<compile_context>
chip_gen: v5e
topology: v5e:2x2
jax: 0.10.0
libtpu: 0.0.40
codegen_flags: <defaults>
</compile_context>

<pallas_src>
import functools

import jax
import jax.numpy as jnp
from jax.experimental import pallas as pl
from jax.experimental.pallas import tpu as pltpu

_LANE = 128


def _round_up(x, m):
    return (x + m - 1) // m * m


def _linear_ae_kernel(x_ref, *refs):
    """Fused 10-layer autoencoder MLP.

    refs = (w1, b1, ..., w10, b10, emb_ref, out_ref)
    Layers 1-5 = encoder (ReLU after 1-4), layers 6-10 = decoder (ReLU after
    6-9).  Each matmul is bf16 x bf16 on the MXU with f32 accumulation; the
    activation is cast back to bf16 between layers.
    """
    wb = refs[:-2]
    emb_ref, out_ref = refs[-2], refs[-1]
    n_layers = len(wb) // 2  # 10

    h = x_ref[...]  # bf16 (TILE_B, pin0)
    for li in range(n_layers):
        w = wb[2 * li][...]       # bf16 (pin, pout)
        b = wb[2 * li + 1][...]   # f32  (1, pout)
        acc = jnp.dot(h, w, preferred_element_type=jnp.float32) + b
        if li == n_layers // 2 - 1:        # encoder output: no ReLU
            emb_ref[...] = acc.astype(emb_ref.dtype)
            h = acc.astype(jnp.bfloat16)   # decoder input
        elif li == n_layers - 1:           # decoder output: no ReLU
            out_ref[...] = acc.astype(out_ref.dtype)
        else:
            h = jnp.maximum(acc, 0.0).astype(jnp.bfloat16)


def prepare_params(enc_params, dec_params):
    """Pad params once to lane-aligned shapes; weights -> bf16, biases -> f32.

    Returns a flat tuple (w1, b1, ..., w10, b10).  Zero padding is exact:
    padded rows/cols stay zero through matmul/bias/ReLU and are sliced off by
    the wrapper.
    """
    flat = []
    for (w, b) in list(enc_params) + list(dec_params):
        din, dout = w.shape
        pin, pout = _round_up(din, _LANE), _round_up(dout, _LANE)
        w_p = jnp.zeros((pin, pout), jnp.bfloat16).at[:din, :dout].set(
            w.astype(jnp.bfloat16))
        b_p = jnp.zeros((1, pout), jnp.float32).at[0, :dout].set(
            b.astype(jnp.float32))
        flat.append(w_p)
        flat.append(b_p)
    return tuple(flat)


@functools.partial(jax.jit, static_argnames=("embedding_dim", "output_dim"))
def linear_ae_forward(x, padded_params, embedding_dim, output_dim):
    """Runs the full LinearAE forward. Returns (embedding, output).

    x:             (B, input_dim) float32
    padded_params: output of prepare_params (cached across calls)
    """
    B, in_dim = x.shape
    weights = padded_params[0::2]
    biases = padded_params[1::2]
    pin0 = weights[0].shape[0]      # padded input width
    pe = weights[4].shape[1]        # padded embedding width (encoder layer 5)
    po = weights[-1].shape[1]       # padded output width    (decoder layer 5)

    # Batch tiling: 256-row tiles (MXU-sized) for large batches; small batches
    # get a single tile padded to a multiple of 16 (bf16 sublane packing).
    if B >= 256:
        tile_b = 256
        bm = _round_up(B, tile_b)
    else:
        bm = _round_up(B, 16)
        tile_b = bm
    n_tiles = bm // tile_b

    x_p = jnp.zeros((bm, pin0), jnp.bfloat16).at[:B, :in_dim].set(
        x.astype(jnp.bfloat16))

    in_specs = [pl.BlockSpec((tile_b, pin0), lambda i: (i, 0))]
    flat_inputs = [x_p]
    for w_p, b_p in zip(weights, biases):
        # Full-array blocks with a constant index_map -> DMA'd once and kept
        # VMEM-resident across all batch tiles.
        in_specs.append(pl.BlockSpec(w_p.shape, lambda i: (0, 0)))
        in_specs.append(pl.BlockSpec(b_p.shape, lambda i: (0, 0)))
        flat_inputs.append(w_p)
        flat_inputs.append(b_p)

    flops = 2 * bm * sum(int(w.shape[0]) * int(w.shape[1]) for w in weights)
    bytes_accessed = (
        x_p.size * 2
        + sum(w.size * 2 for w in weights)
        + sum(b.size * 4 for b in biases)
        + bm * (pe + po) * 4)

    emb_p, out_p = pl.pallas_call(
        _linear_ae_kernel,
        out_shape=(jax.ShapeDtypeStruct((bm, pe), jnp.float32),
                   jax.ShapeDtypeStruct((bm, po), jnp.float32)),
        grid_spec=pltpu.PrefetchScalarGridSpec(
            num_scalar_prefetch=0,
            grid=(n_tiles,),
            in_specs=in_specs,
            out_specs=[pl.BlockSpec((tile_b, pe), lambda i: (i, 0)),
                       pl.BlockSpec((tile_b, po), lambda i: (i, 0))],
        ),
        compiler_params=pltpu.CompilerParams(
            dimension_semantics=("parallel",)),
        cost_estimate=pl.CostEstimate(
            flops=flops, transcendentals=0, bytes_accessed=bytes_accessed),
    )(*flat_inputs)

    return emb_p[:B, :embedding_dim], out_p[:B, :output_dim]


def init_linear_params(key, sizes):
    """Deterministic init mimicking nn.Linear defaults: U(-1/sqrt(fan_in), +)."""
    params = []
    for i in range(len(sizes) - 1):
        fan_in, fan_out = sizes[i], sizes[i + 1]
        key, kw, kb = jax.random.split(key, 3)
        bound = 1.0 / (fan_in ** 0.5)
        w = jax.random.uniform(kw, (fan_in, fan_out), jnp.float32, -bound, bound)
        b = jax.random.uniform(kb, (fan_out,), jnp.float32, -bound, bound)
        params.append((w, b))
    return params


def linear_ae_reference(x, enc_params, dec_params):
    def mlp(h, params):
        n = len(params)
        for i, (w, b) in enumerate(params):
            h = h @ w + b
            if i != n - 1:
                h = jnp.maximum(h, 0.0)
        return h
    emb = mlp(x, enc_params)
    out = mlp(emb, dec_params)
    return emb, out


if __name__ == "__main__":
    INPUT_DIM = 32
    EMBED_DIM = 16
    BATCH = 8

    key = jax.random.PRNGKey(0)
    kx, ke, kd = jax.random.split(key, 3)
    x = jax.random.normal(kx, (BATCH, INPUT_DIM), jnp.float32)

    enc_sizes = [INPUT_DIM, 250, 500, 500, 250, EMBED_DIM]
    dec_sizes = [EMBED_DIM, 250, 500, 500, 250, INPUT_DIM]
    enc_params = init_linear_params(ke, enc_sizes)
    dec_params = init_linear_params(kd, dec_sizes)

    # Pad + cast once; reused for every forward call (no per-call pad HLOs).
    padded_params = prepare_params(enc_params, dec_params)

    emb, out = linear_ae_forward(x, padded_params, EMBED_DIM, INPUT_DIM)
    emb, out = jax.block_until_ready((emb, out))

    emb_ref, out_ref = linear_ae_reference(x, enc_params, dec_params)
    assert emb.shape == (BATCH, EMBED_DIM), emb.shape
    assert out.shape == (BATCH, INPUT_DIM), out.shape
    # bf16 matmuls with f32 accumulation through 10 layers: loosened tolerance
    # vs the pure-f32 reference.
    assert jnp.allclose(emb, emb_ref, atol=5e-2, rtol=5e-2), "embedding mismatch"
    assert jnp.allclose(out, out_ref, atol=5e-2, rtol=5e-2), "output mismatch"

    print("KERNEL_OK")
</pallas_src>

<mosaic_0001>
module attributes {stable_mosaic.version = 11 : i64} {
  func.func @_linear_ae_kernel(%arg0: i32, %arg1: memref<16x128xbf16, #tpu.memory_space<vmem>>, %arg2: memref<128x256xbf16, #tpu.memory_space<vmem>>, %arg3: memref<1x256xf32, #tpu.memory_space<vmem>>, %arg4: memref<256x512xbf16, #tpu.memory_space<vmem>>, %arg5: memref<1x512xf32, #tpu.memory_space<vmem>>, %arg6: memref<512x512xbf16, #tpu.memory_space<vmem>>, %arg7: memref<1x512xf32, #tpu.memory_space<vmem>>, %arg8: memref<512x256xbf16, #tpu.memory_space<vmem>>, %arg9: memref<1x256xf32, #tpu.memory_space<vmem>>, %arg10: memref<256x128xbf16, #tpu.memory_space<vmem>>, %arg11: memref<1x128xf32, #tpu.memory_space<vmem>>, %arg12: memref<128x256xbf16, #tpu.memory_space<vmem>>, %arg13: memref<1x256xf32, #tpu.memory_space<vmem>>, %arg14: memref<256x512xbf16, #tpu.memory_space<vmem>>, %arg15: memref<1x512xf32, #tpu.memory_space<vmem>>, %arg16: memref<512x512xbf16, #tpu.memory_space<vmem>>, %arg17: memref<1x512xf32, #tpu.memory_space<vmem>>, %arg18: memref<512x256xbf16, #tpu.memory_space<vmem>>, %arg19: memref<1x256xf32, #tpu.memory_space<vmem>>, %arg20: memref<256x128xbf16, #tpu.memory_space<vmem>>, %arg21: memref<1x128xf32, #tpu.memory_space<vmem>>, %arg22: memref<16x128xf32, #tpu.memory_space<vmem>>, %arg23: memref<16x128xf32, #tpu.memory_space<vmem>>) attributes {dimension_semantics = [#tpu.dimension_semantics<parallel>], iteration_bounds = array<i64: 1>, scalar_prefetch = 0 : i64, scratch_operands = 0 : i64, tpu.core_type = #tpu.core_type<tc>, window_params = [{transform_indices = @transform_0, window_bounds = array<i64: 16, 128>}, {pipeline_mode = #tpu.pipeline_mode<synchronous>, transform_indices = @transform_1, window_bounds = array<i64: 128, 256>}, {pipeline_mode = #tpu.pipeline_mode<synchronous>, transform_indices = @transform_2, window_bounds = array<i64: 1, 256>}, {pipeline_mode = #tpu.pipeline_mode<synchronous>, transform_indices = @transform_3, window_bounds = array<i64: 256, 512>}, {pipeline_mode = #tpu.pipeline_mode<synchronous>, transform_indices = @transform_4, window_bounds = array<i64: 1, 512>}, {pipeline_mode = #tpu.pipeline_mode<synchronous>, transform_indices = @transform_5, window_bounds = array<i64: 512, 512>}, {pipeline_mode = #tpu.pipeline_mode<synchronous>, transform_indices = @transform_6, window_bounds = array<i64: 1, 512>}, {pipeline_mode = #tpu.pipeline_mode<synchronous>, transform_indices = @transform_7, window_bounds = array<i64: 512, 256>}, {pipeline_mode = #tpu.pipeline_mode<synchronous>, transform_indices = @transform_8, window_bounds = array<i64: 1, 256>}, {pipeline_mode = #tpu.pipeline_mode<synchronous>, transform_indices = @transform_9, window_bounds = array<i64: 256, 128>}, {pipeline_mode = #tpu.pipeline_mode<synchronous>, transform_indices = @transform_10, window_bounds = array<i64: 1, 128>}, {pipeline_mode = #tpu.pipeline_mode<synchronous>, transform_indices = @transform_11, window_bounds = array<i64: 128, 256>}, {pipeline_mode = #tpu.pipeline_mode<synchronous>, transform_indices = @transform_12, window_bounds = array<i64: 1, 256>}, {pipeline_mode = #tpu.pipeline_mode<synchronous>, transform_indices = @transform_13, window_bounds = array<i64: 256, 512>}, {pipeline_mode = #tpu.pipeline_mode<synchronous>, transform_indices = @transform_14, window_bounds = array<i64: 1, 512>}, {pipeline_mode = #tpu.pipeline_mode<synchronous>, transform_indices = @transform_15, window_bounds = array<i64: 512, 512>}, {pipeline_mode = #tpu.pipeline_mode<synchronous>, transform_indices = @transform_16, window_bounds = array<i64: 1, 512>}, {pipeline_mode = #tpu.pipeline_mode<synchronous>, transform_indices = @transform_17, window_bounds = array<i64: 512, 256>}, {pipeline_mode = #tpu.pipeline_mode<synchronous>, transform_indices = @transform_18, window_bounds = array<i64: 1, 256>}, {pipeline_mode = #tpu.pipeline_mode<synchronous>, transform_indices = @transform_19, window_bounds = array<i64: 256, 128>}, {pipeline_mode = #tpu.pipeline_mode<synchronous>, transform_indices = @transform_20, window_bounds = array<i64: 1, 128>}, {transform_indices = @transform_21, window_bounds = array<i64: 16, 128>}, {transform_indices = @transform_22, window_bounds = array<i64: 16, 128>}]} {
    %c0 = arith.constant 0 : index
    %c0_0 = arith.constant 0 : index
    %0 = vector.load %arg1[%c0, %c0_0] : memref<16x128xbf16, #tpu.memory_space<vmem>>, vector<16x128xbf16>
    %c0_1 = arith.constant 0 : index
    %c0_2 = arith.constant 0 : index
    %1 = vector.load %arg2[%c0_1, %c0_2] : memref<128x256xbf16, #tpu.memory_space<vmem>>, vector<128x256xbf16>
    %c0_3 = arith.constant 0 : index
    %c0_4 = arith.constant 0 : index
    %2 = vector.load %arg3[%c0_3, %c0_4] : memref<1x256xf32, #tpu.memory_space<vmem>>, vector<1x256xf32>
    %cst = arith.constant dense<0.000000e+00> : vector<16x256xf32>
    %3 = tpu.matmul %0, %1, %cst {dimension_numbers = #tpu.dot_dimension_numbers<[1], [0], [0], [1], [0, 0, 1, 1], [], []>} : vector<16x128xbf16>, vector<128x256xbf16>, vector<16x256xf32> -> vector<16x256xf32>
    %4 = vector.broadcast %2 : vector<1x256xf32> to vector<16x256xf32>
    %5 = arith.addf %3, %4 : vector<16x256xf32>
    %cst_5 = arith.constant 0.000000e+00 : f32
    %6 = vector.broadcast %cst_5 : f32 to vector<16x256xf32>
    %7 = arith.maximumf %5, %6 : vector<16x256xf32>
    %8 = arith.truncf %7 : vector<16x256xf32> to vector<16x256xbf16>
    %c0_6 = arith.constant 0 : index
    %c0_7 = arith.constant 0 : index
    %9 = vector.load %arg4[%c0_6, %c0_7] : memref<256x512xbf16, #tpu.memory_space<vmem>>, vector<256x512xbf16>
    %c0_8 = arith.constant 0 : index
    %c0_9 = arith.constant 0 : index
    %10 = vector.load %arg5[%c0_8, %c0_9] : memref<1x512xf32, #tpu.memory_space<vmem>>, vector<1x512xf32>
    %cst_10 = arith.constant dense<0.000000e+00> : vector<16x512xf32>
    %11 = tpu.matmul %8, %9, %cst_10 {dimension_numbers = #tpu.dot_dimension_numbers<[1], [0], [0], [1], [0, 0, 1, 1], [], []>} : vector<16x256xbf16>, vector<256x512xbf16>, vector<16x512xf32> -> vector<16x512xf32>
    %12 = vector.broadcast %10 : vector<1x512xf32> to vector<16x512xf32>
    %13 = arith.addf %11, %12 : vector<16x512xf32>
    %cst_11 = arith.constant 0.000000e+00 : f32
    %14 = vector.broadcast %cst_11 : f32 to vector<16x512xf32>
    %15 = arith.maximumf %13, %14 : vector<16x512xf32>
    %16 = arith.truncf %15 : vector<16x512xf32> to vector<16x512xbf16>
    %c0_12 = arith.constant 0 : index
    %c0_13 = arith.constant 0 : index
    %17 = vector.load %arg6[%c0_12, %c0_13] : memref<512x512xbf16, #tpu.memory_space<vmem>>, vector<512x512xbf16>
    %c0_14 = arith.constant 0 : index
    %c0_15 = arith.constant 0 : index
    %18 = vector.load %arg7[%c0_14, %c0_15] : memref<1x512xf32, #tpu.memory_space<vmem>>, vector<1x512xf32>
    %cst_16 = arith.constant dense<0.000000e+00> : vector<16x512xf32>
    %19 = tpu.matmul %16, %17, %cst_16 {dimension_numbers = #tpu.dot_dimension_numbers<[1], [0], [0], [1], [0, 0, 1, 1], [], []>} : vector<16x512xbf16>, vector<512x512xbf16>, vector<16x512xf32> -> vector<16x512xf32>
    %20 = vector.broadcast %18 : vector<1x512xf32> to vector<16x512xf32>
    %21 = arith.addf %19, %20 : vector<16x512xf32>
    %cst_17 = arith.constant 0.000000e+00 : f32
    %22 = vector.broadcast %cst_17 : f32 to vector<16x512xf32>
    %23 = arith.maximumf %21, %22 : vector<16x512xf32>
    %24 = arith.truncf %23 : vector<16x512xf32> to vector<16x512xbf16>
    %c0_18 = arith.constant 0 : index
    %c0_19 = arith.constant 0 : index
    %25 = vector.load %arg8[%c0_18, %c0_19] : memref<512x256xbf16, #tpu.memory_space<vmem>>, vector<512x256xbf16>
    %c0_20 = arith.constant 0 : index
    %c0_21 = arith.constant 0 : index
    %26 = vector.load %arg9[%c0_20, %c0_21] : memref<1x256xf32, #tpu.memory_space<vmem>>, vector<1x256xf32>
    %cst_22 = arith.constant dense<0.000000e+00> : vector<16x256xf32>
    %27 = tpu.matmul %24, %25, %cst_22 {dimension_numbers = #tpu.dot_dimension_numbers<[1], [0], [0], [1], [0, 0, 1, 1], [], []>} : vector<16x512xbf16>, vector<512x256xbf16>, vector<16x256xf32> -> vector<16x256xf32>
    %28 = vector.broadcast %26 : vector<1x256xf32> to vector<16x256xf32>
    %29 = arith.addf %27, %28 : vector<16x256xf32>
    %cst_23 = arith.constant 0.000000e+00 : f32
    %30 = vector.broadcast %cst_23 : f32 to vector<16x256xf32>
    %31 = arith.maximumf %29, %30 : vector<16x256xf32>
    %32 = arith.truncf %31 : vector<16x256xf32> to vector<16x256xbf16>
    %c0_24 = arith.constant 0 : index
    %c0_25 = arith.constant 0 : index
    %33 = vector.load %arg10[%c0_24, %c0_25] : memref<256x128xbf16, #tpu.memory_space<vmem>>, vector<256x128xbf16>
    %c0_26 = arith.constant 0 : index
    %c0_27 = arith.constant 0 : index
    %34 = vector.load %arg11[%c0_26, %c0_27] : memref<1x128xf32, #tpu.memory_space<vmem>>, vector<1x128xf32>
    %cst_28 = arith.constant dense<0.000000e+00> : vector<16x128xf32>
    %35 = tpu.matmul %32, %33, %cst_28 {dimension_numbers = #tpu.dot_dimension_numbers<[1], [0], [0], [1], [0, 0, 1, 1], [], []>} : vector<16x256xbf16>, vector<256x128xbf16>, vector<16x128xf32> -> vector<16x128xf32>
    %36 = vector.broadcast %34 : vector<1x128xf32> to vector<16x128xf32>
    %37 = arith.addf %35, %36 : vector<16x128xf32>
    %c0_29 = arith.constant 0 : index
    %c0_30 = arith.constant 0 : index
    %38 = vector.load %arg22[%c0_29, %c0_30] : memref<16x128xf32, #tpu.memory_space<vmem>>, vector<16x128xf32>
    tpu.vector_store %arg22[%c0_29, %c0_30], %37 {strides = array<i32>} : memref<16x128xf32, #tpu.memory_space<vmem>>, vector<16x128xf32>,
    %39 = arith.truncf %37 : vector<16x128xf32> to vector<16x128xbf16>
    %c0_31 = arith.constant 0 : index
    %c0_32 = arith.constant 0 : index
    %40 = vector.load %arg12[%c0_31, %c0_32] : memref<128x256xbf16, #tpu.memory_space<vmem>>, vector<128x256xbf16>
    %c0_33 = arith.constant 0 : index
    %c0_34 = arith.constant 0 : index
    %41 = vector.load %arg13[%c0_33, %c0_34] : memref<1x256xf32, #tpu.memory_space<vmem>>, vector<1x256xf32>
    %cst_35 = arith.constant dense<0.000000e+00> : vector<16x256xf32>
    %42 = tpu.matmul %39, %40, %cst_35 {dimension_numbers = #tpu.dot_dimension_numbers<[1], [0], [0], [1], [0, 0, 1, 1], [], []>} : vector<16x128xbf16>, vector<128x256xbf16>, vector<16x256xf32> -> vector<16x256xf32>
    %43 = vector.broadcast %41 : vector<1x256xf32> to vector<16x256xf32>
    %44 = arith.addf %42, %43 : vector<16x256xf32>
    %cst_36 = arith.constant 0.000000e+00 : f32
    %45 = vector.broadcast %cst_36 : f32 to vector<16x256xf32>
    %46 = arith.maximumf %44, %45 : vector<16x256xf32>
    %47 = arith.truncf %46 : vector<16x256xf32> to vector<16x256xbf16>
    %c0_37 = arith.constant 0 : index
    %c0_38 = arith.constant 0 : index
    %48 = vector.load %arg14[%c0_37, %c0_38] : memref<256x512xbf16, #tpu.memory_space<vmem>>, vector<256x512xbf16>
    %c0_39 = arith.constant 0 : index
    %c0_40 = arith.constant 0 : index
    %49 = vector.load %arg15[%c0_39, %c0_40] : memref<1x512xf32, #tpu.memory_space<vmem>>, vector<1x512xf32>
    %cst_41 = arith.constant dense<0.000000e+00> : vector<16x512xf32>
    %50 = tpu.matmul %47, %48, %cst_41 {dimension_numbers = #tpu.dot_dimension_numbers<[1], [0], [0], [1], [0, 0, 1, 1], [], []>} : vector<16x256xbf16>, vector<256x512xbf16>, vector<16x512xf32> -> vector<16x512xf32>
    %51 = vector.broadcast %49 : vector<1x512xf32> to vector<16x512xf32>
    %52 = arith.addf %50, %51 : vector<16x512xf32>
    %cst_42 = arith.constant 0.000000e+00 : f32
    %53 = vector.broadcast %cst_42 : f32 to vector<16x512xf32>
    %54 = arith.maximumf %52, %53 : vector<16x512xf32>
    %55 = arith.truncf %54 : vector<16x512xf32> to vector<16x512xbf16>
    %c0_43 = arith.constant 0 : index
    %c0_44 = arith.constant 0 : index
    %56 = vector.load %arg16[%c0_43, %c0_44] : memref<512x512xbf16, #tpu.memory_space<vmem>>, vector<512x512xbf16>
    %c0_45 = arith.constant 0 : index
    %c0_46 = arith.constant 0 : index
    %57 = vector.load %arg17[%c0_45, %c0_46] : memref<1x512xf32, #tpu.memory_space<vmem>>, vector<1x512xf32>
    %cst_47 = arith.constant dense<0.000000e+00> : vector<16x512xf32>
    %58 = tpu.matmul %55, %56, %cst_47 {dimension_numbers = #tpu.dot_dimension_numbers<[1], [0], [0], [1], [0, 0, 1, 1], [], []>} : vector<16x512xbf16>, vector<512x512xbf16>, vector<16x512xf32> -> vector<16x512xf32>
    %59 = vector.broadcast %57 : vector<1x512xf32> to vector<16x512xf32>
    %60 = arith.addf %58, %59 : vector<16x512xf32>
    %cst_48 = arith.constant 0.000000e+00 : f32
    %61 = vector.broadcast %cst_48 : f32 to vector<16x512xf32>
    %62 = arith.maximumf %60, %61 : vector<16x512xf32>
    %63 = arith.truncf %62 : vector<16x512xf32> to vector<16x512xbf16>
    %c0_49 = arith.constant 0 : index
    %c0_50 = arith.constant 0 : index
    %64 = vector.load %arg18[%c0_49, %c0_50] : memref<512x256xbf16, #tpu.memory_space<vmem>>, vector<512x256xbf16>
    %c0_51 = arith.constant 0 : index
    %c0_52 = arith.constant 0 : index
    %65 = vector.load %arg19[%c0_51, %c0_52] : memref<1x256xf32, #tpu.memory_space<vmem>>, vector<1x256xf32>
    %cst_53 = arith.constant dense<0.000000e+00> : vector<16x256xf32>
    %66 = tpu.matmul %63, %64, %cst_53 {dimension_numbers = #tpu.dot_dimension_numbers<[1], [0], [0], [1], [0, 0, 1, 1], [], []>} : vector<16x512xbf16>, vector<512x256xbf16>, vector<16x256xf32> -> vector<16x256xf32>
    %67 = vector.broadcast %65 : vector<1x256xf32> to vector<16x256xf32>
    %68 = arith.addf %66, %67 : vector<16x256xf32>
    %cst_54 = arith.constant 0.000000e+00 : f32
    %69 = vector.broadcast %cst_54 : f32 to vector<16x256xf32>
    %70 = arith.maximumf %68, %69 : vector<16x256xf32>
    %71 = arith.truncf %70 : vector<16x256xf32> to vector<16x256xbf16>
    %c0_55 = arith.constant 0 : index
    %c0_56 = arith.constant 0 : index
    %72 = vector.load %arg20[%c0_55, %c0_56] : memref<256x128xbf16, #tpu.memory_space<vmem>>, vector<256x128xbf16>
    %c0_57 = arith.constant 0 : index
    %c0_58 = arith.constant 0 : index
    %73 = vector.load %arg21[%c0_57, %c0_58] : memref<1x128xf32, #tpu.memory_space<vmem>>, vector<1x128xf32>
    %cst_59 = arith.constant dense<0.000000e+00> : vector<16x128xf32>
    %74 = tpu.matmul %71, %72, %cst_59 {dimension_numbers = #tpu.dot_dimension_numbers<[1], [0], [0], [1], [0, 0, 1, 1], [], []>} : vector<16x256xbf16>, vector<256x128xbf16>, vector<16x128xf32> -> vector<16x128xf32>
    %75 = vector.broadcast %73 : vector<1x128xf32> to vector<16x128xf32>
    %76 = arith.addf %74, %75 : vector<16x128xf32>
    %c0_60 = arith.constant 0 : index
    %c0_61 = arith.constant 0 : index
    %77 = vector.load %arg23[%c0_60, %c0_61] : memref<16x128xf32, #tpu.memory_space<vmem>>, vector<16x128xf32>
    tpu.vector_store %arg23[%c0_60, %c0_61], %76 {strides = array<i32>} : memref<16x128xf32, #tpu.memory_space<vmem>>, vector<16x128xf32>,
    return
  }
  func.func @transform_0(%arg0: i32) -> (i32, i32) {
    %c0_i32 = arith.constant 0 : i32
    %c0_i32_0 = arith.constant 0 : i32
    return %arg0, %c0_i32 : i32, i32
  }
  func.func @transform_1(%arg0: i32) -> (i32, i32) {
    %c0_i32 = arith.constant 0 : i32
    %c0_i32_0 = arith.constant 0 : i32
    %c0_i32_1 = arith.constant 0 : i32
    return %c0_i32, %c0_i32_0 : i32, i32
  }
  func.func @transform_2(%arg0: i32) -> (i32, i32) {
    %c0_i32 = arith.constant 0 : i32
    %c0_i32_0 = arith.constant 0 : i32
    %c0_i32_1 = arith.constant 0 : i32
    return %c0_i32, %c0_i32_0 : i32, i32
  }
  func.func @transform_3(%arg0: i32) -> (i32, i32) {
    %c0_i32 = arith.constant 0 : i32
    %c0_i32_0 = arith.constant 0 : i32
    %c0_i32_1 = arith.constant 0 : i32
    return %c0_i32, %c0_i32_0 : i32, i32
  }
  func.func @transform_4(%arg0: i32) -> (i32, i32) {
    %c0_i32 = arith.constant 0 : i32
    %c0_i32_0 = arith.constant 0 : i32
    %c0_i32_1 = arith.constant 0 : i32
    return %c0_i32, %c0_i32_0 : i32, i32
  }
  func.func @transform_5(%arg0: i32) -> (i32, i32) {
    %c0_i32 = arith.constant 0 : i32
    %c0_i32_0 = arith.constant 0 : i32
    %c0_i32_1 = arith.constant 0 : i32
    return %c0_i32, %c0_i32_0 : i32, i32
  }
  func.func @transform_6(%arg0: i32) -> (i32, i32) {
    %c0_i32 = arith.constant 0 : i32
    %c0_i32_0 = arith.constant 0 : i32
    %c0_i32_1 = arith.constant 0 : i32
    return %c0_i32, %c0_i32_0 : i32, i32
  }
  func.func @transform_7(%arg0: i32) -> (i32, i32) {
    %c0_i32 = arith.constant 0 : i32
    %c0_i32_0 = arith.constant 0 : i32
    %c0_i32_1 = arith.constant 0 : i32
    return %c0_i32, %c0_i32_0 : i32, i32
  }
  func.func @transform_8(%arg0: i32) -> (i32, i32) {
    %c0_i32 = arith.constant 0 : i32
    %c0_i32_0 = arith.constant 0 : i32
    %c0_i32_1 = arith.constant 0 : i32
    return %c0_i32, %c0_i32_0 : i32, i32
  }
  func.func @transform_9(%arg0: i32) -> (i32, i32) {
    %c0_i32 = arith.constant 0 : i32
    %c0_i32_0 = arith.constant 0 : i32
    %c0_i32_1 = arith.constant 0 : i32
    return %c0_i32, %c0_i32_0 : i32, i32
  }
  func.func @transform_10(%arg0: i32) -> (i32, i32) {
    %c0_i32 = arith.constant 0 : i32
    %c0_i32_0 = arith.constant 0 : i32
    %c0_i32_1 = arith.constant 0 : i32
    return %c0_i32, %c0_i32_0 : i32, i32
  }
  func.func @transform_11(%arg0: i32) -> (i32, i32) {
    %c0_i32 = arith.constant 0 : i32
    %c0_i32_0 = arith.constant 0 : i32
    %c0_i32_1 = arith.constant 0 : i32
    return %c0_i32, %c0_i32_0 : i32, i32
  }
  func.func @transform_12(%arg0: i32) -> (i32, i32) {
    %c0_i32 = arith.constant 0 : i32
    %c0_i32_0 = arith.constant 0 : i32
    %c0_i32_1 = arith.constant 0 : i32
    return %c0_i32, %c0_i32_0 : i32, i32
  }
  func.func @transform_13(%arg0: i32) -> (i32, i32) {
    %c0_i32 = arith.constant 0 : i32
    %c0_i32_0 = arith.constant 0 : i32
    %c0_i32_1 = arith.constant 0 : i32
    return %c0_i32, %c0_i32_0 : i32, i32
  }
  func.func @transform_14(%arg0: i32) -> (i32, i32) {
    %c0_i32 = arith.constant 0 : i32
    %c0_i32_0 = arith.constant 0 : i32
    %c0_i32_1 = arith.constant 0 : i32
    return %c0_i32, %c0_i32_0 : i32, i32
  }
  func.func @transform_15(%arg0: i32) -> (i32, i32) {
    %c0_i32 = arith.constant 0 : i32
    %c0_i32_0 = arith.constant 0 : i32
    %c0_i32_1 = arith.constant 0 : i32
    return %c0_i32, %c0_i32_0 : i32, i32
  }
  func.func @transform_16(%arg0: i32) -> (i32, i32) {
    %c0_i32 = arith.constant 0 : i32
    %c0_i32_0 = arith.constant 0 : i32
    %c0_i32_1 = arith.constant 0 : i32
    return %c0_i32, %c0_i32_0 : i32, i32
  }
  func.func @transform_17(%arg0: i32) -> (i32, i32) {
    %c0_i32 = arith.constant 0 : i32
    %c0_i32_0 = arith.constant 0 : i32
    %c0_i32_1 = arith.constant 0 : i32
    return %c0_i32, %c0_i32_0 : i32, i32
  }
  func.func @transform_18(%arg0: i32) -> (i32, i32) {
    %c0_i32 = arith.constant 0 : i32
    %c0_i32_0 = arith.constant 0 : i32
    %c0_i32_1 = arith.constant 0 : i32
    return %c0_i32, %c0_i32_0 : i32, i32
  }
  func.func @transform_19(%arg0: i32) -> (i32, i32) {
    %c0_i32 = arith.constant 0 : i32
    %c0_i32_0 = arith.constant 0 : i32
    %c0_i32_1 = arith.constant 0 : i32
    return %c0_i32, %c0_i32_0 : i32, i32
  }
  func.func @transform_20(%arg0: i32) -> (i32, i32) {
    %c0_i32 = arith.constant 0 : i32
    %c0_i32_0 = arith.constant 0 : i32
    %c0_i32_1 = arith.constant 0 : i32
    return %c0_i32, %c0_i32_0 : i32, i32
  }
  func.func @transform_21(%arg0: i32) -> (i32, i32) {
    %c0_i32 = arith.constant 0 : i32
    %c0_i32_0 = arith.constant 0 : i32
    return %arg0, %c0_i32 : i32, i32
  }
  func.func @transform_22(%arg0: i32) -> (i32, i32) {
    %c0_i32 = arith.constant 0 : i32
    %c0_i32_0 = arith.constant 0 : i32
    return %arg0, %c0_i32 : i32, i32
  }
}

</mosaic_0001>

<bundles_post_ra>
// kernel: linear_ae_forward.1
= control target key start
LH: loop header
LB: loop body
LE: loop exit
PB: predicated region body
PF: predicated region fallthrough
CT: control target
= control target key end

     0   :  { %s8420_s0 = inlined_call_operand.vmem [shape: bf16[16,128], index: 0, kind: input, shape index: {}]   ;;  %s8421_s1 = inlined_call_operand.hbm [shape: bf16[128,256], index: 1, kind: input, shape index: {}]   ;;  %s8422_s2 = inlined_call_operand.vmem [shape: f32[1,256], index: 2, kind: input, shape index: {}]   ;;  %s8423_s3 = inlined_call_operand.hbm [shape: bf16[256,512], index: 3, kind: input, shape index: {}]   ;;  %s8424_s4 = inlined_call_operand.vmem [shape: f32[1,512], index: 4, kind: input, shape index: {}]   ;;  %s8425_s5 = inlined_call_operand.hbm [shape: bf16[512,512], index: 5, kind: input, shape index: {}]   ;;  %s8426_s6 = inlined_call_operand.vmem [shape: f32[1,512], index: 6, kind: input, shape index: {}]   ;;  %s8427_s7 = inlined_call_operand.hbm [shape: bf16[512,256], index: 7, kind: input, shape index: {}]   ;;  %s8428_s8 = inlined_call_operand.vmem [shape: f32[1,256], index: 8, kind: input, shape index: {}]   ;;  %s8429_s9 = inlined_call_operand.hbm [shape: bf16[256,128], index: 9, kind: input, shape index: {}]   ;;  %s8430_s10 = inlined_call_operand.vmem [shape: f32[1,128], index: 10, kind: input, shape index: {}]   ;;  %s8431_s11 = inlined_call_operand.hbm [shape: bf16[128,256], index: 11, kind: input, shape index: {}]   ;;  %s8432_s12 = inlined_call_operand.vmem [shape: f32[1,256], index: 12, kind: input, shape index: {}]   ;;  %s8433_s13 = inlined_call_operand.hbm [shape: bf16[256,512], index: 13, kind: input, shape index: {}]   ;;  %s8434_s14 = inlined_call_operand.vmem [shape: f32[1,512], index: 14, kind: input, shape index: {}]   ;;  %s8435_s15 = inlined_call_operand.hbm [shape: bf16[512,512], index: 15, kind: input, shape index: {}]   ;;  %s8436_s16 = inlined_call_operand.vmem [shape: f32[1,512], index: 16, kind: input, shape index: {}]   ;;  %s8437_s17 = inlined_call_operand.hbm [shape: bf16[512,256], index: 17, kind: input, shape index: {}]   ;;  %s8438_s18 = inlined_call_operand.vmem [shape: f32[1,256], index: 18, kind: input, shape index: {}]   ;;  %s8439_s19 = inlined_call_operand.hbm [shape: bf16[256,128], index: 19, kind: input, shape index: {}]   ;;  %s8440_s20 = inlined_call_operand.vmem [shape: f32[1,128], index: 20, kind: input, shape index: {}]   ;;  %s8441_s21 = inlined_call_operand.vmem [shape: f32[16,128], index: 21, kind: output, shape index: {0}]   ;;  %s8442_s22 = inlined_call_operand.vmem [shape: f32[16,128], index: 22, kind: output, shape index: {1}]  }
   0x1   :  { %8446 = sst [smem:[#allocation24_spill]] %s8420_s0 }
   0x2   :  { %8447 = sst [smem:[#allocation25_spill]] %s8421_s1 }
   0x3   :  { %8448 = sst [smem:[#allocation26_spill]] %s8422_s2 }
   0x4   :  { %8449 = sst [smem:[#allocation27_spill]] %s8423_s3 }
   0x5   :  { %8450 = sst [smem:[#allocation28_spill]] %s8424_s4 }
   0x6   :  { %8451 = sst [smem:[#allocation29_spill]] %s8425_s5 }
   0x7   :  { %8452 = sst [smem:[#allocation30_spill]] %s8426_s6 }
   0x8   :  { %8453 = sst [smem:[#allocation31_spill]] %s8442_s22 }
   0x9   :  { %28 = vsyncpa [#allocation3], 0 }
   0xa   :  { %29 = vsyncpa [#allocation5], 0 }
   0xb   :  { %30 = vsyncpa [#allocation8], 0 }
   0xc   :  { %31 = vsyncpa [#allocation11], 0 }
   0xd   :  { %32 = vsyncpa [#allocation14], 0  ;;  %s8454_s29 = sld [smem:[#allocation27_spill]] }
  0x13   :  { %s55_s30 = sshll.u32 %s8454_s29, 4  ;;  %s56_s30 = int_to_ptr.hbm [resolvable:$true] %s55_s30 }
  0x14   :  { %33 = vsyncpa [#allocation17], 0  ;;  %s8080_s4 = smov [#allocation4]   ;;  %s8443_s23 = smov 256  }
  0x15   :  { %s57_s0 = sshll.u32 %s8080_s4, 4  ;;  %s8082_s1 = smov 16   ;;  %s58_s0 = int_to_ptr.vmem [resolvable:$true] %s57_s0 }
  0x16   :  { %63 = dma.hbm_to_vmem [thread:$0]  %s56_s30, 8192, %s58_s0, [#allocation5], %s8443_s23, %s8443_s23, %s8082_s1  }
  0x17   :  { %s85_s6 = sshll.u32 %s8427_s7, 4  ;;  %s8083_s25 = smov [#allocation7]   ;;  %s86_s6 = int_to_ptr.hbm [resolvable:$true] %s85_s6 }
  0x18   :  { %s87_s26 = sshll.u32 %s8083_s25, 4  ;;  %s115_s3 = sshll.u32 %s8431_s11, 4  ;;  %s88_s26 = int_to_ptr.vmem [resolvable:$true] %s87_s26  ;;  %s116_s3 = int_to_ptr.hbm [resolvable:$true] %s115_s3 }
  0x19   :  { %s8084_s28 = smov 128   ;;  %s8085_s29 = smov 8  }
  0x1a   :  { %93 = dma.hbm_to_vmem [thread:$0]  %s86_s6, 8192, %s88_s26, [#allocation8], %s8084_s28, %s8084_s28, %s8085_s29  }
  0x1b   :  { %s145_s0 = sshll.u32 %s8435_s15, 4  ;;  %s8086_s7 = smov [#allocation10]   ;;  %s146_s0 = int_to_ptr.hbm [resolvable:$true] %s145_s0 }
  0x1c   :  { %s117_s5 = sshll.u32 %s8086_s7, 4  ;;  %s8087_s11 = smov [#allocation13]   ;;  %s118_s5 = int_to_ptr.vmem [resolvable:$true] %s117_s5 }
  0x1d   :  { %123 = dma.hbm_to_vmem [thread:$0]  %s116_s3, 2048, %s118_s5, [#allocation11], %s8084_s28, %s8084_s28, %s8085_s29  }
  0x1e   :  { %s147_s24 = sshll.u32 %s8087_s11, 4  ;;  %s8455_s27 = sld [smem:[#allocation25_spill]]  ;;  %s148_s24 = int_to_ptr.vmem [resolvable:$true] %s147_s24 }
  0x1f   :  { %s8456_s6 = smov 256   ;;  %s8457_s30 = sld [smem:[#allocation29_spill]] }
  0x20   :  { %153 = dma.hbm_to_vmem [thread:$0]  %s146_s0, 16384, %s148_s24, [#allocation14], %s8456_s6, %s8456_s6, %s8082_s1  }
  0x21   :  { %s8088_s7 = smov [#allocation2]   ;;  %s8089_s3 = smov [#allocation6]  }
  0x22   :  { %s42_s22 = sshll.u32 %s8088_s7, 4  ;;  %s72_s5 = sshll.u32 %s8089_s3, 4  ;;  %s43_s22 = int_to_ptr.vmem [resolvable:$true] %s42_s22  ;;  %s73_s5 = int_to_ptr.vmem [resolvable:$true] %s72_s5 }
  0x23   :  { %s100_s2 = sshll.u32 %s8429_s9, 4  ;;  %s8090_s0 = smov [#allocation9]   ;;  %s101_s2 = int_to_ptr.hbm [resolvable:$true] %s100_s2 }
  0x24   :  { %s40_s23 = sshll.u32 %s8455_s27, 4  ;;  %s102_s24 = sshll.u32 %s8090_s0, 4  ;;  %s41_s23 = int_to_ptr.hbm [resolvable:$true] %s40_s23  ;;  %s103_s24 = int_to_ptr.vmem [resolvable:$true] %s102_s24 }
  0x25   :  { %s70_s4 = sshll.u32 %s8457_s30, 4  ;;  %s130_s26 = sshll.u32 %s8433_s13, 4  ;;  %s71_s4 = int_to_ptr.hbm [resolvable:$true] %s70_s4  ;;  %s131_s26 = int_to_ptr.hbm [resolvable:$true] %s130_s26 }
  0x26   :  { %48 = dma.hbm_to_vmem [thread:$0]  %s41_s23, 2048, %s43_s22, [#allocation3], %s8084_s28, %s8084_s28, %s8085_s29  }
  0x27   :  { %78 = dma.hbm_to_vmem [thread:$0]  %s71_s4, 16384, %s73_s5, [#allocation5], %s8456_s6, %s8456_s6, %s8082_s1  }
  0x28   :  { %s8091_s22 = smov 64   ;;  %s8092_s23 = smov 4  }
  0x29   :  { %108 = dma.hbm_to_vmem [thread:$0]  %s101_s2, 2048, %s103_s24, [#allocation8], %s8091_s22, %s8091_s22, %s8092_s23  }
  0x2a   :  { %s8093_s30 = smov [#allocation12]   ;;  %s160_s11 = sshll.u32 %s8437_s17, 4  ;;  %s161_s11 = int_to_ptr.hbm [resolvable:$true] %s160_s11 }
  0x2b   :  { %s132_s7 = sshll.u32 %s8093_s30, 4  ;;  %s175_s13 = sshll.u32 %s8439_s19, 4  ;;  %s133_s7 = int_to_ptr.vmem [resolvable:$true] %s132_s7  ;;  %s176_s13 = int_to_ptr.hbm [resolvable:$true] %s175_s13 }
  0x2c   :  { %138 = dma.hbm_to_vmem [thread:$0]  %s131_s26, 8192, %s133_s7, [#allocation11], %s8456_s6, %s8456_s6, %s8082_s1  }
  0x2d   :  { %s8094_s25 = smov [#allocation15]   ;;  %s8095_s2 = smov [#allocation16]  }
  0x2e   :  { %s162_s0 = sshll.u32 %s8094_s25, 4  ;;  %s177_s17 = sshll.u32 %s8095_s2, 4  ;;  %s163_s0 = int_to_ptr.vmem [resolvable:$true] %s162_s0  ;;  %s178_s17 = int_to_ptr.vmem [resolvable:$true] %s177_s17 }
  0x2f   :  { %168 = dma.hbm_to_vmem [thread:$0]  %s161_s11, 8192, %s163_s0, [#allocation14], %s8084_s28, %s8084_s28, %s8085_s29  }
  0x30   :  { %183 = dma.hbm_to_vmem [thread:$0]  %s176_s13, 2048, %s178_s17, [#allocation17], %s8091_s22, %s8091_s22, %s8092_s23  }
  0x31   :  { %8068 = dma.done.wait [#allocation3], 2048  }
  0x32   :  { %8069 = vsyncadd [#allocation3], 4294965248 }
  0x33   :  { %8070 = dma.done.wait [#allocation5], 24576  }
  0x34   :  { %8071 = vsyncadd [#allocation5], 4294942720 }
  0x35   :  { %8072 = dma.done.wait [#allocation8], 10240  }
  0x36   :  { %8073 = vsyncadd [#allocation8], 4294957056 }
  0x37   :  { %8074 = dma.done.wait [#allocation11], 10240  }
  0x38   :  { %8075 = vsyncadd [#allocation11], 4294957056 }
  0x39   :  { %8076 = dma.done.wait [#allocation14], 24576  }
  0x3a   :  { %8077 = vsyncadd [#allocation14], 4294942720 }
  0x3b   :  { %8078 = dma.done.wait [#allocation17], 2048  }
  0x3c   :  { %8079 = vsyncadd [#allocation17], 4294965248  ;;  %v4987_v0 = vld [vmem:[#allocation2 + $0x70] sm:$0xf]  ;;  %v7249_v1 = vld [vmem:[#allocation2 + $0x74] sm:$0xf0] }
  0x3d   :  { %v7248_v2 = vld [vmem:[#allocation2 + $0x74] sm:$0xf]  ;;  %v4988_v3 = vor.u32 %v7249_v1, %v4987_v0  ;;  %v4989_v4 = vld [vmem:[#allocation2 + $0x78] sm:$0xf0]  ;;  %v4979_v5 = vld [vmem:[#allocation2 + $0x60] sm:$0xf] }
  0x3e   :  { %v7247_v6 = vld [vmem:[#allocation2 + $0x64] sm:$0xf0]  ;;  %v4992_v7 = vor.u32 %v7248_v2, %v4989_v4  ;;  %v7246_v8 = vld [vmem:[#allocation2 + $0x64] sm:$0xf]  ;;  %v4981_v9 = vld [vmem:[#allocation2 + $0x68] sm:$0xf0] }
  0x3f   :  { %336 = vmatpush.bf16.msra.mxu0 %v4988_v3  ;;  %v4980_v10 = vor.u32 %v7247_v6, %v4979_v5  ;;  %v4984_v11 = vor.u32 %v7246_v8, %v4981_v9  ;;  %v4971_v12 = vld [vmem:[#allocation2 + $0x50] sm:$0xf]  ;;  %v7245_v13 = vld [vmem:[#allocation2 + $0x54] sm:$0xf0]  ;;  %v7244_v14 = vld [vmem:[#allocation2 + $0x54] sm:$0xf] }
  0x40   :  { %350 = vmatpush.bf16.msra.mxu1 %v4992_v7  ;;  %v4973_v15 = vld [vmem:[#allocation2 + $0x58] sm:$0xf0]  ;;  %v4972_v16 = vor.u32 %v7245_v13, %v4971_v12  ;;  %v4963_v18 = vld [vmem:[#allocation2 + $0x40] sm:$0xf]  ;;  %v7243_v19 = vld [vmem:[#allocation2 + $0x44] sm:$0xf0] }
  0x41   :  { %v4976_v17 = vor.u32 %v7244_v14, %v4973_v15  ;;  %v7242_v20 = vld [vmem:[#allocation2 + $0x44] sm:$0xf]  ;;  %v4965_v21 = vld [vmem:[#allocation2 + $0x48] sm:$0xf0]  ;;  %v4964_v22 = vor.u32 %v7243_v19, %v4963_v18  ;;  %v5107_v23 = vld [vmem:[#allocation4 + $0xe0] sm:$0xf] }
  0x42   :  { %v7280_v24 = vld [vmem:[#allocation4 + $0xec] sm:$0xf0]  ;;  %v5235_v25 = vld [vmem:[#allocation4 + $0x1e0] sm:$0xf]  ;;  %v4968_v26 = vor.u32 %v7242_v20, %v4965_v21  ;;  %v7241_v28 = vld [vmem:[#allocation2 + $0x34] sm:$0xf0] }
  0x43   :  { %337 = vmatpush.bf16.msra.mxu0 %v4980_v10  ;;  %v4955_v27 = vld [vmem:[#allocation2 + $0x30] sm:$0xf]  ;;  %v5108_v29 = vor.u32 %v7280_v24, %v5107_v23  ;;  %v7240_v31 = vld [vmem:[#allocation2 + $0x34] sm:$0xf]  ;;  %v4957_v32 = vld [vmem:[#allocation2 + $0x38] sm:$0xf0] }
  0x44   :  { %351 = vmatpush.bf16.msra.mxu1 %v4984_v11  ;;  %v7312_v30 = vld [vmem:[#allocation4 + $0x1ec] sm:$0xf0]  ;;  %v5091_v34 = vld [vmem:[#allocation4 + $0xc0] sm:$0xf]  ;;  %v4956_v38 = vor.u32 %v7241_v28, %v4955_v27  ;;  %v7239_v40 = vld [vmem:[#allocation2 + $0x24] sm:$0xf0]  ;;  %v4960_v43 = vor.u32 %v7240_v31, %v4957_v32 }
  0x45   :  { %v5236_v33 = vor.u32 %v7312_v30, %v5235_v25  ;;  %764 = vmatpush.bf16.msra.mxu2 %v5108_v29  ;;  %v7276_v35 = vld [vmem:[#allocation4 + $0xcc] sm:$0xf0]  ;;  %v5219_v36 = vld [vmem:[#allocation4 + $0x1c0] sm:$0xf]  ;;  %v7238_v44 = vld [vmem:[#allocation2 + $0x24] sm:$0xf] }
  0x46   :  { %v7308_v37 = vld [vmem:[#allocation4 + $0x1cc] sm:$0xf0]  ;;  %v4947_v39 = vld [vmem:[#allocation2 + $0x20] sm:$0xf]  ;;  %v5092_v41 = vor.u32 %v7276_v35, %v5091_v34  ;;  %v4949_v47 = vld [vmem:[#allocation2 + $0x28] sm:$0xf0] }
  0x47   :  { %338 = vmatpush.bf16.msra.mxu0 %v4972_v16  ;;  %778 = vmatpush.bf16.msra.mxu3 %v5236_v33  ;;  %v5220_v42 = vor.u32 %v7308_v37, %v5219_v36  ;;  %v5075_v45 = vld [vmem:[#allocation4 + $0xa0] sm:$0xf]  ;;  %v7272_v46 = vld [vmem:[#allocation4 + $0xac] sm:$0xf0]  ;;  %v4948_v51 = vor.u32 %v7239_v40, %v4947_v39  ;;  %v4952_v56 = vor.u32 %v7238_v44, %v4949_v47  ;;  %v7237_v57 = vld [vmem:[#allocation2 + $0x14] sm:$0xf0] }
  0x48   :  { %352 = vmatpush.bf16.msra.mxu1 %v4976_v17  ;;  %v5203_v48 = vld [vmem:[#allocation4 + $0x1a0] sm:$0xf]  ;;  %v7304_v49 = vld [vmem:[#allocation4 + $0x1ac] sm:$0xf0]  ;;  %v5076_v50 = vor.u32 %v7272_v46, %v5075_v45  ;;  %v7236_v60 = vld [vmem:[#allocation2 + $0x14] sm:$0xf] }
  0x49   :  { %765 = vmatpush.bf16.msra.mxu2 %v5092_v41  ;;  %v4939_v52 = vld [vmem:[#allocation2 + $0x10] sm:$0xf]  ;;  %v5204_v53 = vor.u32 %v7304_v49, %v5203_v48  ;;  %v5059_v54 = vld [vmem:[#allocation4 + $0x80] sm:$0xf]  ;;  %v4941_v61 = vld [vmem:[#allocation2 + $0x18] sm:$0xf0] }
  0x4a   :  { %v7268_v55 = vld [vmem:[#allocation4 + $0x8c] sm:$0xf0]  ;;  %v5187_v58 = vld [vmem:[#allocation4 + $0x180] sm:$0xf]  ;;  %v4940_v0 = vor.u32 %v7237_v57, %v4939_v52  ;;  %v7235_v1 = vld [vmem:[#allocation2 + $0x4] sm:$0xf0]  ;;  %v4944_v5 = vor.u32 %v7236_v60, %v4941_v61 }
  0x4b   :  { %339 = vmatpush.bf16.msra.mxu0 %v4964_v22  ;;  %779 = vmatpush.bf16.msra.mxu3 %v5220_v42  ;;  %v7300_v59 = vld [vmem:[#allocation4 + $0x18c] sm:$0xf0]  ;;  %v4931_v62 = vld [vmem:[#allocation2] sm:$0xf]  ;;  %v5060_v63 = vor.u32 %v7268_v55, %v5059_v54  ;;  %v7234_v6 = vld [vmem:[#allocation2 + $0x4] sm:$0xf] }
  0x4c   :  { %353 = vmatpush.bf16.msra.mxu1 %v4968_v26  ;;  %v5188_v2 = vor.u32 %v7300_v59, %v5187_v58  ;;  %v5043_v3 = vld [vmem:[#allocation4 + $0x60] sm:$0xf]  ;;  %v7264_v4 = vld [vmem:[#allocation4 + $0x6c] sm:$0xf0]  ;;  %v4933_v9 = vld [vmem:[#allocation2 + $0x8] sm:$0xf0]  ;;  %v4932_v15 = vor.u32 %v7235_v1, %v4931_v62 }
  0x4d   :  { %766 = vmatpush.bf16.msra.mxu2 %v5076_v50  ;;  %v5171_v7 = vld [vmem:[#allocation4 + $0x160] sm:$0xf]  ;;  %v7296_v8 = vld [vmem:[#allocation4 + $0x16c] sm:$0xf0]  ;;  %v7278_v10 = vld [vmem:[#allocation4 + $0xe4] sm:$0xf]  ;;  %v5044_v14 = vor.u32 %v7264_v4, %v5043_v3  ;;  %v4936_v19 = vor.u32 %v7234_v6, %v4933_v9 }
  0x4e   :  { %v5109_v11 = vld [vmem:[#allocation4 + $0xf0] sm:$0xf0]  ;;  %v7310_v12 = vld [vmem:[#allocation4 + $0x1e4] sm:$0xf]  ;;  %v5172_v16 = vor.u32 %v7296_v8, %v5171_v7  ;;  %v5027_v17 = vld [vmem:[#allocation4 + $0x40] sm:$0xf] }
  0x4f   :  { %340 = vmatpush.bf16.msra.mxu0 %v4956_v38  ;;  %780 = vmatpush.bf16.msra.mxu3 %v5204_v53  ;;  %v5237_v13 = vld [vmem:[#allocation4 + $0x1f0] sm:$0xf0]  ;;  %v7260_v18 = vld [vmem:[#allocation4 + $0x4c] sm:$0xf0]  ;;  %v5112_v20 = vor.u32 %v7278_v10, %v5109_v11  ;;  %v5155_v21 = vld [vmem:[#allocation4 + $0x140] sm:$0xf] }
  0x50   :  { %354 = vmatpush.bf16.msra.mxu1 %v4960_v43  ;;  %v7292_v22 = vld [vmem:[#allocation4 + $0x14c] sm:$0xf0]  ;;  %v5240_v23 = vor.u32 %v7310_v12, %v5237_v13  ;;  %v7274_v24 = vld [vmem:[#allocation4 + $0xc4] sm:$0xf]  ;;  %v5093_v25 = vld [vmem:[#allocation4 + $0xd0] sm:$0xf0]  ;;  %v5028_v29 = vor.u32 %v7260_v18, %v5027_v17 }
  0x51   :  { %767 = vmatpush.bf16.msra.mxu2 %v5060_v63  ;;  %s8458_s28 = sld [smem:[#allocation24_spill]]  ;;  %v7306_v27 = vld [vmem:[#allocation4 + $0x1c4] sm:$0xf]  ;;  %v5221_v28 = vld [vmem:[#allocation4 + $0x1d0] sm:$0xf0]  ;;  %v5156_v30 = vor.u32 %v7292_v22, %v5155_v21  ;;  %v5096_v33 = vor.u32 %v7274_v24, %v5093_v25 }
  0x52   :  { %v5011_v31 = vld [vmem:[#allocation4 + $0x20] sm:$0xf]  ;;  %v7256_v32 = vld [vmem:[#allocation4 + $0x2c] sm:$0xf0]  ;;  %v5224_v36 = vor.u32 %v7306_v27, %v5221_v28  ;;  %v7270_v37 = vld [vmem:[#allocation4 + $0xa4] sm:$0xf] }
  0x53   :  { %341 = vmatpush.bf16.msra.mxu0 %v4948_v51  ;;  %781 = vmatpush.bf16.msra.mxu3 %v5188_v2  ;;  %v5139_v34 = vld [vmem:[#allocation4 + $0x120] sm:$0xf]  ;;  %v7288_v35 = vld [vmem:[#allocation4 + $0x12c] sm:$0xf0]  ;;  %v5077_v38 = vld [vmem:[#allocation4 + $0xb0] sm:$0xf0]  ;;  %v5012_v41 = vor.u32 %v7256_v32, %v5011_v31 }
  0x54   :  { %355 = vmatpush.bf16.msra.mxu1 %v4952_v56  ;;  %v7302_v39 = vld [vmem:[#allocation4 + $0x1a4] sm:$0xf]  ;;  %v5205_v40 = vld [vmem:[#allocation4 + $0x1b0] sm:$0xf0]  ;;  %v5140_v42 = vor.u32 %v7288_v35, %v5139_v34  ;;  %v4995_v43 = vld [vmem:[#allocation4] sm:$0xf]  ;;  %v5080_v45 = vor.u32 %v7270_v37, %v5077_v38 }
  0x55   :  { %768 = vmatpush.bf16.msra.mxu2 %v5044_v14  ;;  %v7252_v44 = vld [vmem:[#allocation4 + $0xc] sm:$0xf0]  ;;  %v5123_v46 = vld [vmem:[#allocation4 + $0x100] sm:$0xf]  ;;  %v5208_v48 = vor.u32 %v7302_v39, %v5205_v40  ;;  %v7266_v49 = vld [vmem:[#allocation4 + $0x84] sm:$0xf] }
  0x56   :  { %v7284_v47 = vld [vmem:[#allocation4 + $0x10c] sm:$0xf0]  ;;  %v5061_v50 = vld [vmem:[#allocation4 + $0x90] sm:$0xf0]  ;;  %v7298_v51 = vld [vmem:[#allocation4 + $0x184] sm:$0xf]  ;;  %v4996_v53 = vor.u32 %v7252_v44, %v4995_v43 }
  0x57   :  { %342 = vmatpush.bf16.msra.mxu0 %v4940_v0  ;;  %v7233_v26 = vld [vmem:[%s8458_s28] sm:$0xff]  ;;  %782 = vmatpush.bf16.msra.mxu3 %v5172_v16  ;;  %v5189_v52 = vld [vmem:[#allocation4 + $0x190] sm:$0xf0]  ;;  %v5124_v54 = vor.u32 %v7284_v47, %v5123_v46  ;;  %v5064_v55 = vor.u32 %v7266_v49, %v5061_v50  ;;  %v5115_v17 = vld [vmem:[#allocation4 + $0xe8] sm:$0xf]  ;;  %s8459_s24 = sld [smem:[#allocation26_spill]] }
  0x58   :  { %356 = vmatpush.bf16.msra.mxu1 %v4944_v5  ;;  %v5192_v56 = vor.u32 %v7298_v51, %v5189_v52  ;;  %v7262_v57 = vld [vmem:[#allocation4 + $0x64] sm:$0xf]  ;;  %v5045_v58 = vld [vmem:[#allocation4 + $0x70] sm:$0xf0]  ;;  %v7281_v18 = vld [vmem:[#allocation4 + $0xf4] sm:$0xf0] }
  0x59   :  { %769 = vmatpush.bf16.msra.mxu2 %v5028_v29  ;;  %v7294_v59 = vld [vmem:[#allocation4 + $0x164] sm:$0xf]  ;;  %v5173_v60 = vld [vmem:[#allocation4 + $0x170] sm:$0xf0]  ;;  %v5048_v61 = vor.u32 %v7262_v57, %v5045_v58  ;;  %v7313_v21 = vld [vmem:[#allocation4 + $0x1f4] sm:$0xf0] }
  0x5a   :  { %v5176_v62 = vor.u32 %v7294_v59, %v5173_v60  ;;  %v7258_v63 = vld [vmem:[#allocation4 + $0x44] sm:$0xf]  ;;  %v5029_v0 = vld [vmem:[#allocation4 + $0x50] sm:$0xf0]  ;;  %v7279_v22 = vld [vmem:[#allocation4 + $0xec] sm:$0xf] }
  0x5b   :  { %343 = vmatpush.bf16.msra.mxu0 %v4932_v15  ;;  %783 = vmatpush.bf16.msra.mxu3 %v5156_v30  ;;  %v7290_v1 = vld [vmem:[#allocation4 + $0x144] sm:$0xf]  ;;  %v5157_v2 = vld [vmem:[#allocation4 + $0x150] sm:$0xf0]  ;;  %v5032_v3 = vor.u32 %v7258_v63, %v5029_v0  ;;  %v5245_v27 = vld [vmem:[#allocation4 + $0x1f8] sm:$0xf0] }
  0x5c   :  { %357 = vmatpush.bf16.msra.mxu1 %v4936_v19  ;;  %v5160_v4 = vor.u32 %v7290_v1, %v5157_v2  ;;  %v7254_v5 = vld [vmem:[#allocation4 + $0x24] sm:$0xf]  ;;  %v5013_v6 = vld [vmem:[#allocation4 + $0x30] sm:$0xf0]  ;;  %v5243_v19 = vld [vmem:[#allocation4 + $0x1e8] sm:$0xf] }
  0x5d   :  { %770 = vmatpush.bf16.msra.mxu2 %v5012_v41  ;;  %v7286_v7 = vld [vmem:[#allocation4 + $0x124] sm:$0xf]  ;;  %v5141_v8 = vld [vmem:[#allocation4 + $0x130] sm:$0xf0]  ;;  %v5016_v9 = vor.u32 %v7254_v5, %v5013_v6  ;;  %v5244_v24 = vor.u32 %v7313_v21, %v5243_v19  ;;  %v5099_v29 = vld [vmem:[#allocation4 + $0xc8] sm:$0xf] }
  0x5e   :  { %344 = vmatmul.bf16.vlgmr.msra.gmra.mxu0 %v7233_v26  ;;  %v5144_v10 = vor.u32 %v7286_v7, %v5141_v8  ;;  %v7250_v11 = vld [vmem:[#allocation4 + $0x4] sm:$0xf]  ;;  %v4997_v12 = vld [vmem:[#allocation4 + $0x10] sm:$0xf0]  ;;  %v7277_v30 = vld [vmem:[#allocation4 + $0xd4] sm:$0xf0] }
  0x5f   :  { %792 = vmatpush.bf16.msrb.mxu0 %v5112_v20  ;;  %358 = vmatmul.bf16.vlgmr.msra.gmra.mxu1 %v7233_v26  ;;  %v7282_v13 = vld [vmem:[#allocation4 + $0x104] sm:$0xf]  ;;  %v5125_v14 = vld [vmem:[#allocation4 + $0x110] sm:$0xf0]  ;;  %v5000_v15 = vor.u32 %v7250_v11, %v4997_v12  ;;  %v5116_v20 = vor.u32 %v7281_v18, %v5115_v17  ;;  %v7311_v26 = vld [vmem:[#allocation4 + $0x1ec] sm:$0xf]  ;;  %v5100_v31 = vor.u32 %v7277_v30, %v5099_v29 }
  0x60   :  { %806 = vmatpush.bf16.msrb.mxu1 %v5240_v23  ;;  %784 = vmatpush.bf16.msra.mxu3 %v5140_v42  ;;  %v5128_v16 = vor.u32 %v7282_v13, %v5125_v14  ;;  %v5117_v23 = vld [vmem:[#allocation4 + $0xf8] sm:$0xf0]  ;;  %v5248_v28 = vor.u32 %v7311_v26, %v5245_v27  ;;  %v5227_v32 = vld [vmem:[#allocation4 + $0x1c8] sm:$0xf]  ;;  %v7275_v34 = vld [vmem:[#allocation4 + $0xcc] sm:$0xf] }
  0x61   :  { %771 = vmatpush.bf16.msra.mxu2 %v4996_v53  ;;  %v5120_v25 = vor.u32 %v7279_v22, %v5117_v23  ;;  %v7307_v37 = vld [vmem:[#allocation4 + $0x1cc] sm:$0xf]  ;;  %v5229_v38 = vld [vmem:[#allocation4 + $0x1d8] sm:$0xf0]  ;;  %v5083_v41 = vld [vmem:[#allocation4 + $0xa8] sm:$0xf] }
  0x62   :  { %v5232_v40 = vor.u32 %v7307_v37, %v5229_v38  ;;  %v7273_v42 = vld [vmem:[#allocation4 + $0xb4] sm:$0xf0]  ;;  %v5211_v43 = vld [vmem:[#allocation4 + $0x1a8] sm:$0xf]  ;;  %v7271_v46 = vld [vmem:[#allocation4 + $0xac] sm:$0xf] }
  0x63   :  { %793 = vmatpush.bf16.msrb.mxu0 %v5096_v33  ;;  %v7309_v33 = vld [vmem:[#allocation4 + $0x1d4] sm:$0xf0]  ;;  %v5084_v44 = vor.u32 %v7273_v42, %v5083_v41  ;;  %v5085_v47 = vld [vmem:[#allocation4 + $0xb8] sm:$0xf0]  ;;  %v7303_v50 = vld [vmem:[#allocation4 + $0x1ac] sm:$0xf] }
  0x64   :  { %807 = vmatpush.bf16.msrb.mxu1 %v5224_v36  ;;  %785 = vmatpush.bf16.msra.mxu3 %v5124_v54  ;;  %v5228_v35 = vor.u32 %v7309_v33, %v5227_v32  ;;  %v5101_v36 = vld [vmem:[#allocation4 + $0xd8] sm:$0xf0]  ;;  %v5088_v49 = vor.u32 %v7271_v46, %v5085_v47  ;;  %v5067_v53 = vld [vmem:[#allocation4 + $0x88] sm:$0xf]  ;;  %v7269_v54 = vld [vmem:[#allocation4 + $0x94] sm:$0xf0] }
  0x65   :  { %820 = vmatpush.bf16.msrb.mxu2 %v5116_v20  ;;  %v5104_v39 = vor.u32 %v7275_v34, %v5101_v36  ;;  %v5213_v51 = vld [vmem:[#allocation4 + $0x1b8] sm:$0xf0]  ;;  %v7301_v57 = vld [vmem:[#allocation4 + $0x194] sm:$0xf0]  ;;  %v7267_v58 = vld [vmem:[#allocation4 + $0x8c] sm:$0xf] }
  0x66   :  { %v5216_v52 = vor.u32 %v7303_v50, %v5213_v51  ;;  %v5069_v59 = vld [vmem:[#allocation4 + $0x98] sm:$0xf0]  ;;  %v5051_v1 = vld [vmem:[#allocation4 + $0x68] sm:$0xf]  ;;  %v7265_v2 = vld [vmem:[#allocation4 + $0x74] sm:$0xf0] }
  0x67   :  { %794 = vmatpush.bf16.msrb.mxu0 %v5080_v45  ;;  %v7305_v45 = vld [vmem:[#allocation4 + $0x1b4] sm:$0xf0]  ;;  %v5197_v63 = vld [vmem:[#allocation4 + $0x198] sm:$0xf0]  ;;  %v7263_v6 = vld [vmem:[#allocation4 + $0x6c] sm:$0xf] }
  0x68   :  { %808 = vmatpush.bf16.msrb.mxu1 %v5208_v48  ;;  %834 = vmatpush.bf16.msrb.mxu3 %v5244_v24  ;;  %v5212_v48 = vor.u32 %v7305_v45, %v5211_v43  ;;  %v7297_v5 = vld [vmem:[#allocation4 + $0x174] sm:$0xf0]  ;;  %v5053_v7 = vld [vmem:[#allocation4 + $0x78] sm:$0xf0]  ;;  %v5035_v12 = vld [vmem:[#allocation4 + $0x48] sm:$0xf] }
  0x69   :  { %821 = vmatpush.bf16.msrb.mxu2 %v5100_v31  ;;  %v5181_v11 = vld [vmem:[#allocation4 + $0x178] sm:$0xf0]  ;;  %v7261_v14 = vld [vmem:[#allocation4 + $0x54] sm:$0xf0]  ;;  %v7259_v19 = vld [vmem:[#allocation4 + $0x4c] sm:$0xf] }
  0x6a   :  { %v5036_v17 = vor.u32 %v7261_v14, %v5035_v12  ;;  %v5037_v20 = vld [vmem:[#allocation4 + $0x58] sm:$0xf0]  ;;  %v7291_v21 = vld [vmem:[#allocation4 + $0x14c] sm:$0xf]  ;;  %v5019_v24 = vld [vmem:[#allocation4 + $0x28] sm:$0xf] }
  0x6b   :  { %795 = vmatpush.bf16.msrb.mxu0 %v5064_v55  ;;  %v5195_v55 = vld [vmem:[#allocation4 + $0x188] sm:$0xf]  ;;  %v5040_v22 = vor.u32 %v7259_v19, %v5037_v20  ;;  %v5165_v23 = vld [vmem:[#allocation4 + $0x158] sm:$0xf0]  ;;  %v7255_v29 = vld [vmem:[#allocation4 + $0x2c] sm:$0xf] }
  0x6c   :  { %809 = vmatpush.bf16.msrb.mxu1 %v5192_v56  ;;  %835 = vmatpush.bf16.msrb.mxu3 %v5228_v35  ;;  %v5068_v56 = vor.u32 %v7269_v54, %v5067_v53  ;;  %v5196_v60 = vor.u32 %v7301_v57, %v5195_v55  ;;  %v5168_v26 = vor.u32 %v7291_v21, %v5165_v23  ;;  %v5147_v27 = vld [vmem:[#allocation4 + $0x128] sm:$0xf]  ;;  %v5021_v31 = vld [vmem:[#allocation4 + $0x38] sm:$0xf0]  ;;  %v7287_v32 = vld [vmem:[#allocation4 + $0x12c] sm:$0xf] }
  0x6d   :  { %822 = vmatpush.bf16.msrb.mxu2 %v5084_v44  ;;  %v5149_v33 = vld [vmem:[#allocation4 + $0x138] sm:$0xf0]  ;;  %v5003_v35 = vld [vmem:[#allocation4 + $0x8] sm:$0xf]  ;;  %v7253_v36 = vld [vmem:[#allocation4 + $0x14] sm:$0xf0]  ;;  %v5024_v37 = vor.u32 %v7255_v29, %v5021_v31 }
  0x6e   :  { %v5152_v38 = vor.u32 %v7287_v32, %v5149_v33  ;;  %v7251_v41 = vld [vmem:[#allocation4 + $0xc] sm:$0xf]  ;;  %v5005_v42 = vld [vmem:[#allocation4 + $0x18] sm:$0xf0]  ;;  %v5004_v45 = vor.u32 %v7253_v36, %v5003_v35  ;;  %v5347_v14 = vld [vmem:[#allocation6 + $0xc0] sm:$0xf] }
  0x6f   :  { %796 = vmatpush.bf16.msrb.mxu0 %v5048_v61  ;;  %v5072_v61 = vor.u32 %v7267_v58, %v5069_v59  ;;  %v7283_v43 = vld [vmem:[#allocation4 + $0x10c] sm:$0xf]  ;;  %v5133_v44 = vld [vmem:[#allocation4 + $0x118] sm:$0xf0]  ;;  %v5008_v47 = vor.u32 %v7251_v41, %v5005_v42  ;;  %v5491_v59 = vld [vmem:[#allocation6 + $0x1e0] sm:$0xf] }
  0x70   :  { %810 = vmatpush.bf16.msrb.mxu1 %v5176_v62  ;;  %836 = vmatpush.bf16.msrb.mxu3 %v5212_v48  ;;  %v7299_v62 = vld [vmem:[#allocation4 + $0x18c] sm:$0xf]  ;;  %v5136_v48 = vor.u32 %v7283_v43, %v5133_v44  ;;  %v7436_v19 = vld [vmem:[#allocation6 + $0x3cc] sm:$0xf0]  ;;  %v5603_v20 = vld [vmem:[#allocation6 + $0x2c0] sm:$0xf] }
  0x71   :  { %823 = vmatpush.bf16.msrb.mxu2 %v5068_v56  ;;  %v5200_v0 = vor.u32 %v7299_v62, %v5197_v63  ;;  %v7344_v63 = vld [vmem:[#allocation6 + $0xec] sm:$0xf0]  ;;  %v5459_v23 = vld [vmem:[#allocation6 + $0x1a0] sm:$0xf]  ;;  %s8460_s26 = sld [smem:[#allocation28_spill]] }
  0x72   :  { %v7404_v21 = vld [vmem:[#allocation6 + $0x2cc] sm:$0xf0]  ;;  %v5715_v29 = vld [vmem:[#allocation6 + $0x3a0] sm:$0xf]  ;;  %s8461_s30 = sld [smem:[#allocation30_spill]] }
  0x73   :  { %797 = vmatpush.bf16.msrb.mxu0 %v5032_v3  ;;  %v5179_v3 = vld [vmem:[#allocation4 + $0x168] sm:$0xf]  ;;  %v7432_v31 = vld [vmem:[#allocation6 + $0x3ac] sm:$0xf0]  ;;  %v5587_v32 = vld [vmem:[#allocation6 + $0x2a0] sm:$0xf] }
  0x74   :  { %811 = vmatpush.bf16.msrb.mxu1 %v5160_v4  ;;  %837 = vmatpush.bf16.msrb.mxu3 %v5196_v60  ;;  %v5052_v4 = vor.u32 %v7265_v2, %v5051_v1  ;;  %v5180_v8 = vor.u32 %v7297_v5, %v5179_v3  ;;  %v7376_v60 = vld [vmem:[#allocation6 + $0x1ec] sm:$0xf0]  ;;  %v5443_v35 = vld [vmem:[#allocation6 + $0x180] sm:$0xf]  ;;  %s8462_s28 = sld [smem:[#allocation31_spill]] }
  0x75   :  { %v7440_v1 = vld [vmem:[#allocation6 + $0x3ec] sm:$0xf0]  ;;  %v5699_v41 = vld [vmem:[#allocation6 + $0x380] sm:$0xf] }
  0x76   :  { %824 = vmatpush.bf16.msrb.mxu2 %v5052_v4  ;;  %v5619_v4 = vld [vmem:[#allocation6 + $0x2e0] sm:$0xf]  ;;  %v7408_v5 = vld [vmem:[#allocation6 + $0x2ec] sm:$0xf0] }
  0x77   :  { %798 = vmatpush.bf16.msrb.mxu0 %v5016_v9  ;;  %v5056_v9 = vor.u32 %v7263_v6, %v5053_v7  ;;  %v7400_v33 = vld [vmem:[#allocation6 + $0x2ac] sm:$0xf0]  ;;  %v5571_v44 = vld [vmem:[#allocation6 + $0x280] sm:$0xf] }
  0x78   :  { %812 = vmatpush.bf16.msrb.mxu1 %v5144_v10  ;;  %v7295_v10 = vld [vmem:[#allocation4 + $0x16c] sm:$0xf]  ;;  %838 = vmatpush.bf16.msrb.mxu3 %v5180_v8  ;;  %v7364_v36 = vld [vmem:[#allocation6 + $0x18c] sm:$0xf0]  ;;  %v5588_v42 = vor.u32 %v7400_v33, %v5587_v32 }
  0x79   :  { %v5184_v13 = vor.u32 %v7295_v10, %v5181_v11  ;;  %v5475_v10 = vld [vmem:[#allocation6 + $0x1c0] sm:$0xf]  ;;  %v7372_v11 = vld [vmem:[#allocation6 + $0x1cc] sm:$0xf0] }
  0x7a   :  { %825 = vmatpush.bf16.msrb.mxu2 %v5036_v17  ;;  %v5731_v17 = vld [vmem:[#allocation6 + $0x3c0] sm:$0xf]  ;;  %v7428_v43 = vld [vmem:[#allocation6 + $0x38c] sm:$0xf0] }
  0x7b   :  { %799 = vmatpush.bf16.msrb.mxu0 %v5000_v15  ;;  %v5163_v15 = vld [vmem:[#allocation4 + $0x148] sm:$0xf] }
  0x7c   :  { %813 = vmatpush.bf16.msrb.mxu1 %v5128_v16  ;;  %v7293_v16 = vld [vmem:[#allocation4 + $0x154] sm:$0xf0] }
  0x7d   :  { %v5164_v18 = vor.u32 %v7293_v16, %v5163_v15  ;;  %v7340_v15 = vld [vmem:[#allocation6 + $0xcc] sm:$0xf0] }
  0x7f   :  { %848 = vmatpush.bf16.msra.mxu0 %v5120_v25  ;;  %v7257_v25 = vld [vmem:[#allocation4 + $0x34] sm:$0xf0]  ;;  %839 = vmatpush.bf16.msrb.mxu3 %v5164_v18  ;;  %v5620_v18 = vor.u32 %v7408_v5, %v5619_v4  ;;  %v5395_v5 = vld [vmem:[#allocation6 + $0x120] sm:$0xf] }
  0x80   :  { %862 = vmatpush.bf16.msra.mxu1 %v5248_v28  ;;  %v7289_v28 = vld [vmem:[#allocation4 + $0x134] sm:$0xf0]  ;;  %v5020_v30 = vor.u32 %v7257_v25, %v5019_v24  ;;  %v7368_v24 = vld [vmem:[#allocation6 + $0x1ac] sm:$0xf0]  ;;  %v5348_v25 = vor.u32 %v7340_v15, %v5347_v14  ;;  %v5379_v15 = vld [vmem:[#allocation6 + $0x100] sm:$0xf] }
  0x81   :  { %v5148_v34 = vor.u32 %v7289_v28, %v5147_v27  ;;  %v7336_v27 = vld [vmem:[#allocation6 + $0xac] sm:$0xf0]  ;;  %v5732_v28 = vor.u32 %v7436_v19, %v5731_v17 }
  0x82   :  { %826 = vmatpush.bf16.msrb.mxu2 %v5020_v30  ;;  %v5604_v30 = vor.u32 %v7404_v21, %v5603_v20  ;;  %v7416_v14 = vld [vmem:[#allocation6 + $0x32c] sm:$0xf0]  ;;  %v5493_v21 = vld [vmem:[#allocation6 + $0x1f0] sm:$0xf0] }
  0x83   :  { %849 = vmatpush.bf16.msra.mxu0 %v5104_v39  ;;  %v5131_v39 = vld [vmem:[#allocation4 + $0x108] sm:$0xf]  ;;  %840 = vmatpush.bf16.msrb.mxu3 %v5148_v34  ;;  %v5460_v34 = vor.u32 %v7368_v24, %v5459_v23  ;;  %v7316_v19 = vld [vmem:[#allocation6 + $0xc] sm:$0xf0]  ;;  %v5365_v23 = vld [vmem:[#allocation6 + $0xf0] sm:$0xf0] }
  0x84   :  { %863 = vmatpush.bf16.msra.mxu1 %v5232_v40  ;;  %v7285_v40 = vld [vmem:[#allocation4 + $0x114] sm:$0xf0] }
  0x85   :  { %v5132_v46 = vor.u32 %v7285_v40, %v5131_v39  ;;  %v7332_v39 = vld [vmem:[#allocation6 + $0x8c] sm:$0xf0]  ;;  %v5716_v40 = vor.u32 %v7432_v31, %v5715_v29  ;;  %v5477_v29 = vld [vmem:[#allocation6 + $0x1d0] sm:$0xf0] }
  0x86   :  { %827 = vmatpush.bf16.msrb.mxu2 %v5004_v45  ;;  %v7396_v45 = vld [vmem:[#allocation6 + $0x28c] sm:$0xf0]  ;;  %v5349_v31 = vld [vmem:[#allocation6 + $0xd0] sm:$0xf0] }
  0x87   :  { %850 = vmatpush.bf16.msra.mxu0 %v5088_v49  ;;  %841 = vmatpush.bf16.msrb.mxu3 %v5132_v46  ;;  %v244_v49 = vld [vmem:[%s8459_s24] sm:$0x3]  ;;  %v5444_v46 = vor.u32 %v7364_v36, %v5443_v35  ;;  %v5461_v35 = vld [vmem:[#allocation6 + $0x1b0] sm:$0xf0] }
  0x88   :  { %864 = vmatpush.bf16.msra.mxu1 %v5216_v52  ;;  %v246_v52 = vperm.slane %v244_v49, 0  ;;  %v247_v53 = vperm.slane %v244_v49, 1 }
  0x8b   :  { %851 = vmatpush.bf16.msra.mxu0 %v5072_v61  ;;  %v5363_v61 = vld [vmem:[#allocation6 + $0xe0] sm:$0xf] }
  0x8c   :  { %865 = vmatpush.bf16.msra.mxu1 %v5200_v0  ;;  %v5747_v0 = vld [vmem:[#allocation6 + $0x3e0] sm:$0xf]  ;;  %v5364_v12 = vor.u32 %v7344_v63, %v5363_v61  ;;  %v7356_v61 = vld [vmem:[#allocation6 + $0x14c] sm:$0xf0] }
  0x8d   :  { %v5748_v16 = vor.u32 %v7440_v1, %v5747_v0  ;;  %v7324_v63 = vld [vmem:[#allocation6 + $0x4c] sm:$0xf0] }
  0x8f   :  { %852 = vmatpush.bf16.msra.mxu0 %v5056_v9  ;;  %v5492_v9 = vor.u32 %v7376_v60, %v5491_v59  ;;  %v5411_v59 = vld [vmem:[#allocation6 + $0x140] sm:$0xf] }
  0x90   :  { %866 = vmatpush.bf16.msra.mxu1 %v5184_v13  ;;  %v5412_v4 = vor.u32 %v7356_v61, %v5411_v59  ;;  %v5317_v59 = vld [vmem:[#allocation6 + $0x90] sm:$0xf0]  ;;  %v7354_v61 = vld [vmem:[#allocation6 + $0x144] sm:$0xf] }
  0x93   :  { %853 = vmatpush.bf16.msra.mxu0 %v5040_v22  ;;  %v5476_v22 = vor.u32 %v7372_v11, %v5475_v10  ;;  %v7320_v10 = vld [vmem:[#allocation6 + $0x2c] sm:$0xf0] }
  0x94   :  { %867 = vmatpush.bf16.msra.mxu1 %v5168_v26  ;;  %v5331_v26 = vld [vmem:[#allocation6 + $0xa0] sm:$0xf] }
  0x97   :  { %854 = vmatpush.bf16.msra.mxu0 %v5024_v37  ;;  %v5332_v37 = vor.u32 %v7336_v27, %v5331_v26  ;;  %v7370_v27 = vld [vmem:[#allocation6 + $0x1c4] sm:$0xf] }
  0x98   :  { %868 = vmatpush.bf16.msra.mxu1 %v5152_v38  ;;  %v5315_v38 = vld [vmem:[#allocation6 + $0x80] sm:$0xf]  ;;  %v5480_v32 = vor.u32 %v7370_v27, %v5477_v29 }
  0x99   :  { %v5316_v49 = vor.u32 %v7332_v39, %v5315_v38  ;;  %v5445_v38 = vld [vmem:[#allocation6 + $0x190] sm:$0xf0] }
  0x9b   :  { %855 = vmatpush.bf16.msra.mxu0 %v5008_v47  ;;  %v5427_v47 = vld [vmem:[#allocation6 + $0x160] sm:$0xf] }
  0x9c   :  { %869 = vmatpush.bf16.msra.mxu1 %v5136_v48  ;;  %v7360_v48 = vld [vmem:[#allocation6 + $0x16c] sm:$0xf0] }
  0xdb   :  { %v345_v50 = vpop.f32.mrf.mxu0 }
  0xdc   :  { %v359_v51 = vpop.f32.mrf.mxu1  ;;  %v346_v54 = vadd.f32 %v345_v50, %v246_v52  ;;  %v5299_v50 = vld [vmem:[#allocation6 + $0x60] sm:$0xf] }
  0xdd   :  { %v360_v55 = vadd.f32 %v359_v51, %v247_v53  ;;  %v7328_v51 = vld [vmem:[#allocation6 + $0x6c] sm:$0xf0] }
  0xde   :  { %v364_v2 = vmax.f32 %v346_v54, 0.0  ;;  %v5572_v54 = vor.u32 %v7396_v45, %v5571_v44  ;;  %v5300_v60 = vor.u32 %v7328_v51, %v5299_v50  ;;  %v5333_v44 = vld [vmem:[#allocation6 + $0xb0] sm:$0xf0]  ;;  %v7438_v51 = vld [vmem:[#allocation6 + $0x3e4] sm:$0xf] }
  0xdf   :  { %v365_v6 = vmax.f32 %v360_v55, 0.0  ;;  %v7424_v55 = vld [vmem:[#allocation6 + $0x36c] sm:$0xf0]  ;;  %v5429_v50 = vld [vmem:[#allocation6 + $0x170] sm:$0xf0] }
  0xe3   :  { %v347_v56 = vpop.f32.mrf.mxu0 }
  0xe4   :  { %v348_v57 = vadd.f32 %v347_v56, %v246_v52  ;;  %v361_v58 = vpop.f32.mrf.mxu1  ;;  %v5700_v52 = vor.u32 %v7428_v43, %v5699_v41  ;;  %v5555_v56 = vld [vmem:[#allocation6 + $0x260] sm:$0xf]  ;;  %v7388_v41 = vld [vmem:[#allocation6 + $0x24c] sm:$0xf0]  ;;  %v7334_v43 = vld [vmem:[#allocation6 + $0xa4] sm:$0xf] }
  0xe5   :  { %v362_v62 = vadd.f32 %v361_v58, %v247_v53  ;;  %v5683_v53 = vld [vmem:[#allocation6 + $0x360] sm:$0xf]  ;;  %v5428_v58 = vor.u32 %v7360_v48, %v5427_v47  ;;  %v5336_v45 = vor.u32 %v7334_v43, %v5333_v44  ;;  %v7412_v47 = vld [vmem:[#allocation6 + $0x30c] sm:$0xf0]  ;;  %v5573_v43 = vld [vmem:[#allocation6 + $0x290] sm:$0xf0] }
  0xe6   :  { %v366_v3 = vmax.f32 %v348_v57, 0.0  ;;  %v7392_v57 = vld [vmem:[#allocation6 + $0x26c] sm:$0xf0]  ;;  %v5684_v0 = vor.u32 %v7424_v55, %v5683_v53  ;;  %v5749_v53 = vld [vmem:[#allocation6 + $0x3f0] sm:$0xf0] }
  0xe7   :  { %v367_v7 = vmax.f32 %v362_v62, 0.0  ;;  %v5283_v62 = vld [vmem:[#allocation6 + $0x40] sm:$0xf]  ;;  %v5556_v1 = vor.u32 %v7392_v57, %v5555_v56  ;;  %v7384_v55 = vld [vmem:[#allocation6 + $0x22c] sm:$0xf0]  ;;  %v5752_v56 = vor.u32 %v7438_v51, %v5749_v53 }
  0xe8   :  { %v8271_v8 = vpack.c.bf16 %v366_v3, %v364_v2  ;;  %v5667_v2 = vld [vmem:[#allocation6 + $0x340] sm:$0xf]  ;;  %v7420_v3 = vld [vmem:[#allocation6 + $0x34c] sm:$0xf0]  ;;  %v7414_v51 = vld [vmem:[#allocation6 + $0x324] sm:$0xf] }
  0xe9   :  { %v8273_v13 = vpack.c.bf16 %v367_v7, %v365_v6  ;;  %v5284_v6 = vor.u32 %v7324_v63, %v5283_v62  ;;  %v7352_v7 = vld [vmem:[#allocation6 + $0x12c] sm:$0xf0]  ;;  %v5668_v11 = vor.u32 %v7420_v3, %v5667_v2  ;;  %v5413_v62 = vld [vmem:[#allocation6 + $0x150] sm:$0xf0]  ;;  %v7434_v63 = vld [vmem:[#allocation6 + $0x3c4] sm:$0xf] }
  0xea   :  { %772 = vmatmul.bf16.vlgmr.msra.gmra.mxu2 %v8271_v8  ;;  %800 = vmatmul.bf16.vlgmr.msrb.gmra.mxu0 %v8271_v8  ;;  %v5507_v2 = vld [vmem:[#allocation6 + $0x200] sm:$0xf]  ;;  %v7380_v3 = vld [vmem:[#allocation6 + $0x20c] sm:$0xf0] }
  0xeb   :  { %786 = vmatmul.bf16.vlgmr.msra.gmra.mxu3 %v8273_v13  ;;  %814 = vmatmul.bf16.vlgmr.msrb.gmra.mxu1 %v8273_v13 }
  0xec   :  { %1680 = vmatpush.bf16.msra.mxu3 %v5492_v9  ;;  %1666 = vmatpush.bf16.msra.mxu2 %v5364_v12  ;;  %v5267_v9 = vld [vmem:[#allocation6 + $0x20] sm:$0xf] }
  0xed   :  { %1708 = vmatpush.bf16.msrb.mxu1 %v5748_v16  ;;  %1694 = vmatpush.bf16.msrb.mxu0 %v5620_v18  ;;  %v5651_v12 = vld [vmem:[#allocation6 + $0x320] sm:$0xf]  ;;  %v7348_v16 = vld [vmem:[#allocation6 + $0x10c] sm:$0xf0]  ;;  %v5268_v17 = vor.u32 %v7320_v10, %v5267_v9  ;;  %v7406_v9 = vld [vmem:[#allocation6 + $0x2e4] sm:$0xf] }
  0xee   :  { %v5251_v18 = vld [vmem:[#allocation6] sm:$0xf]  ;;  %v5652_v20 = vor.u32 %v7416_v14, %v5651_v12  ;;  %v5380_v24 = vor.u32 %v7348_v16, %v5379_v15  ;;  %v7350_v14 = vld [vmem:[#allocation6 + $0x124] sm:$0xf] }
  0xef   :  { %v7430_v15 = vld [vmem:[#allocation6 + $0x3a4] sm:$0xf] }
  0xf0   :  { %1681 = vmatpush.bf16.msra.mxu3 %v5476_v22  ;;  %1667 = vmatpush.bf16.msra.mxu2 %v5348_v25  ;;  %v7342_v22 = vld [vmem:[#allocation6 + $0xe4] sm:$0xf]  ;;  %v5252_v25 = vor.u32 %v7316_v19, %v5251_v18  ;;  %v5285_v19 = vld [vmem:[#allocation6 + $0x50] sm:$0xf0] }
  0xf1   :  { %1709 = vmatpush.bf16.msrb.mxu1 %v5732_v28  ;;  %1695 = vmatpush.bf16.msrb.mxu0 %v5604_v30  ;;  %v5368_v28 = vor.u32 %v7342_v22, %v5365_v23  ;;  %v7338_v30 = vld [vmem:[#allocation6 + $0xc4] sm:$0xf]  ;;  %v5605_v22 = vld [vmem:[#allocation6 + $0x2d0] sm:$0xf0] }
  0xf2   :  { %v5352_v33 = vor.u32 %v7338_v30, %v5349_v31  ;;  %v7322_v18 = vld [vmem:[#allocation6 + $0x44] sm:$0xf]  ;;  %v5269_v31 = vld [vmem:[#allocation6 + $0x30] sm:$0xf0] }
  0xf3   :  { %v7318_v30 = vld [vmem:[#allocation6 + $0x24] sm:$0xf] }
  0xf4   :  { %1682 = vmatpush.bf16.msra.mxu3 %v5460_v34  ;;  %1668 = vmatpush.bf16.msra.mxu2 %v5332_v37  ;;  %v7366_v34 = vld [vmem:[#allocation6 + $0x1a4] sm:$0xf] }
  0xf5   :  { %1710 = vmatpush.bf16.msrb.mxu1 %v5716_v40  ;;  %1696 = vmatpush.bf16.msrb.mxu0 %v5588_v42  ;;  %v5464_v36 = vor.u32 %v7366_v34, %v5461_v35  ;;  %v7362_v37 = vld [vmem:[#allocation6 + $0x184] sm:$0xf]  ;;  %v5539_v40 = vld [vmem:[#allocation6 + $0x240] sm:$0xf]  ;;  %v5589_v34 = vld [vmem:[#allocation6 + $0x2b0] sm:$0xf0] }
  0xf6   :  { %v5448_v39 = vor.u32 %v7362_v37, %v5445_v38  ;;  %v5540_v42 = vor.u32 %v7388_v41, %v5539_v40  ;;  %v5685_v37 = vld [vmem:[#allocation6 + $0x370] sm:$0xf0]  ;;  %v7394_v41 = vld [vmem:[#allocation6 + $0x284] sm:$0xf] }
  0xf7   :  { %v5253_v40 = vld [vmem:[#allocation6 + $0x10] sm:$0xf0]  ;;  %v5576_v44 = vor.u32 %v7394_v41, %v5573_v43  ;;  %v7341_v43 = vld [vmem:[#allocation6 + $0xd4] sm:$0xf0] }
  0xf8   :  { %1683 = vmatpush.bf16.msra.mxu3 %v5444_v46  ;;  %1669 = vmatpush.bf16.msra.mxu2 %v5316_v49  ;;  %v5635_v46 = vld [vmem:[#allocation6 + $0x300] sm:$0xf]  ;;  %v7358_v49 = vld [vmem:[#allocation6 + $0x164] sm:$0xf] }
  0xf9   :  { %1711 = vmatpush.bf16.msrb.mxu1 %v5700_v52  ;;  %1697 = vmatpush.bf16.msrb.mxu0 %v5572_v54  ;;  %v5636_v48 = vor.u32 %v7412_v47, %v5635_v46  ;;  %v5432_v52 = vor.u32 %v7358_v49, %v5429_v50  ;;  %v5523_v54 = vld [vmem:[#allocation6 + $0x220] sm:$0xf]  ;;  %v5669_v46 = vld [vmem:[#allocation6 + $0x350] sm:$0xf0] }
  0xfa   :  { %828 = vmatmul.bf16.vlgmr.msrb.gmra.mxu2 %v8271_v8  ;;  %856 = vmatmul.bf16.vlgmr.msra.gmra.mxu0 %v8271_v8  ;;  %v5396_v8 = vor.u32 %v7352_v7, %v5395_v5  ;;  %v5524_v57 = vor.u32 %v7384_v55, %v5523_v54  ;;  %v5508_v5 = vor.u32 %v7380_v3, %v5507_v2  ;;  %v5301_v7 = vld [vmem:[#allocation6 + $0x70] sm:$0xf0]  ;;  %v7386_v54 = vld [vmem:[#allocation6 + $0x244] sm:$0xf] }
  0xfb   :  { %842 = vmatmul.bf16.vlgmr.msrb.gmra.mxu3 %v8273_v13  ;;  %870 = vmatmul.bf16.vlgmr.msra.gmra.mxu1 %v8273_v13  ;;  %v7374_v13 = vld [vmem:[#allocation6 + $0x1e4] sm:$0xf]  ;;  %v5557_v49 = vld [vmem:[#allocation6 + $0x270] sm:$0xf0] }
  0xfc   :  { %1684 = vmatpush.bf16.msra.mxu3 %v5428_v58  ;;  %1670 = vmatpush.bf16.msra.mxu2 %v5300_v60  ;;  %v5496_v26 = vor.u32 %v7374_v13, %v5493_v21  ;;  %v7330_v58 = vld [vmem:[#allocation6 + $0x84] sm:$0xf]  ;;  %v5288_v21 = vor.u32 %v7322_v18, %v5285_v19  ;;  %v5541_v55 = vld [vmem:[#allocation6 + $0x250] sm:$0xf0] }
  0xfd   :  { %1712 = vmatpush.bf16.msrb.mxu1 %v5684_v0  ;;  %1698 = vmatpush.bf16.msrb.mxu0 %v5556_v1  ;;  %v5320_v60 = vor.u32 %v7330_v58, %v5317_v59  ;;  %v5416_v0 = vor.u32 %v7354_v61, %v5413_v62  ;;  %v5733_v1 = vld [vmem:[#allocation6 + $0x3d0] sm:$0xf0]  ;;  %v7410_v58 = vld [vmem:[#allocation6 + $0x304] sm:$0xf] }
  0xfe   :  { %v5637_v59 = vld [vmem:[#allocation6 + $0x310] sm:$0xf0]  ;;  %v7382_v62 = vld [vmem:[#allocation6 + $0x224] sm:$0xf] }
  0xff   :  { %v7378_v3 = vld [vmem:[#allocation6 + $0x204] sm:$0xf] }
 0x100   :  { %1685 = vmatpush.bf16.msra.mxu3 %v5412_v4  ;;  %1671 = vmatpush.bf16.msra.mxu2 %v5284_v6  ;;  %v5736_v4 = vor.u32 %v7434_v63, %v5733_v1  ;;  %v7326_v6 = vld [vmem:[#allocation6 + $0x64] sm:$0xf]  ;;  %v5525_v63 = vld [vmem:[#allocation6 + $0x230] sm:$0xf0] }
 0x101   :  { %1713 = vmatpush.bf16.msrb.mxu1 %v5668_v11  ;;  %1699 = vmatpush.bf16.msrb.mxu0 %v5540_v42  ;;  %v5304_v10 = vor.u32 %v7326_v6, %v5301_v7  ;;  %v5621_v11 = vld [vmem:[#allocation6 + $0x2f0] sm:$0xf0]  ;;  %v5528_v2 = vor.u32 %v7382_v62, %v5525_v63  ;;  %v7361_v62 = vld [vmem:[#allocation6 + $0x174] sm:$0xf0] }
 0x102   :  { %v5624_v12 = vor.u32 %v7406_v9, %v5621_v11  ;;  %v7441_v63 = vld [vmem:[#allocation6 + $0x3f4] sm:$0xf0] }
 0x104   :  { %1686 = vmatpush.bf16.msra.mxu3 %v5396_v8  ;;  %1672 = vmatpush.bf16.msra.mxu2 %v5268_v17  ;;  %v5397_v8 = vld [vmem:[#allocation6 + $0x130] sm:$0xf0] }
 0x105   :  { %1714 = vmatpush.bf16.msrb.mxu1 %v5652_v20  ;;  %1700 = vmatpush.bf16.msrb.mxu0 %v5524_v57  ;;  %v5400_v16 = vor.u32 %v7350_v14, %v5397_v8  ;;  %v5717_v17 = vld [vmem:[#allocation6 + $0x3b0] sm:$0xf0]  ;;  %v7402_v20 = vld [vmem:[#allocation6 + $0x2c4] sm:$0xf]  ;;  %v8286_v57 = vld [vmem:[%s8460_s26] sm:$0xf] }
 0x106   :  { %v5720_v13 = vor.u32 %v7430_v15, %v5717_v17  ;;  %v5608_v23 = vor.u32 %v7402_v20, %v5605_v22  ;;  %v436_v9 = vperm.slane %v8286_v57, 0  ;;  %v5499_v17 = vld [vmem:[#allocation6 + $0x1e8] sm:$0xf] }
 0x108   :  { %1687 = vmatpush.bf16.msra.mxu3 %v5380_v24  ;;  %1673 = vmatpush.bf16.msra.mxu2 %v5252_v25  ;;  %v7346_v24 = vld [vmem:[#allocation6 + $0x104] sm:$0xf]  ;;  %v5381_v25 = vld [vmem:[#allocation6 + $0x110] sm:$0xf0] }
 0x109   :  { %1715 = vmatpush.bf16.msrb.mxu1 %v5636_v48  ;;  %1701 = vmatpush.bf16.msrb.mxu0 %v5508_v5  ;;  %v5384_v27 = vor.u32 %v7346_v24, %v5381_v25  ;;  %v7390_v48 = vld [vmem:[#allocation6 + $0x264] sm:$0xf] }
 0x10a   :  { %v5560_v50 = vor.u32 %v7390_v48, %v5557_v49  ;;  %v5451_v48 = vld [vmem:[#allocation6 + $0x188] sm:$0xf]  ;;  %v7365_v49 = vld [vmem:[#allocation6 + $0x194] sm:$0xf0] }
 0x10c   :  { %1736 = vmatpush.bf16.msrb.mxu3 %v5496_v26  ;;  %1722 = vmatpush.bf16.msrb.mxu2 %v5368_v28  ;;  %v7426_v26 = vld [vmem:[#allocation6 + $0x384] sm:$0xf]  ;;  %v5701_v28 = vld [vmem:[#allocation6 + $0x390] sm:$0xf0] }
 0x10d   :  { %1764 = vmatpush.bf16.msra.mxu1 %v5752_v56  ;;  %1750 = vmatpush.bf16.msra.mxu0 %v5624_v12  ;;  %v5704_v29 = vor.u32 %v7426_v26, %v5701_v28  ;;  %v5544_v56 = vor.u32 %v7386_v54, %v5541_v55  ;;  %v5483_v26 = vld [vmem:[#allocation6 + $0x1c8] sm:$0xf]  ;;  %v7337_v55 = vld [vmem:[#allocation6 + $0xb4] sm:$0xf0] }
 0x10e   :  { %v5339_v54 = vld [vmem:[#allocation6 + $0xa8] sm:$0xf] }
 0x110   :  { %1737 = vmatpush.bf16.msrb.mxu3 %v5480_v32  ;;  %1723 = vmatpush.bf16.msrb.mxu2 %v5352_v33  ;;  %v5272_v32 = vor.u32 %v7318_v30, %v5269_v31  ;;  %v7398_v33 = vld [vmem:[#allocation6 + $0x2a4] sm:$0xf]  ;;  %v439_v30 = vperm.slane %v8286_v57, 3 }
 0x111   :  { %1765 = vmatpush.bf16.msra.mxu1 %v5736_v4  ;;  %1751 = vmatpush.bf16.msra.mxu0 %v5608_v23  ;;  %v5592_v35 = vor.u32 %v7398_v33, %v5589_v34  ;;  %v5509_v4 = vld [vmem:[#allocation6 + $0x210] sm:$0xf0]  ;;  %v7345_v33 = vld [vmem:[#allocation6 + $0xf4] sm:$0xf0] }
 0x112   :  { %v5512_v6 = vor.u32 %v7378_v3, %v5509_v4  ;;  %v5323_v3 = vld [vmem:[#allocation6 + $0x88] sm:$0xf]  ;;  %v7333_v4 = vld [vmem:[#allocation6 + $0x94] sm:$0xf0] }
 0x114   :  { %1738 = vmatpush.bf16.msrb.mxu3 %v5464_v36  ;;  %1724 = vmatpush.bf16.msrb.mxu2 %v5336_v45  ;;  %v7422_v36 = vld [vmem:[#allocation6 + $0x364] sm:$0xf] }
 0x115   :  { %1766 = vmatpush.bf16.msra.mxu1 %v5720_v13  ;;  %v5688_v38 = vor.u32 %v7422_v36, %v5685_v37  ;;  %1752 = vmatpush.bf16.msra.mxu0 %v5592_v35  ;;  %v7418_v45 = vld [vmem:[#allocation6 + $0x344] sm:$0xf]  ;;  %v7377_v13 = vld [vmem:[#allocation6 + $0x1f4] sm:$0xf0]  ;;  %v5467_v37 = vld [vmem:[#allocation6 + $0x1a8] sm:$0xf] }
 0x116   :  { %v5672_v47 = vor.u32 %v7418_v45, %v5669_v46  ;;  %v438_v46 = vperm.slane %v8286_v57, 2 }
 0x118   :  { %1739 = vmatpush.bf16.msrb.mxu3 %v5448_v39  ;;  %1725 = vmatpush.bf16.msrb.mxu2 %v5320_v60  ;;  %v7314_v39 = vld [vmem:[#allocation6 + $0x4] sm:$0xf]  ;;  %v5640_v60 = vor.u32 %v7410_v58, %v5637_v59  ;;  %v5452_v58 = vor.u32 %v7365_v49, %v5451_v48  ;;  %v5435_v59 = vld [vmem:[#allocation6 + $0x168] sm:$0xf]  ;;  %v5501_v48 = vld [vmem:[#allocation6 + $0x1f8] sm:$0xf0] }
 0x119   :  { %1767 = vmatpush.bf16.msra.mxu1 %v5704_v29  ;;  %v5256_v42 = vor.u32 %v7314_v39, %v5253_v40  ;;  %1753 = vmatpush.bf16.msra.mxu0 %v5576_v44  ;;  %v5275_v49 = vld [vmem:[#allocation6 + $0x28] sm:$0xf] }
 0x11c   :  { %1740 = vmatpush.bf16.msrb.mxu3 %v5432_v52  ;;  %1726 = vmatpush.bf16.msrb.mxu2 %v5304_v10  ;;  %v5653_v52 = vld [vmem:[#allocation6 + $0x330] sm:$0xf0] }
 0x11d   :  { %1768 = vmatpush.bf16.msra.mxu1 %v5688_v38  ;;  %v5656_v53 = vor.u32 %v7414_v51, %v5653_v52  ;;  %1754 = vmatpush.bf16.msra.mxu0 %v5560_v50  ;;  %v7369_v38 = vld [vmem:[#allocation6 + $0x1b4] sm:$0xf0] }
 0x11e   :  { %v5468_v45 = vor.u32 %v7369_v38, %v5467_v37  ;;  %v7405_v37 = vld [vmem:[#allocation6 + $0x2d4] sm:$0xf0] }
 0x120   :  { %1741 = vmatpush.bf16.msrb.mxu3 %v5416_v0  ;;  %1727 = vmatpush.bf16.msrb.mxu2 %v5288_v21  ;;  %v437_v0 = vperm.slane %v8286_v57, 1  ;;  %v5500_v21 = vor.u32 %v7377_v13, %v5499_v17  ;;  %v5755_v57 = vld [vmem:[#allocation6 + $0x3e8] sm:$0xf]  ;;  %v5324_v17 = vor.u32 %v7333_v4, %v5323_v3  ;;  %v7343_v3 = vld [vmem:[#allocation6 + $0xec] sm:$0xf] }
 0x121   :  { %1769 = vmatpush.bf16.msra.mxu1 %v5672_v47  ;;  %1755 = vmatpush.bf16.msra.mxu0 %v5544_v56  ;;  %v5307_v13 = vld [vmem:[#allocation6 + $0x68] sm:$0xf]  ;;  %v5373_v4 = vld [vmem:[#allocation6 + $0xf8] sm:$0xf0] }
 0x124   :  { %1742 = vmatpush.bf16.msrb.mxu3 %v5400_v16  ;;  %1728 = vmatpush.bf16.msrb.mxu2 %v5272_v32  ;;  %v5371_v32 = vld [vmem:[#allocation6 + $0xe8] sm:$0xf] }
 0x125   :  { %1770 = vmatpush.bf16.msra.mxu1 %v5656_v53  ;;  %1756 = vmatpush.bf16.msra.mxu0 %v5528_v2  ;;  %v5372_v39 = vor.u32 %v7345_v33, %v5371_v32  ;;  %v5291_v33 = vld [vmem:[#allocation6 + $0x48] sm:$0xf] }
 0x128   :  { %1743 = vmatpush.bf16.msrb.mxu3 %v5384_v27  ;;  %1729 = vmatpush.bf16.msrb.mxu2 %v5256_v42  ;;  %v7373_v27 = vld [vmem:[#allocation6 + $0x1d4] sm:$0xf0]  ;;  %v5355_v42 = vld [vmem:[#allocation6 + $0xc8] sm:$0xf] }
 0x129   :  { %1771 = vmatpush.bf16.msra.mxu1 %v5640_v60  ;;  %1757 = vmatpush.bf16.msra.mxu0 %v5512_v6  ;;  %v5484_v34 = vor.u32 %v7373_v27, %v5483_v26  ;;  %v5356_v51 = vor.u32 %v7341_v43, %v5355_v42  ;;  %v5436_v6 = vor.u32 %v7361_v62, %v5435_v59  ;;  %v7353_v26 = vld [vmem:[#allocation6 + $0x134] sm:$0xf0]  ;;  %v5707_v43 = vld [vmem:[#allocation6 + $0x388] sm:$0xf]  ;;  %v5485_v62 = vld [vmem:[#allocation6 + $0x1d8] sm:$0xf0] }
 0x12a   :  { %v7349_v42 = vld [vmem:[#allocation6 + $0x114] sm:$0xf0] }
 0x167   :  { %v801_v61 = vpop.f32.mrf.mxu0 }
 0x168   :  { %v815_v1 = vpop.f32.mrf.mxu1  ;;  %v802_v5 = vadd.f32 %v801_v61, %v437_v0 }
 0x16a   :  { %v816_v12 = vadd.f32 %v815_v1, %v802_v5 }
 0x16c   :  { %v877_v18 = vmax.f32 %v816_v12, 0.0 }
 0x16d   :  { %v773_v7 = vpop.f32.mrf.mxu2 }
 0x16e   :  { %v787_v10 = vpop.f32.mrf.mxu3  ;;  %v774_v15 = vadd.f32 %v773_v7, %v436_v9  ;;  %v5756_v7 = vor.u32 %v7441_v63, %v5755_v57  ;;  %v5259_v57 = vld [vmem:[#allocation6 + $0x8] sm:$0xf]  ;;  %v7317_v63 = vld [vmem:[#allocation6 + $0x14] sm:$0xf0] }
 0x16f   :  { %v803_v11 = vpop.f32.mrf.mxu0 }
 0x170   :  { %v804_v14 = vadd.f32 %v803_v11, %v437_v0  ;;  %v817_v8 = vpop.f32.mrf.mxu1  ;;  %v788_v22 = vadd.f32 %v787_v10, %v774_v15  ;;  %v5340_v0 = vor.u32 %v7337_v55, %v5339_v54  ;;  %v7437_v15 = vld [vmem:[#allocation6 + $0x3d4] sm:$0xf0] }
 0x172   :  { %v818_v16 = vadd.f32 %v817_v8, %v804_v14  ;;  %v876_v35 = vmax.f32 %v788_v22, 0.0  ;;  %v7357_v14 = vld [vmem:[#allocation6 + $0x154] sm:$0xf0]  ;;  %v5739_v8 = vld [vmem:[#allocation6 + $0x3c8] sm:$0xf] }
 0x174   :  { %v881_v19 = vmax.f32 %v818_v16, 0.0 }
 0x175   :  { %v775_v20 = vpop.f32.mrf.mxu2 }
 0x176   :  { %v8290_v23 = vpack.c.bf16 %v881_v19, %v877_v18  ;;  %v776_v24 = vadd.f32 %v775_v20, %v436_v9  ;;  %v789_v25 = vpop.f32.mrf.mxu3  ;;  %v5419_v9 = vld [vmem:[#allocation6 + $0x148] sm:$0xf]  ;;  %v7329_v19 = vld [vmem:[#allocation6 + $0x74] sm:$0xf0] }
 0x177   :  { %v857_v28 = vpop.f32.mrf.mxu0  ;;  %v5627_v20 = vld [vmem:[#allocation6 + $0x2e8] sm:$0xf]  ;;  %v5420_v22 = vor.u32 %v7357_v14, %v5419_v9  ;;  %v5260_v9 = vor.u32 %v7317_v63, %v5259_v57  ;;  %v5469_v14 = vld [vmem:[#allocation6 + $0x1b8] sm:$0xf0] }
 0x178   :  { %v790_v29 = vadd.f32 %v789_v25, %v776_v24  ;;  %v871_v31 = vpop.f32.mrf.mxu1  ;;  %1688 = vmatmul.bf16.vlgmr.msra.gmra.mxu3 %v8290_v23  ;;  %v858_v41 = vadd.f32 %v857_v28, %v439_v30  ;;  %v5740_v24 = vor.u32 %v7437_v15, %v5739_v8  ;;  %v5403_v25 = vld [vmem:[#allocation6 + $0x128] sm:$0xf]  ;;  %v5376_v8 = vor.u32 %v7343_v3, %v5373_v4  ;;  %v7431_v3 = vld [vmem:[#allocation6 + $0x3ac] sm:$0xf]  ;;  %v5725_v4 = vld [vmem:[#allocation6 + $0x3b8] sm:$0xf0] }
 0x179   :  { %1792 = vmatpush.bf16.msra.mxu3 %v5500_v21  ;;  %v7409_v21 = vld [vmem:[#allocation6 + $0x2f4] sm:$0xf0]  ;;  %v5404_v38 = vor.u32 %v7353_v26, %v5403_v25  ;;  %v5563_v15 = vld [vmem:[#allocation6 + $0x268] sm:$0xf]  ;;  %v5453_v25 = vld [vmem:[#allocation6 + $0x198] sm:$0xf0] }
 0x17a   :  { %v880_v36 = vmax.f32 %v790_v29, 0.0  ;;  %v872_v52 = vadd.f32 %v871_v31, %v858_v41  ;;  %v5723_v29 = vld [vmem:[#allocation6 + $0x3a8] sm:$0xf]  ;;  %v5308_v31 = vor.u32 %v7329_v19, %v5307_v13  ;;  %v5628_v32 = vor.u32 %v7409_v21, %v5627_v20  ;;  %v7339_v13 = vld [vmem:[#allocation6 + $0xcc] sm:$0xf] }
 0x17b   :  { %v5387_v41 = vld [vmem:[#allocation6 + $0x108] sm:$0xf]  ;;  %v7417_v21 = vld [vmem:[#allocation6 + $0x334] sm:$0xf0] }
 0x17c   :  { %v8294_v40 = vpack.c.bf16 %v880_v36, %v876_v35  ;;  %v879_v1 = vmax.f32 %v872_v52, 0.0  ;;  %v7325_v35 = vld [vmem:[#allocation6 + $0x54] sm:$0xf0]  ;;  %v5611_v36 = vld [vmem:[#allocation6 + $0x2c8] sm:$0xf] }
 0x17d   :  { %1793 = vmatpush.bf16.msra.mxu3 %v5484_v34  ;;  %v829_v44 = vpop.f32.mrf.mxu2  ;;  %v7401_v52 = vld [vmem:[#allocation6 + $0x2b4] sm:$0xf0]  ;;  %v5659_v20 = vld [vmem:[#allocation6 + $0x328] sm:$0xf] }
 0x17e   :  { %v843_v47 = vpop.f32.mrf.mxu3  ;;  %1674 = vmatmul.bf16.vlgmr.msra.gmra.mxu2 %v8294_v40  ;;  %v830_v60 = vadd.f32 %v829_v44, %v438_v46  ;;  %v7429_v44 = vld [vmem:[#allocation6 + $0x394] sm:$0xf0] }
 0x17f   :  { %1778 = vmatpush.bf16.msra.mxu2 %v5372_v39  ;;  %v859_v50 = vpop.f32.mrf.mxu0  ;;  %v5708_v54 = vor.u32 %v7429_v44, %v5707_v43  ;;  %v5531_v43 = vld [vmem:[#allocation6 + $0x228] sm:$0xf]  ;;  %v7385_v44 = vld [vmem:[#allocation6 + $0x234] sm:$0xf0] }
 0x180   :  { %v860_v53 = vadd.f32 %v859_v50, %v439_v30  ;;  %v873_v56 = vpop.f32.mrf.mxu1  ;;  %v844_v10 = vadd.f32 %v843_v47, %v830_v60  ;;  %v7433_v30 = vld [vmem:[#allocation6 + $0x3b4] sm:$0xf0]  ;;  %v7375_v47 = vld [vmem:[#allocation6 + $0x1ec] sm:$0xf] }
 0x181   :  { %1794 = vmatpush.bf16.msra.mxu3 %v5468_v45  ;;  %v5724_v39 = vor.u32 %v7433_v30, %v5723_v29  ;;  %v5292_v45 = vor.u32 %v7325_v35, %v5291_v33  ;;  %v7321_v50 = vld [vmem:[#allocation6 + $0x34] sm:$0xf0]  ;;  %v5504_v55 = vor.u32 %v7375_v47, %v5501_v48  ;;  %v5660_v29 = vor.u32 %v7417_v21, %v5659_v20  ;;  %v7335_v30 = vld [vmem:[#allocation6 + $0xac] sm:$0xf]  ;;  %v5643_v33 = vld [vmem:[#allocation6 + $0x308] sm:$0xf] }
 0x182   :  { %v874_v61 = vadd.f32 %v873_v56, %v860_v53  ;;  %v878_v27 = vmax.f32 %v844_v10, 0.0  ;;  %v5388_v53 = vor.u32 %v7349_v42, %v5387_v41  ;;  %v5691_v56 = vld [vmem:[#allocation6 + $0x368] sm:$0xf]  ;;  %v5276_v59 = vor.u32 %v7321_v50, %v5275_v49  ;;  %v7413_v35 = vld [vmem:[#allocation6 + $0x314] sm:$0xf0] }
 0x183   :  { %1779 = vmatpush.bf16.msra.mxu2 %v5356_v51  ;;  %v5595_v51 = vld [vmem:[#allocation6 + $0x2a8] sm:$0xf]  ;;  %v5757_v41 = vld [vmem:[#allocation6 + $0x3f8] sm:$0xf0]  ;;  %v7355_v50 = vld [vmem:[#allocation6 + $0x14c] sm:$0xf] }
 0x184   :  { %v883_v2 = vmax.f32 %v874_v61, 0.0  ;;  %v5596_v60 = vor.u32 %v7401_v52, %v5595_v51  ;;  %v7371_v61 = vld [vmem:[#allocation6 + $0x1cc] sm:$0xf]  ;;  %v5325_v47 = vld [vmem:[#allocation6 + $0x98] sm:$0xf0]  ;;  %v5532_v51 = vor.u32 %v7385_v44, %v5531_v43 }
 0x185   :  { %1795 = vmatpush.bf16.msra.mxu3 %v5452_v58  ;;  %v831_v5 = vpop.f32.mrf.mxu2  ;;  %v7425_v58 = vld [vmem:[#allocation6 + $0x374] sm:$0xf0]  ;;  %v5421_v52 = vld [vmem:[#allocation6 + $0x158] sm:$0xf0]  ;;  %v7319_v20 = vld [vmem:[#allocation6 + $0x2c] sm:$0xf] }
 0x186   :  { %v8298_v11 = vpack.c.bf16 %v883_v2, %v879_v1  ;;  %v832_v12 = vadd.f32 %v831_v5, %v438_v46  ;;  %v845_v16 = vpop.f32.mrf.mxu3  ;;  %v5612_v46 = vor.u32 %v7405_v37, %v5611_v36  ;;  %v7397_v1 = vld [vmem:[#allocation6 + $0x294] sm:$0xf0]  ;;  %v5692_v2 = vor.u32 %v7425_v58, %v5691_v56  ;;  %v7359_v36 = vld [vmem:[#allocation6 + $0x16c] sm:$0xf]  ;;  %v5515_v56 = vld [vmem:[#allocation6 + $0x208] sm:$0xf] }
 0x187   :  { %1780 = vmatpush.bf16.msra.mxu2 %v5340_v0  ;;  %v5579_v0 = vld [vmem:[#allocation6 + $0x288] sm:$0xf]  ;;  %v5488_v5 = vor.u32 %v7371_v61, %v5485_v62  ;;  %v7381_v58 = vld [vmem:[#allocation6 + $0x214] sm:$0xf0]  ;;  %v7407_v61 = vld [vmem:[#allocation6 + $0x2ec] sm:$0xf]  ;;  %v5424_v57 = vor.u32 %v7355_v50, %v5421_v52 }
 0x188   :  { %v846_v18 = vadd.f32 %v845_v16, %v832_v12  ;;  %1716 = vmatmul.bf16.vlgmr.msrb.gmra.mxu1 %v8298_v11  ;;  %1744 = vmatmul.bf16.vlgmr.msrb.gmra.mxu3 %v8290_v23  ;;  %v5580_v10 = vor.u32 %v7397_v1, %v5579_v0  ;;  %v7367_v12 = vld [vmem:[#allocation6 + $0x1ac] sm:$0xf]  ;;  %v7393_v16 = vld [vmem:[#allocation6 + $0x274] sm:$0xf0]  ;;  %v5629_v62 = vld [vmem:[#allocation6 + $0x2f8] sm:$0xf0]  ;;  %v5516_v1 = vor.u32 %v7381_v58, %v5515_v56 }
 0x189   :  { %1796 = vmatpush.bf16.msra.mxu3 %v5436_v6  ;;  %1820 = vmatpush.bf16.msrb.mxu1 %v5756_v7  ;;  %v5675_v6 = vld [vmem:[#allocation6 + $0x348] sm:$0xf]  ;;  %v7421_v7 = vld [vmem:[#allocation6 + $0x354] sm:$0xf0]  ;;  %v5472_v19 = vor.u32 %v7367_v12, %v5469_v14  ;;  %v7351_v0 = vld [vmem:[#allocation6 + $0x12c] sm:$0xf] }
 0x18a   :  { %v882_v28 = vmax.f32 %v846_v18, 0.0  ;;  %v5357_v18 = vld [vmem:[#allocation6 + $0xd8] sm:$0xf0]  ;;  %v7391_v44 = vld [vmem:[#allocation6 + $0x26c] sm:$0xf] }
 0x18b   :  { %1781 = vmatpush.bf16.msra.mxu2 %v5324_v17  ;;  %v5676_v17 = vor.u32 %v7421_v7, %v5675_v6  ;;  %v5360_v26 = vor.u32 %v7339_v13, %v5357_v18  ;;  %v5632_v6 = vor.u32 %v7407_v61, %v5629_v62  ;;  %v7323_v7 = vld [vmem:[#allocation6 + $0x4c] sm:$0xf]  ;;  %v5613_v12 = vld [vmem:[#allocation6 + $0x2d8] sm:$0xf0]  ;;  %v5803_v58 = vld [vmem:[#allocation7 + $0x50] sm:$0xf] }
 0x18c   :  { %v8302_v34 = vpack.c.bf16 %v882_v28, %v878_v27  ;;  %v5547_v27 = vld [vmem:[#allocation6 + $0x248] sm:$0xf]  ;;  %v7389_v28 = vld [vmem:[#allocation6 + $0x254] sm:$0xf0]  ;;  %v5709_v13 = vld [vmem:[#allocation6 + $0x398] sm:$0xf0] }
 0x18d   :  { %1797 = vmatpush.bf16.msra.mxu3 %v5420_v22  ;;  %1821 = vmatpush.bf16.msrb.mxu1 %v5740_v24  ;;  %v5564_v22 = vor.u32 %v7393_v16, %v5563_v15  ;;  %v7363_v24 = vld [vmem:[#allocation6 + $0x18c] sm:$0xf]  ;;  %v5548_v37 = vor.u32 %v7389_v28, %v5547_v27  ;;  %v5389_v16 = vld [vmem:[#allocation6 + $0x118] sm:$0xf0] }
 0x18e   :  { %1702 = vmatmul.bf16.vlgmr.msrb.gmra.mxu0 %v8302_v34  ;;  %1730 = vmatmul.bf16.vlgmr.msrb.gmra.mxu2 %v8294_v40  ;;  %v7347_v15 = vld [vmem:[#allocation6 + $0x10c] sm:$0xf]  ;;  %v5277_v21 = vld [vmem:[#allocation6 + $0x38] sm:$0xf0] }
 0x18f   :  { %1782 = vmatpush.bf16.msra.mxu2 %v5308_v31  ;;  %1806 = vmatpush.bf16.msrb.mxu0 %v5628_v32  ;;  %v5341_v31 = vld [vmem:[#allocation6 + $0xb8] sm:$0xf0]  ;;  %v5456_v32 = vor.u32 %v7363_v24, %v5453_v25  ;;  %v5392_v25 = vor.u32 %v7347_v15, %v5389_v16  ;;  %v7423_v27 = vld [vmem:[#allocation6 + $0x36c] sm:$0xf]  ;;  %v5779_v15 = vld [vmem:[#allocation7 + $0x20] sm:$0xf] }
 0x190   :  { %v5344_v42 = vor.u32 %v7335_v30, %v5341_v31  ;;  %v5597_v24 = vld [vmem:[#allocation6 + $0x2b8] sm:$0xf0]  ;;  %v7315_v31 = vld [vmem:[#allocation6 + $0xc] sm:$0xf]  ;;  %v7447_v16 = vld [vmem:[#allocation7 + $0x24] sm:$0xf0] }
 0x191   :  { %1798 = vmatpush.bf16.msra.mxu3 %v5404_v38  ;;  %1822 = vmatpush.bf16.msrb.mxu1 %v5724_v39  ;;  %v5437_v38 = vld [vmem:[#allocation6 + $0x178] sm:$0xf0]  ;;  %v7439_v39 = vld [vmem:[#allocation6 + $0x3ec] sm:$0xf] }
 0x192   :  { %v5440_v48 = vor.u32 %v7359_v36, %v5437_v38  ;;  %v5760_v49 = vor.u32 %v7439_v39, %v5757_v41  ;;  %v5693_v28 = vld [vmem:[#allocation6 + $0x378] sm:$0xf0]  ;;  %v7457_v38 = vld [vmem:[#allocation7 + $0x74] sm:$0xf0]  ;;  %v7419_v39 = vld [vmem:[#allocation6 + $0x34c] sm:$0xf] }
 0x193   :  { %1783 = vmatpush.bf16.msra.mxu2 %v5292_v45  ;;  %1807 = vmatpush.bf16.msrb.mxu0 %v5612_v46  ;;  %v5644_v45 = vor.u32 %v7413_v35, %v5643_v33  ;;  %v7331_v46 = vld [vmem:[#allocation6 + $0x8c] sm:$0xf]  ;;  %v5581_v35 = vld [vmem:[#allocation6 + $0x298] sm:$0xf0]  ;;  %v5696_v36 = vor.u32 %v7423_v27, %v5693_v28  ;;  %v5859_v27 = vld [vmem:[#allocation7 + $0xc0] sm:$0xf] }
 0x194   :  { %v7395_v33 = vld [vmem:[#allocation6 + $0x28c] sm:$0xf]  ;;  %v5677_v41 = vld [vmem:[#allocation6 + $0x358] sm:$0xf0] }
 0x195   :  { %1799 = vmatpush.bf16.msra.mxu3 %v5388_v53  ;;  %1823 = vmatpush.bf16.msrb.mxu1 %v5708_v54  ;;  %v7435_v53 = vld [vmem:[#allocation6 + $0x3cc] sm:$0xf]  ;;  %v5741_v54 = vld [vmem:[#allocation6 + $0x3d8] sm:$0xf0]  ;;  %v5584_v43 = vor.u32 %v7395_v33, %v5581_v35  ;;  %v5851_v35 = vld [vmem:[#allocation7 + $0xb0] sm:$0xf] }
 0x196   :  { %v5744_v63 = vor.u32 %v7435_v53, %v5741_v54  ;;  %v7415_v50 = vld [vmem:[#allocation6 + $0x32c] sm:$0xf]  ;;  %v5549_v54 = vld [vmem:[#allocation6 + $0x258] sm:$0xf0] }
 0x197   :  { %1784 = vmatpush.bf16.msra.mxu2 %v5276_v59  ;;  %1808 = vmatpush.bf16.msrb.mxu0 %v5596_v60  ;;  %v7327_v59 = vld [vmem:[#allocation6 + $0x6c] sm:$0xf]  ;;  %v5309_v60 = vld [vmem:[#allocation6 + $0x78] sm:$0xf0] }
 0x198   :  { %1772 = vmatmul.bf16.vlgmr.msra.gmra.mxu1 %v8298_v11  ;;  %1800 = vmatmul.bf16.vlgmr.msra.gmra.mxu3 %v8290_v23  ;;  %v7387_v53 = vld [vmem:[#allocation6 + $0x24c] sm:$0xf] }
 0x199   :  { %1848 = vmatpush.bf16.msrb.mxu3 %v5504_v55  ;;  %1824 = vmatpush.bf16.msrb.mxu1 %v5692_v2  ;;  %v5328_v55 = vor.u32 %v7331_v46, %v5325_v47  ;;  %v5405_v2 = vld [vmem:[#allocation6 + $0x138] sm:$0xf0]  ;;  %v5680_v47 = vor.u32 %v7419_v39, %v5677_v41  ;;  %v5552_v61 = vor.u32 %v7387_v53, %v5549_v54  ;;  %v7383_v62 = vld [vmem:[#allocation6 + $0x22c] sm:$0xf]  ;;  %v7489_v39 = vld [vmem:[#allocation7 + $0x174] sm:$0xf0] }
 0x19a   :  { %v5408_v14 = vor.u32 %v7351_v0, %v5405_v2  ;;  %v7379_v2 = vld [vmem:[#allocation6 + $0x20c] sm:$0xf]  ;;  %v7454_v41 = vld [vmem:[#allocation7 + $0x64] sm:$0xf]  ;;  %v5835_v54 = vld [vmem:[#allocation7 + $0x90] sm:$0xf] }
 0x19b   :  { %1785 = vmatpush.bf16.msra.mxu2 %v5260_v9  ;;  %1809 = vmatpush.bf16.msrb.mxu0 %v5580_v10  ;;  %v5293_v9 = vld [vmem:[#allocation6 + $0x58] sm:$0xf0]  ;;  %v7403_v10 = vld [vmem:[#allocation6 + $0x2cc] sm:$0xf] }
 0x19c   :  { %v5296_v18 = vor.u32 %v7323_v7, %v5293_v9  ;;  %v5787_v7 = vld [vmem:[#allocation7 + $0x30] sm:$0xf]  ;;  %v7449_v9 = vld [vmem:[#allocation7 + $0x34] sm:$0xf0] }
 0x19d   :  { %1849 = vmatpush.bf16.msrb.mxu3 %v5488_v5  ;;  %1825 = vmatpush.bf16.msrb.mxu1 %v5676_v17  ;;  %v5312_v5 = vor.u32 %v7327_v59, %v5309_v60  ;;  %v7427_v17 = vld [vmem:[#allocation6 + $0x38c] sm:$0xf]  ;;  %v5645_v60 = vld [vmem:[#allocation6 + $0x318] sm:$0xf0] }
 0x19e   :  { %1758 = vmatmul.bf16.vlgmr.msra.gmra.mxu0 %v8302_v34  ;;  %1786 = vmatmul.bf16.vlgmr.msra.gmra.mxu2 %v8294_v40  ;;  %v7411_v59 = vld [vmem:[#allocation6 + $0x30c] sm:$0xf] }
 0x19f   :  { %1834 = vmatpush.bf16.msrb.mxu2 %v5376_v8  ;;  %1810 = vmatpush.bf16.msrb.mxu0 %v5564_v22  ;;  %v5728_v8 = vor.u32 %v7431_v3, %v5725_v4  ;;  %v7399_v22 = vld [vmem:[#allocation6 + $0x2ac] sm:$0xf]  ;;  %v5648_v0 = vor.u32 %v7411_v59, %v5645_v60  ;;  %v5517_v3 = vld [vmem:[#allocation6 + $0x218] sm:$0xf0]  ;;  %v7450_v59 = vld [vmem:[#allocation7 + $0x44] sm:$0xf] }
 0x1a0   :  { %v5600_v30 = vor.u32 %v7399_v22, %v5597_v24  ;;  %v5520_v4 = vor.u32 %v7379_v2, %v5517_v3  ;;  %v7469_v22 = vld [vmem:[#allocation7 + $0xd4] sm:$0xf0]  ;;  %v5797_v60 = vld [vmem:[#allocation7 + $0x48] sm:$0xf0]  ;;  %v7483_v2 = vld [vmem:[#allocation7 + $0x144] sm:$0xf0] }
 0x1a1   :  { %1850 = vmatpush.bf16.msrb.mxu3 %v5472_v19  ;;  %1826 = vmatpush.bf16.msrb.mxu1 %v5660_v29  ;;  %v5616_v19 = vor.u32 %v7403_v10, %v5613_v12  ;;  %v5280_v29 = vor.u32 %v7319_v20, %v5277_v21  ;;  %v5883_v10 = vld [vmem:[#allocation7 + $0xf0] sm:$0xf]  ;;  %v7473_v12 = vld [vmem:[#allocation7 + $0xf4] sm:$0xf0]  ;;  %v7448_v3 = vld [vmem:[#allocation7 + $0x34] sm:$0xf] }
 0x1a2   :  { %v5867_v20 = vld [vmem:[#allocation7 + $0xd0] sm:$0xf] }
 0x1a3   :  { %1835 = vmatpush.bf16.msrb.mxu2 %v5360_v26  ;;  %1811 = vmatpush.bf16.msrb.mxu0 %v5548_v37  ;;  %v5712_v26 = vor.u32 %v7427_v17, %v5709_v13  ;;  %v5819_v37 = vld [vmem:[#allocation7 + $0x70] sm:$0xf]  ;;  %v5875_v17 = vld [vmem:[#allocation7 + $0xe0] sm:$0xf]  ;;  %v5780_v13 = vor.u32 %v7447_v16, %v5779_v15  ;;  %v5868_v24 = vor.u32 %v7469_v22, %v5867_v20  ;;  %v5781_v15 = vld [vmem:[#allocation7 + $0x28] sm:$0xf0] }
 0x1a4   :  { %v5820_v46 = vor.u32 %v7457_v38, %v5819_v37  ;;  %v5947_v37 = vld [vmem:[#allocation7 + $0x170] sm:$0xf]  ;;  %v7470_v16 = vld [vmem:[#allocation7 + $0xe4] sm:$0xf]  ;;  %v5907_v20 = vld [vmem:[#allocation7 + $0x120] sm:$0xf] }
 0x1a5   :  { %1851 = vmatpush.bf16.msrb.mxu3 %v5456_v32  ;;  %1827 = vmatpush.bf16.msrb.mxu1 %v5644_v45  ;;  %v5261_v32 = vld [vmem:[#allocation6 + $0x18] sm:$0xf0] }
 0x1a6   :  { %v5565_v45 = vld [vmem:[#allocation6 + $0x278] sm:$0xf0] }
 0x1a7   :  { %1836 = vmatpush.bf16.msrb.mxu2 %v5344_v42  ;;  %1812 = vmatpush.bf16.msrb.mxu0 %v5532_v51  ;;  %v5264_v42 = vor.u32 %v7315_v31, %v5261_v32  ;;  %v5661_v51 = vld [vmem:[#allocation6 + $0x338] sm:$0xf0]  ;;  %v5568_v52 = vor.u32 %v7391_v44, %v5565_v45  ;;  %v5843_v45 = vld [vmem:[#allocation7 + $0xa0] sm:$0xf] }
 0x1a8   :  { %1828 = vmatmul.bf16.vlgmr.msrb.gmra.mxu1 %v8298_v11  ;;  %v5664_v56 = vor.u32 %v7415_v50, %v5661_v51  ;;  %v5821_v31 = vld [vmem:[#allocation7 + $0x78] sm:$0xf0]  ;;  %v7452_v50 = vld [vmem:[#allocation7 + $0x54] sm:$0xf] }
 0x1a9   :  { %1852 = vmatpush.bf16.msrb.mxu3 %v5440_v48  ;;  %1876 = vmatpush.bf16.msra.mxu1 %v5760_v49  ;;  %v5811_v48 = vld [vmem:[#allocation7 + $0x60] sm:$0xf]  ;;  %v7455_v49 = vld [vmem:[#allocation7 + $0x64] sm:$0xf0]  ;;  %v5805_v51 = vld [vmem:[#allocation7 + $0x58] sm:$0xf0] }
 0x1aa   :  { %v5808_v53 = vor.u32 %v7452_v50, %v5805_v51  ;;  %v7505_v51 = vld [vmem:[#allocation7 + $0x1f4] sm:$0xf0] }
 0x1ab   :  { %1837 = vmatpush.bf16.msrb.mxu2 %v5328_v55  ;;  %1813 = vmatpush.bf16.msrb.mxu0 %v5516_v1  ;;  %v5812_v55 = vor.u32 %v7455_v49, %v5811_v48  ;;  %v7487_v49 = vld [vmem:[#allocation7 + $0x164] sm:$0xf0] }
 0x1ad   :  { %1853 = vmatpush.bf16.msrb.mxu3 %v5424_v57  ;;  %1877 = vmatpush.bf16.msra.mxu1 %v5744_v63  ;;  %v5533_v57 = vld [vmem:[#allocation6 + $0x238] sm:$0xf0] }
 0x1ae   :  { %1814 = vmatmul.bf16.vlgmr.msrb.gmra.mxu0 %v8302_v34  ;;  %v5536_v1 = vor.u32 %v7383_v62, %v5533_v57  ;;  %v5800_v62 = vor.u32 %v7450_v59, %v5797_v60  ;;  %v5827_v57 = vld [vmem:[#allocation7 + $0x80] sm:$0xf] }
 0x1af   :  { %1838 = vmatpush.bf16.msrb.mxu2 %v5312_v5  ;;  %1862 = vmatpush.bf16.msra.mxu0 %v5632_v6  ;;  %v7451_v5 = vld [vmem:[#allocation7 + $0x44] sm:$0xf0] }
 0x1b1   :  { %1854 = vmatpush.bf16.msrb.mxu3 %v5408_v14  ;;  %1878 = vmatpush.bf16.msra.mxu1 %v5728_v8  ;;  %v5788_v14 = vor.u32 %v7449_v9, %v5787_v7  ;;  %v5884_v8 = vor.u32 %v7473_v12, %v5883_v10  ;;  %v5885_v7 = vld [vmem:[#allocation7 + $0xf8] sm:$0xf0]  ;;  %v5915_v10 = vld [vmem:[#allocation7 + $0x130] sm:$0xf]  ;;  %v7481_v12 = vld [vmem:[#allocation7 + $0x134] sm:$0xf0] }
 0x1b3   :  { %1839 = vmatpush.bf16.msrb.mxu2 %v5296_v18  ;;  %1863 = vmatpush.bf16.msra.mxu0 %v5616_v19  ;;  %v7445_v19 = vld [vmem:[#allocation7 + $0x14] sm:$0xf0] }
 0x1b5   :  { %1855 = vmatpush.bf16.msrb.mxu3 %v5392_v25  ;;  %1879 = vmatpush.bf16.msra.mxu1 %v5712_v26  ;;  %v5763_v25 = vld [vmem:[#allocation7] sm:$0xf]  ;;  %v7443_v26 = vld [vmem:[#allocation7 + $0x4] sm:$0xf0] }
 0x1b6   :  { %v5764_v28 = vor.u32 %v7443_v26, %v5763_v25  ;;  %v5773_v25 = vld [vmem:[#allocation7 + $0x18] sm:$0xf0]  ;;  %v7468_v26 = vld [vmem:[#allocation7 + $0xd4] sm:$0xf] }
 0x1b7   :  { %1840 = vmatpush.bf16.msrb.mxu2 %v5280_v29  ;;  %1864 = vmatpush.bf16.msra.mxu0 %v5600_v30  ;;  %v7467_v29 = vld [vmem:[#allocation7 + $0xc4] sm:$0xf0]  ;;  %v7456_v30 = vld [vmem:[#allocation7 + $0x74] sm:$0xf] }
 0x1b8   :  { %1856 = vmatmul.bf16.vlgmr.msrb.gmra.mxu3 %v8290_v23  ;;  %v7453_v23 = vld [vmem:[#allocation7 + $0x54] sm:$0xf0]  ;;  %v5860_v32 = vor.u32 %v7467_v29, %v5859_v27  ;;  %v5824_v33 = vor.u32 %v7456_v30, %v5821_v31 }
 0x1b9   :  { %1880 = vmatpush.bf16.msra.mxu1 %v5696_v36  ;;  %v5804_v63 = vor.u32 %v7453_v23, %v5803_v58  ;;  %2306 = vmatpush.bf16.msra.mxu3 %v5884_v8  ;;  %v7465_v36 = vld [vmem:[#allocation7 + $0xb4] sm:$0xf0]  ;;  %v7446_v8 = vld [vmem:[#allocation7 + $0x24] sm:$0xf] }
 0x1ba   :  { %v5852_v38 = vor.u32 %v7465_v36, %v5851_v35  ;;  %v7485_v23 = vld [vmem:[#allocation7 + $0x154] sm:$0xf0]  ;;  %v7442_v36 = vld [vmem:[#allocation7 + $0x4] sm:$0xf] }
 0x1bb   :  { %1841 = vmatpush.bf16.msrb.mxu2 %v5264_v42  ;;  %1865 = vmatpush.bf16.msra.mxu0 %v5584_v43  ;;  %v5813_v42 = vld [vmem:[#allocation7 + $0x68] sm:$0xf0]  ;;  %v5948_v43 = vor.u32 %v7489_v39, %v5947_v37 }
 0x1bc   :  { %v5816_v44 = vor.u32 %v7454_v41, %v5813_v42  ;;  %v5765_v37 = vld [vmem:[#allocation7 + $0x8] sm:$0xf0] }
 0x1bd   :  { %1881 = vmatpush.bf16.msra.mxu1 %v5680_v47  ;;  %v5939_v47 = vld [vmem:[#allocation7 + $0x160] sm:$0xf]  ;;  %v5768_v39 = vor.u32 %v7442_v36, %v5765_v37  ;;  %v5861_v41 = vld [vmem:[#allocation7 + $0xc8] sm:$0xf0] }
 0x1be   :  { %1842 = vmatmul.bf16.vlgmr.msrb.gmra.mxu2 %v8294_v40  ;;  %v5795_v40 = vld [vmem:[#allocation7 + $0x40] sm:$0xf] }
 0x1bf   :  { %2292 = vmatpush.bf16.msra.mxu2 %v5820_v46  ;;  %1866 = vmatpush.bf16.msra.mxu0 %v5568_v52  ;;  %v5796_v6 = vor.u32 %v7451_v5, %v5795_v40  ;;  %v7463_v46 = vld [vmem:[#allocation7 + $0xa4] sm:$0xf0]  ;;  %v5940_v52 = vor.u32 %v7487_v49, %v5939_v47 }
 0x1c0   :  { %v5844_v48 = vor.u32 %v7463_v46, %v5843_v45  ;;  %v5891_v46 = vld [vmem:[#allocation7 + $0x100] sm:$0xf]  ;;  %v7475_v47 = vld [vmem:[#allocation7 + $0x104] sm:$0xf0] }
 0x1c1   :  { %1882 = vmatpush.bf16.msra.mxu1 %v5664_v56  ;;  %v5931_v56 = vld [vmem:[#allocation7 + $0x150] sm:$0xf]  ;;  %v5892_v50 = vor.u32 %v7475_v47, %v5891_v46  ;;  %v5917_v46 = vld [vmem:[#allocation7 + $0x138] sm:$0xf0] }
 0x1c3   :  { %2293 = vmatpush.bf16.msra.mxu2 %v5812_v55  ;;  %1867 = vmatpush.bf16.msra.mxu0 %v5552_v61  ;;  %v7461_v55 = vld [vmem:[#allocation7 + $0x94] sm:$0xf0]  ;;  %v5932_v61 = vor.u32 %v7485_v23, %v5931_v56  ;;  %v7488_v56 = vld [vmem:[#allocation7 + $0x174] sm:$0xf] }
 0x1c4   :  { %v5836_v58 = vor.u32 %v7461_v55, %v5835_v54 }
 0x1c5   :  { %1883 = vmatpush.bf16.msra.mxu1 %v5648_v0  ;;  %v5923_v0 = vld [vmem:[#allocation7 + $0x140] sm:$0xf] }
 0x1c6   :  { %v5924_v40 = vor.u32 %v7483_v2, %v5923_v0  ;;  %v7462_v0 = vld [vmem:[#allocation7 + $0xa4] sm:$0xf] }
 0x1c7   :  { %2294 = vmatpush.bf16.msra.mxu2 %v5804_v63  ;;  %1868 = vmatpush.bf16.msra.mxu0 %v5536_v1  ;;  %v7459_v63 = vld [vmem:[#allocation7 + $0x84] sm:$0xf0]  ;;  %v7486_v2 = vld [vmem:[#allocation7 + $0x164] sm:$0xf] }
 0x1c8   :  { %1884 = vmatmul.bf16.vlgmr.msra.gmra.mxu1 %v8298_v11  ;;  %v7471_v11 = vld [vmem:[#allocation7 + $0xe4] sm:$0xf0]  ;;  %v5828_v1 = vor.u32 %v7459_v63, %v5827_v57 }
 0x1c9   :  { %v5876_v18 = vor.u32 %v7471_v11, %v5875_v17  ;;  %v5877_v11 = vld [vmem:[#allocation7 + $0xe8] sm:$0xf0]  ;;  %v7503_v57 = vld [vmem:[#allocation7 + $0x1e4] sm:$0xf0] }
 0x1cb   :  { %1869 = vmatpush.bf16.msra.mxu0 %v5520_v4  ;;  %2295 = vmatpush.bf16.msra.mxu2 %v5796_v6  ;;  %v5789_v4 = vld [vmem:[#allocation7 + $0x38] sm:$0xf0]  ;;  %v7472_v6 = vld [vmem:[#allocation7 + $0xf4] sm:$0xf] }
 0x1cc   :  { %2307 = vmatpush.bf16.msra.mxu3 %v5876_v18  ;;  %v5792_v5 = vor.u32 %v7448_v3, %v5789_v4  ;;  %v5888_v9 = vor.u32 %v7472_v6, %v5885_v7 }
 0x1ce   :  { %1870 = vmatmul.bf16.vlgmr.msra.gmra.mxu0 %v8302_v34  ;;  %v5771_v34 = vld [vmem:[#allocation7 + $0x10] sm:$0xf] }
 0x1cf   :  { %2296 = vmatpush.bf16.msra.mxu2 %v5788_v14  ;;  %v5772_v21 = vor.u32 %v7445_v19, %v5771_v34  ;;  %2320 = vmatpush.bf16.msrb.mxu0 %v5948_v43  ;;  %v5916_v14 = vor.u32 %v7481_v12, %v5915_v10  ;;  %v5880_v34 = vor.u32 %v7470_v16, %v5877_v11  ;;  %v8319_v19 = vld [vmem:[%s8461_s30] sm:$0xf]  ;;  %v7501_v10 = vld [vmem:[#allocation7 + $0x1d4] sm:$0xf0]  ;;  %v7484_v16 = vld [vmem:[#allocation7 + $0x154] sm:$0xf] }
 0x1d0   :  { %2308 = vmatpush.bf16.msra.mxu3 %v5868_v24  ;;  %v7444_v24 = vld [vmem:[#allocation7 + $0x14] sm:$0xf]  ;;  %v1018_v31 = vperm.slane %v8319_v19, 0 }
 0x1d1   :  { %v5776_v27 = vor.u32 %v7444_v24, %v5773_v25  ;;  %v5987_v24 = vld [vmem:[#allocation7 + $0x1c0] sm:$0xf]  ;;  %v7499_v25 = vld [vmem:[#allocation7 + $0x1c4] sm:$0xf0] }
 0x1d3   :  { %2297 = vmatpush.bf16.msra.mxu2 %v5780_v13  ;;  %2321 = vmatpush.bf16.msrb.mxu0 %v5940_v52  ;;  %v5784_v13 = vor.u32 %v7446_v8, %v5781_v15  ;;  %v7464_v52 = vld [vmem:[#allocation7 + $0xb4] sm:$0xf]  ;;  %v5837_v15 = vld [vmem:[#allocation7 + $0x98] sm:$0xf0] }
 0x1d4   :  { %2309 = vmatpush.bf16.msra.mxu3 %v5860_v32  ;;  %v5899_v32 = vld [vmem:[#allocation7 + $0x110] sm:$0xf]  ;;  %v7460_v8 = vld [vmem:[#allocation7 + $0x94] sm:$0xf] }
 0x1d7   :  { %2298 = vmatpush.bf16.msra.mxu2 %v5772_v21  ;;  %2322 = vmatpush.bf16.msrb.mxu0 %v5932_v61  ;;  %v7479_v21 = vld [vmem:[#allocation7 + $0x124] sm:$0xf0] }
 0x1d8   :  { %2310 = vmatpush.bf16.msra.mxu3 %v5852_v38  ;;  %v5908_v22 = vor.u32 %v7479_v21, %v5907_v20  ;;  %v7466_v38 = vld [vmem:[#allocation7 + $0xc4] sm:$0xf]  ;;  %v1019_v21 = vperm.slane %v8319_v19, 1 }
 0x1d9   :  { %v5864_v43 = vor.u32 %v7466_v38, %v5861_v41  ;;  %v5979_v41 = vld [vmem:[#allocation7 + $0x1b0] sm:$0xf] }
 0x1db   :  { %2299 = vmatpush.bf16.msra.mxu2 %v5764_v28  ;;  %2323 = vmatpush.bf16.msrb.mxu0 %v5924_v40  ;;  %v5869_v28 = vld [vmem:[#allocation7 + $0xd8] sm:$0xf0]  ;;  %v5941_v40 = vld [vmem:[#allocation7 + $0x168] sm:$0xf0] }
 0x1dc   :  { %2311 = vmatpush.bf16.msra.mxu3 %v5844_v48  ;;  %v5872_v30 = vor.u32 %v7468_v26, %v5869_v28  ;;  %v6011_v48 = vld [vmem:[#allocation7 + $0x1f0] sm:$0xf]  ;;  %v5944_v6 = vor.u32 %v7486_v2, %v5941_v40  ;;  %v7458_v28 = vld [vmem:[#allocation7 + $0x84] sm:$0xf]  ;;  %v1020_v40 = vperm.slane %v8319_v19, 2 }
 0x1dd   :  { %v6012_v54 = vor.u32 %v7505_v51, %v6011_v48  ;;  %v5971_v51 = vld [vmem:[#allocation7 + $0x1a0] sm:$0xf] }
 0x1df   :  { %2348 = vmatpush.bf16.msrb.mxu2 %v5824_v33  ;;  %2324 = vmatpush.bf16.msrb.mxu0 %v5916_v14  ;;  %v7477_v33 = vld [vmem:[#allocation7 + $0x114] sm:$0xf0] }
 0x1e0   :  { %2312 = vmatpush.bf16.msra.mxu3 %v5836_v58  ;;  %v5900_v35 = vor.u32 %v7477_v33, %v5899_v32  ;;  %v5949_v58 = vld [vmem:[#allocation7 + $0x178] sm:$0xf0]  ;;  %2334 = vmatpush.bf16.msrb.mxu1 %v6012_v54  ;;  %v7478_v54 = vld [vmem:[#allocation7 + $0x124] sm:$0xf] }
 0x1e1   :  { %v5952_v59 = vor.u32 %v7488_v56, %v5949_v58 }
 0x1e3   :  { %2349 = vmatpush.bf16.msrb.mxu2 %v5816_v44  ;;  %2325 = vmatpush.bf16.msrb.mxu0 %v5908_v22 }
 0x1e4   :  { %2313 = vmatpush.bf16.msra.mxu3 %v5828_v1  ;;  %v5845_v1 = vld [vmem:[#allocation7 + $0xa8] sm:$0xf0] }
 0x1e5   :  { %v5848_v4 = vor.u32 %v7462_v0, %v5845_v1  ;;  %v7476_v0 = vld [vmem:[#allocation7 + $0x114] sm:$0xf]  ;;  %v5901_v1 = vld [vmem:[#allocation7 + $0x118] sm:$0xf0] }
 0x1e7   :  { %2350 = vmatpush.bf16.msrb.mxu2 %v5808_v53  ;;  %2326 = vmatpush.bf16.msrb.mxu0 %v5900_v35  ;;  %v5853_v53 = vld [vmem:[#allocation7 + $0xb8] sm:$0xf0]  ;;  %v5925_v35 = vld [vmem:[#allocation7 + $0x148] sm:$0xf0] }
 0x1e8   :  { %2362 = vmatpush.bf16.msrb.mxu3 %v5888_v9  ;;  %v5856_v55 = vor.u32 %v7464_v52, %v5853_v53  ;;  %v5995_v9 = vld [vmem:[#allocation7 + $0x1d0] sm:$0xf]  ;;  %v7495_v52 = vld [vmem:[#allocation7 + $0x1a4] sm:$0xf0] }
 0x1e9   :  { %v5996_v14 = vor.u32 %v7501_v10, %v5995_v9  ;;  %v5972_v53 = vor.u32 %v7495_v52, %v5971_v51  ;;  %v7474_v10 = vld [vmem:[#allocation7 + $0x104] sm:$0xf]  ;;  %v5973_v51 = vld [vmem:[#allocation7 + $0x1a8] sm:$0xf0] }
 0x1eb   :  { %2351 = vmatpush.bf16.msrb.mxu2 %v5800_v62  ;;  %2327 = vmatpush.bf16.msrb.mxu0 %v5892_v50  ;;  %v6003_v62 = vld [vmem:[#allocation7 + $0x1e0] sm:$0xf] }
 0x1ec   :  { %2363 = vmatpush.bf16.msrb.mxu3 %v5880_v34  ;;  %v6004_v63 = vor.u32 %v7503_v57, %v6003_v62  ;;  %v5933_v34 = vld [vmem:[#allocation7 + $0x158] sm:$0xf0]  ;;  %v7493_v62 = vld [vmem:[#allocation7 + $0x194] sm:$0xf0] }
 0x1ed   :  { %v5936_v20 = vor.u32 %v7484_v16, %v5933_v34 }
 0x1ee   :  { %2335 = vmatpush.bf16.msrb.mxu1 %v6004_v63 }
 0x1ef   :  { %2352 = vmatpush.bf16.msrb.mxu2 %v5792_v5  ;;  %2376 = vmatpush.bf16.msra.mxu0 %v5952_v59 }
 0x1f0   :  { %2364 = vmatpush.bf16.msrb.mxu3 %v5872_v30  ;;  %v5829_v30 = vld [vmem:[#allocation7 + $0x88] sm:$0xf0] }
 0x1f1   :  { %v5832_v33 = vor.u32 %v7458_v28, %v5829_v30  ;;  %v7500_v30 = vld [vmem:[#allocation7 + $0x1d4] sm:$0xf] }
 0x1f2   :  { %2336 = vmatpush.bf16.msrb.mxu1 %v5996_v14  ;;  %v7504_v14 = vld [vmem:[#allocation7 + $0x1f4] sm:$0xf] }
 0x1f3   :  { %2353 = vmatpush.bf16.msrb.mxu2 %v5784_v13  ;;  %2377 = vmatpush.bf16.msra.mxu0 %v5944_v6  ;;  %v5955_v6 = vld [vmem:[#allocation7 + $0x180] sm:$0xf] }
 0x1f4   :  { %2365 = vmatpush.bf16.msrb.mxu3 %v5864_v43 }
 0x1f7   :  { %2354 = vmatpush.bf16.msrb.mxu2 %v5776_v27  ;;  %2378 = vmatpush.bf16.msra.mxu0 %v5936_v20  ;;  %v5988_v27 = vor.u32 %v7499_v25, %v5987_v24 }
 0x1f8   :  { %2366 = vmatpush.bf16.msrb.mxu3 %v5856_v55  ;;  %v5909_v55 = vld [vmem:[#allocation7 + $0x128] sm:$0xf0] }
 0x1f9   :  { %2337 = vmatpush.bf16.msrb.mxu1 %v5988_v27  ;;  %v5912_v58 = vor.u32 %v7478_v54, %v5909_v55  ;;  %v7492_v54 = vld [vmem:[#allocation7 + $0x194] sm:$0xf]  ;;  %v5965_v55 = vld [vmem:[#allocation7 + $0x198] sm:$0xf0] }
 0x1fb   :  { %v1689_v17 = vpop.f32.mrf.mxu3  ;;  %2355 = vmatpush.bf16.msrb.mxu2 %v5768_v39 }
 0x1fc   :  { %2367 = vmatpush.bf16.msrb.mxu3 %v5848_v4  ;;  %v5904_v4 = vor.u32 %v7476_v0, %v5901_v1 }
 0x201   :  { %v1675_v18 = vpop.f32.mrf.mxu2 }
 0x202   :  { %v1676_v44 = vadd.f32 %v1675_v18, %v1018_v31  ;;  %v5840_v18 = vor.u32 %v7460_v8, %v5837_v15 }
 0x203   :  { %v1691_v45 = vpop.f32.mrf.mxu3 }
 0x204   :  { %v1690_v61 = vadd.f32 %v1689_v17, %v1676_v44  ;;  %2368 = vmatpush.bf16.msrb.mxu3 %v5840_v18 }
 0x205   :  { %v8321_v29 = vpop.f32.mrf.mxu1 }
 0x208   :  { %2369 = vmatpush.bf16.msrb.mxu3 %v5832_v33 }
 0x209   :  { %v1677_v42 = vpop.f32.mrf.mxu2 }
 0x20a   :  { %v1678_v60 = vadd.f32 %v1677_v42, %v1018_v31  ;;  %v7482_v31 = vld [vmem:[#allocation7 + $0x144] sm:$0xf]  ;;  %v7497_v42 = vld [vmem:[#allocation7 + $0x1b4] sm:$0xf0] }
 0x20b   :  { %v1703_v49 = vpop.f32.mrf.mxu0  ;;  %v1745_v13 = vpop.f32.mrf.mxu3  ;;  %v5928_v37 = vor.u32 %v7482_v31, %v5925_v35  ;;  %v5980_v44 = vor.u32 %v7497_v42, %v5979_v41  ;;  %v5997_v31 = vld [vmem:[#allocation7 + $0x1d8] sm:$0xf0] }
 0x20c   :  { %v1704_v3 = vadd.f32 %v1703_v49, %v1690_v61  ;;  %v1692_v7 = vadd.f32 %v1691_v45, %v1678_v60  ;;  %v7480_v45 = vld [vmem:[#allocation7 + $0x134] sm:$0xf]  ;;  %v5963_v61 = vld [vmem:[#allocation7 + $0x190] sm:$0xf] }
 0x20d   :  { %v1719_v23 = vpop.f32.mrf.mxu1  ;;  %2379 = vmatpush.bf16.msra.mxu0 %v5928_v37  ;;  %v5920_v47 = vor.u32 %v7480_v45, %v5917_v46  ;;  %2338 = vmatpush.bf16.msrb.mxu1 %v5980_v44  ;;  %v5964_v63 = vor.u32 %v7493_v62, %v5963_v61  ;;  %v5989_v37 = vld [vmem:[#allocation7 + $0x1c8] sm:$0xf0]  ;;  %v5981_v46 = vld [vmem:[#allocation7 + $0x1b8] sm:$0xf0] }
 0x20e   :  { %v1718_v17 = vadd.f32 %v8321_v29, %v1704_v3 }
 0x210   :  { %v1890_v32 = vmax.f32 %v1718_v17, 0.0 }
 0x211   :  { %v1731_v5 = vpop.f32.mrf.mxu2  ;;  %2380 = vmatpush.bf16.msra.mxu0 %v5920_v47  ;;  %2339 = vmatpush.bf16.msrb.mxu1 %v5972_v53 }
 0x212   :  { %v1732_v38 = vadd.f32 %v1731_v5, %v1019_v21 }
 0x213   :  { %v1705_v12 = vpop.f32.mrf.mxu0  ;;  %v1747_v48 = vpop.f32.mrf.mxu3 }
 0x214   :  { %v1706_v11 = vadd.f32 %v1705_v12, %v1692_v7  ;;  %v1746_v50 = vadd.f32 %v1745_v13, %v1732_v38  ;;  %v7491_v7 = vld [vmem:[#allocation7 + $0x184] sm:$0xf0]  ;;  %v5893_v12 = vld [vmem:[#allocation7 + $0x108] sm:$0xf0]  ;;  %v6013_v13 = vld [vmem:[#allocation7 + $0x1f8] sm:$0xf0] }
 0x215   :  { %v1773_v26 = vpop.f32.mrf.mxu1  ;;  %2381 = vmatpush.bf16.msra.mxu0 %v5912_v58  ;;  %2340 = vmatpush.bf16.msrb.mxu1 %v5964_v63  ;;  %v5956_v9 = vor.u32 %v7491_v7, %v5955_v6  ;;  %v5896_v17 = vor.u32 %v7474_v10, %v5893_v12  ;;  %v5968_v58 = vor.u32 %v7492_v54, %v5965_v55 }
 0x216   :  { %v1720_v22 = vadd.f32 %v1719_v23, %v1706_v11  ;;  %v6016_v11 = vor.u32 %v7504_v14, %v6013_v13  ;;  %v7510_v13 = vld [vmem:[#allocation9 + $0x20] sm:$0xff] }
 0x218   :  { %v1894_v29 = vmax.f32 %v1720_v22, 0.0  ;;  %v6005_v22 = vld [vmem:[#allocation7 + $0x1e8] sm:$0xf0] }
 0x219   :  { %v1733_v36 = vpop.f32.mrf.mxu2  ;;  %2382 = vmatpush.bf16.msra.mxu0 %v5904_v4  ;;  %2341 = vmatpush.bf16.msrb.mxu1 %v5956_v9 }
 0x21a   :  { %v8326_v39 = vpack.c.bf16 %v1894_v29, %v1890_v32  ;;  %v1734_v49 = vadd.f32 %v1733_v36, %v1019_v21  ;;  %v7502_v21 = vld [vmem:[#allocation7 + $0x1e4] sm:$0xf]  ;;  %v6000_v32 = vor.u32 %v7500_v30, %v5997_v31 }
 0x21b   :  { %v1759_v43 = vpop.f32.mrf.mxu0  ;;  %v1801_v15 = vpop.f32.mrf.mxu3  ;;  %v7498_v36 = vld [vmem:[#allocation7 + $0x1c4] sm:$0xf] }
 0x21c   :  { %2300 = vmatmul.bf16.vlgmr.msra.gmra.mxu2 %v8326_v39  ;;  %v1760_v56 = vadd.f32 %v1759_v43, %v1746_v50  ;;  %v1748_v60 = vadd.f32 %v1747_v48, %v1734_v49  ;;  %v5992_v41 = vor.u32 %v7498_v36, %v5989_v37  ;;  %v7494_v50 = vld [vmem:[#allocation7 + $0x1a4] sm:$0xf] }
 0x21d   :  { %v1775_v23 = vpop.f32.mrf.mxu1  ;;  %2383 = vmatpush.bf16.msra.mxu0 %v5896_v17  ;;  %2390 = vmatpush.bf16.msra.mxu1 %v6016_v11  ;;  %v5976_v53 = vor.u32 %v7494_v50, %v5973_v51  ;;  %v7511_v17 = vld [vmem:[#allocation9 + $0x28] sm:$0xff]  ;;  %v7509_v11 = vld [vmem:[#allocation9 + $0x18] sm:$0xff] }
 0x21e   :  { %v1774_v2 = vadd.f32 %v1773_v26, %v1760_v56  ;;  %v6008_v26 = vor.u32 %v7502_v21, %v6005_v22  ;;  %v7507_v21 = vld [vmem:[#allocation9 + $0x8] sm:$0xff] }
 0x21f   :  { %v7519_v22 = vld [vmem:[#allocation9 + $0x68] sm:$0xff] }
 0x220   :  { %v1891_v8 = vmax.f32 %v1774_v2, 0.0 }
 0x221   :  { %v1787_v59 = vpop.f32.mrf.mxu2  ;;  %2391 = vmatpush.bf16.msra.mxu1 %v6008_v26  ;;  %v7517_v26 = vld [vmem:[#allocation9 + $0x58] sm:$0xff] }
 0x222   :  { %v1788_v34 = vadd.f32 %v1787_v59, %v1020_v40  ;;  %v5957_v59 = vld [vmem:[#allocation7 + $0x188] sm:$0xf0] }
 0x223   :  { %v1761_v57 = vpop.f32.mrf.mxu0  ;;  %v1803_v33 = vpop.f32.mrf.mxu3 }
 0x224   :  { %v1762_v3 = vadd.f32 %v1761_v57, %v1748_v60  ;;  %v1802_v28 = vadd.f32 %v1801_v15, %v1788_v34  ;;  %v1021_v60 = vperm.slane %v8319_v19, 3  ;;  %v7513_v15 = vld [vmem:[#allocation9 + $0x38] sm:$0xff]  ;;  %v7508_v34 = vld [vmem:[#allocation9 + $0x10] sm:$0xff] }
 0x225   :  { %v1829_v20 = vpop.f32.mrf.mxu1  ;;  %2392 = vmatpush.bf16.msra.mxu1 %v6000_v32  ;;  %2542 = vmatpush.bf16.msra.mxu2 %v7513_v15  ;;  %v7515_v32 = vld [vmem:[#allocation9 + $0x48] sm:$0xff] }
 0x226   :  { %v1776_v5 = vadd.f32 %v1775_v23, %v1762_v3  ;;  %v7490_v23 = vld [vmem:[#allocation7 + $0x184] sm:$0xf]  ;;  %v7535_v15 = vld [vmem:[#allocation10 + $0x64] sm:$0xf0] }
 0x227   :  { %v5960_v61 = vor.u32 %v7490_v23, %v5957_v59 }
 0x228   :  { %v1895_v16 = vmax.f32 %v1776_v5, 0.0 }
 0x229   :  { %v1789_v24 = vpop.f32.mrf.mxu2  ;;  %2393 = vmatpush.bf16.msra.mxu1 %v5992_v41  ;;  %v7537_v41 = vld [vmem:[#allocation10 + $0x74] sm:$0xf0] }
 0x22a   :  { %v1899_v18 = vpack.c.bf16 %v1895_v16, %v1891_v8  ;;  %v1790_v27 = vadd.f32 %v1789_v24, %v1020_v40  ;;  %v7512_v16 = vld [vmem:[#allocation9 + $0x30] sm:$0xff]  ;;  %v7506_v24 = vld [vmem:[#allocation9] sm:$0xff] }
 0x22b   :  { %v1815_v25 = vpop.f32.mrf.mxu0  ;;  %2543 = vmatpush.bf16.msra.mxu2 %v7512_v16  ;;  %v7534_v16 = vld [vmem:[#allocation10 + $0x64] sm:$0xf] }
 0x22c   :  { %2314 = vmatmul.bf16.vlgmr.msra.gmra.mxu3 %v1899_v18  ;;  %2356 = vmatmul.bf16.vlgmr.msrb.gmra.mxu2 %v8326_v39  ;;  %v1816_v29 = vadd.f32 %v1815_v25, %v1802_v28  ;;  %v1804_v35 = vadd.f32 %v1803_v33, %v1790_v27  ;;  %v7496_v39 = vld [vmem:[#allocation7 + $0x1b4] sm:$0xf]  ;;  %v7518_v25 = vld [vmem:[#allocation9 + $0x60] sm:$0xff] }
 0x22d   :  { %v1831_v44 = vpop.f32.mrf.mxu1  ;;  %v5984_v47 = vor.u32 %v7496_v39, %v5981_v46  ;;  %v7516_v28 = vld [vmem:[#allocation9 + $0x50] sm:$0xff]  ;;  %v7514_v33 = vld [vmem:[#allocation9 + $0x40] sm:$0xff]  ;;  %v6141_v39 = vld [vmem:[#allocation10 + $0x78] sm:$0xf0] }
 0x22e   :  { %v1830_v42 = vadd.f32 %v1829_v20, %v1816_v29  ;;  %v7520_v20 = vld [vmem:[#allocation9 + $0x70] sm:$0xff]  ;;  %v1966_v29 = vld [vmem:[%s8428_s8] sm:$0x3] }
 0x22f   :  { %2394 = vmatpush.bf16.msra.mxu1 %v5984_v47  ;;  %2544 = vmatpush.bf16.msra.mxu2 %v7511_v17  ;;  %v1968_v36 = vperm.slane %v1966_v29, 0 }
 0x230   :  { %v1892_v48 = vmax.f32 %v1830_v42, 0.0  ;;  %v7536_v42 = vld [vmem:[#allocation10 + $0x74] sm:$0xf] }
 0x231   :  { %v6144_v47 = vor.u32 %v7536_v42, %v6141_v39  ;;  %v7526_v42 = vld [vmem:[#allocation10 + $0x24] sm:$0xf]  ;;  %v6091_v39 = vld [vmem:[#allocation10 + $0x10] sm:$0xf] }
 0x233   :  { %v1817_v38 = vpop.f32.mrf.mxu0  ;;  %2395 = vmatpush.bf16.msra.mxu1 %v5976_v53  ;;  %2545 = vmatpush.bf16.msra.mxu2 %v7510_v13  ;;  %v6133_v13 = vld [vmem:[#allocation10 + $0x68] sm:$0xf0] }
 0x234   :  { %v1818_v43 = vadd.f32 %v1817_v38, %v1804_v35  ;;  %v6139_v38 = vld [vmem:[#allocation10 + $0x70] sm:$0xf] }
 0x236   :  { %v1832_v45 = vadd.f32 %v1831_v44, %v1818_v43 }
 0x237   :  { %2396 = vmatpush.bf16.msra.mxu1 %v5968_v58  ;;  %2546 = vmatpush.bf16.msra.mxu2 %v7509_v11  ;;  %v6136_v11 = vor.u32 %v7534_v16, %v6133_v13  ;;  %v7560_v16 = vld [vmem:[#allocation12 + $0xac] sm:$0xf0]  ;;  %v6355_v13 = vld [vmem:[#allocation12 + $0x1a0] sm:$0xf] }
 0x238   :  { %v1896_v49 = vmax.f32 %v1832_v45, 0.0  ;;  %v6140_v45 = vor.u32 %v7537_v41, %v6139_v38  ;;  %v6099_v38 = vld [vmem:[#allocation10 + $0x20] sm:$0xf]  ;;  %v7527_v41 = vld [vmem:[#allocation10 + $0x24] sm:$0xf0] }
 0x23a   :  { %v1900_v52 = vpack.c.bf16 %v1896_v49, %v1892_v48 }
 0x23b   :  { %v1857_v62 = vpop.f32.mrf.mxu3  ;;  %2397 = vmatpush.bf16.msra.mxu1 %v5960_v61  ;;  %2547 = vmatpush.bf16.msra.mxu2 %v7508_v34  ;;  %v1969_v61 = vperm.slane %v1966_v29, 1  ;;  %v7533_v34 = vld [vmem:[#allocation10 + $0x54] sm:$0xf0] }
 0x23c   :  { %2370 = vmatmul.bf16.vlgmr.msrb.gmra.mxu3 %v1899_v18  ;;  %2328 = vmatmul.bf16.vlgmr.msrb.gmra.mxu0 %v1900_v52  ;;  %v7521_v18 = vld [vmem:[#allocation9 + $0x78] sm:$0xff] }
 0x23d   :  { %2556 = vmatpush.bf16.msra.mxu3 %v7521_v18  ;;  %2675 = vmatpush.bf16.msrb.mxu0 %v6140_v45  ;;  %v6123_v18 = vld [vmem:[#allocation10 + $0x50] sm:$0xf]  ;;  %v7529_v29 = vld [vmem:[#allocation10 + $0x34] sm:$0xf0] }
 0x23f   :  { %2548 = vmatpush.bf16.msra.mxu2 %v7507_v21  ;;  %v6124_v21 = vor.u32 %v7533_v34, %v6123_v18  ;;  %v7558_v18 = vld [vmem:[#allocation12 + $0xa4] sm:$0xf] }
 0x241   :  { %v1843_v56 = vpop.f32.mrf.mxu2  ;;  %2557 = vmatpush.bf16.msra.mxu3 %v7520_v20  ;;  %v7532_v20 = vld [vmem:[#allocation10 + $0x54] sm:$0xf] }
 0x242   :  { %v1844_v57 = vadd.f32 %v1843_v56, %v1021_v60 }
 0x243   :  { %v1859_v40 = vpop.f32.mrf.mxu3  ;;  %2549 = vmatpush.bf16.msra.mxu2 %v7506_v24 }
 0x244   :  { %v1858_v3 = vadd.f32 %v1857_v62, %v1844_v57 }
 0x245   :  { %v1885_v63 = vpop.f32.mrf.mxu1  ;;  %2558 = vmatpush.bf16.msra.mxu3 %v7519_v22  ;;  %v6125_v22 = vld [vmem:[#allocation10 + $0x58] sm:$0xf0] }
 0x246   :  { %v6128_v24 = vor.u32 %v7532_v20, %v6125_v22  ;;  %v6229_v20 = vld [vmem:[#allocation12 + $0xb0] sm:$0xf0] }
 0x247   :  { %v6357_v22 = vld [vmem:[#allocation12 + $0x1b0] sm:$0xf0] }
 0x249   :  { %v1845_v0 = vpop.f32.mrf.mxu2  ;;  %2559 = vmatpush.bf16.msra.mxu3 %v7518_v25  ;;  %v6115_v25 = vld [vmem:[#allocation10 + $0x40] sm:$0xf] }
 0x24a   :  { %v1846_v2 = vadd.f32 %v1845_v0, %v1021_v60 }
 0x24b   :  { %v1871_v1 = vpop.f32.mrf.mxu0 }
 0x24c   :  { %v1872_v4 = vadd.f32 %v1871_v1, %v1858_v3  ;;  %2384 = vmatmul.bf16.vlgmr.msra.gmra.mxu0 %v1900_v52  ;;  %v1860_v5 = vadd.f32 %v1859_v40, %v1846_v2 }
 0x24d   :  { %v1887_v10 = vpop.f32.mrf.mxu1  ;;  %2560 = vmatpush.bf16.msra.mxu3 %v7517_v26  ;;  %v7531_v26 = vld [vmem:[#allocation10 + $0x44] sm:$0xf0] }
 0x24e   :  { %v1886_v7 = vadd.f32 %v1885_v63, %v1872_v4 }
 0x250   :  { %v1893_v19 = vmax.f32 %v1886_v7, 0.0 }
 0x251   :  { %2561 = vmatpush.bf16.msra.mxu3 %v7516_v28  ;;  %v6116_v28 = vor.u32 %v7531_v26, %v6115_v25  ;;  %v6232_v25 = vor.u32 %v7558_v18, %v6229_v20  ;;  %v6211_v26 = vld [vmem:[#allocation12 + $0x80] sm:$0xf]  ;;  %v7572_v20 = vld [vmem:[#allocation12 + $0x10c] sm:$0xf0] }
 0x252   :  { %v6275_v18 = vld [vmem:[#allocation12 + $0x100] sm:$0xf] }
 0x253   :  { %v1873_v6 = vpop.f32.mrf.mxu0 }
 0x254   :  { %v1874_v9 = vadd.f32 %v1873_v6, %v1860_v5 }
 0x255   :  { %2562 = vmatpush.bf16.msra.mxu3 %v7515_v32  ;;  %v6107_v32 = vld [vmem:[#allocation10 + $0x30] sm:$0xf] }
 0x256   :  { %v1888_v12 = vadd.f32 %v1887_v10, %v1874_v9 }
 0x258   :  { %v1897_v14 = vmax.f32 %v1888_v12, 0.0 }
 0x259   :  { %2563 = vmatpush.bf16.msra.mxu3 %v7514_v33  ;;  %v7528_v33 = vld [vmem:[#allocation10 + $0x34] sm:$0xf] }
 0x25a   :  { %v1901_v8 = vpack.c.bf16 %v1897_v14, %v1893_v19 }
 0x25c   :  { %2342 = vmatmul.bf16.vlgmr.msrb.gmra.mxu1 %v1901_v8 }
 0x25d   :  { %2689 = vmatpush.bf16.msrb.mxu1 %v6144_v47  ;;  %v7524_v47 = vld [vmem:[#allocation10 + $0x14] sm:$0xf] }
 0x261   :  { %2690 = vmatpush.bf16.msrb.mxu1 %v6136_v11  ;;  %v7592_v11 = vld [vmem:[#allocation12 + $0x1ac] sm:$0xf0] }
 0x265   :  { %2691 = vmatpush.bf16.msrb.mxu1 %v6128_v24  ;;  %v6356_v24 = vor.u32 %v7592_v11, %v6355_v13  ;;  %v7540_v13 = vld [vmem:[#allocation12 + $0xc] sm:$0xf0] }
 0x26c   :  { %2398 = vmatmul.bf16.vlgmr.msra.gmra.mxu1 %v1901_v8  ;;  %v6131_v8 = vld [vmem:[#allocation10 + $0x60] sm:$0xf] }
 0x26d   :  { %v6132_v17 = vor.u32 %v7535_v15, %v6131_v8  ;;  %v6373_v8 = vld [vmem:[#allocation12 + $0x1d0] sm:$0xf0]  ;;  %v6227_v15 = vld [vmem:[#allocation12 + $0xa0] sm:$0xf] }
 0x26e   :  { %v6228_v34 = vor.u32 %v7560_v16, %v6227_v15 }
 0x26f   :  { %2676 = vmatpush.bf16.msrb.mxu0 %v6132_v17 }
 0x273   :  { %2677 = vmatpush.bf16.msrb.mxu0 %v6124_v21  ;;  %v7590_v21 = vld [vmem:[#allocation12 + $0x1a4] sm:$0xf] }
 0x277   :  { %2678 = vmatpush.bf16.msrb.mxu0 %v6116_v28  ;;  %v6339_v28 = vld [vmem:[#allocation12 + $0x180] sm:$0xf] }
 0x29f   :  { %v2301_v27 = vpop.f32.mrf.mxu2 }
 0x2a0   :  { %v2302_v46 = vadd.f32 %v2301_v27, %v1968_v36  ;;  %v7530_v27 = vld [vmem:[#allocation10 + $0x44] sm:$0xf] }
 0x2a7   :  { %v2303_v35 = vpop.f32.mrf.mxu2 }
 0x2a8   :  { %v2304_v48 = vadd.f32 %v2303_v35, %v1968_v36  ;;  %v6108_v35 = vor.u32 %v7529_v29, %v6107_v32  ;;  %v6109_v36 = vld [vmem:[#allocation10 + $0x38] sm:$0xf0]  ;;  %v7554_v32 = vld [vmem:[#allocation12 + $0x84] sm:$0xf]  ;;  %v6213_v29 = vld [vmem:[#allocation12 + $0x90] sm:$0xf0] }
 0x2aa   :  { %2679 = vmatpush.bf16.msrb.mxu0 %v6108_v35  ;;  %v6341_v35 = vld [vmem:[#allocation12 + $0x190] sm:$0xf0] }
 0x2af   :  { %v2315_v30 = vpop.f32.mrf.mxu3  ;;  %v2357_v52 = vpop.f32.mrf.mxu2 }
 0x2b0   :  { %v2316_v49 = vadd.f32 %v2315_v30, %v2302_v46  ;;  %v2358_v0 = vadd.f32 %v2357_v52, %v1969_v61  ;;  %v6117_v30 = vld [vmem:[#allocation10 + $0x48] sm:$0xf0]  ;;  %v7525_v46 = vld [vmem:[#allocation10 + $0x14] sm:$0xf0]  ;;  %v7523_v52 = vld [vmem:[#allocation10 + $0x4] sm:$0xf0] }
 0x2b7   :  { %v2317_v37 = vpop.f32.mrf.mxu3  ;;  %v2359_v57 = vpop.f32.mrf.mxu2 }
 0x2b8   :  { %v2318_v50 = vadd.f32 %v2317_v37, %v2304_v48  ;;  %v2360_v2 = vadd.f32 %v2359_v57, %v1969_v61  ;;  %v6112_v37 = vor.u32 %v7528_v33, %v6109_v36  ;;  %v6092_v48 = vor.u32 %v7525_v46, %v6091_v39  ;;  %v7600_v61 = vld [vmem:[#allocation12 + $0x1ec] sm:$0xf0]  ;;  %v6261_v57 = vld [vmem:[#allocation12 + $0xf0] sm:$0xf0]  ;;  %v7586_v33 = vld [vmem:[#allocation12 + $0x184] sm:$0xf] }
 0x2b9   :  { %v2329_v31 = vpop.f32.mrf.mxu0  ;;  %v7584_v39 = vld [vmem:[#allocation12 + $0x16c] sm:$0xf0]  ;;  %v7550_v46 = vld [vmem:[#allocation12 + $0x64] sm:$0xf] }
 0x2ba   :  { %v2330_v51 = vadd.f32 %v2329_v31, %v2316_v49  ;;  %v6120_v31 = vor.u32 %v7530_v27, %v6117_v30  ;;  %v6093_v49 = vld [vmem:[#allocation10 + $0x18] sm:$0xf0]  ;;  %v7556_v27 = vld [vmem:[#allocation12 + $0x8c] sm:$0xf0]  ;;  %v6360_v30 = vor.u32 %v7590_v21, %v6357_v22  ;;  %v7538_v21 = vld [vmem:[#allocation12 + $0x4] sm:$0xf] }
 0x2bb   :  { %v6212_v36 = vor.u32 %v7556_v27, %v6211_v26  ;;  %v6149_v22 = vld [vmem:[#allocation12 + $0x10] sm:$0xf0]  ;;  %v7570_v26 = vld [vmem:[#allocation12 + $0x104] sm:$0xf] }
 0x2bc   :  { %2692 = vmatpush.bf16.msrb.mxu1 %v6120_v31  ;;  %v7588_v31 = vld [vmem:[#allocation12 + $0x18c] sm:$0xf0]  ;;  %v6277_v27 = vld [vmem:[#allocation12 + $0x110] sm:$0xf0] }
 0x2bf   :  { %v2371_v55 = vpop.f32.mrf.mxu3 }
 0x2c0   :  { %v2372_v3 = vadd.f32 %v2371_v55, %v2358_v0  ;;  %2693 = vmatpush.bf16.msrb.mxu1 %v6112_v37  ;;  %v6085_v55 = vld [vmem:[#allocation10 + $0x8] sm:$0xf0]  ;;  %v6340_v37 = vor.u32 %v7588_v31, %v6339_v28  ;;  %v6152_v31 = vor.u32 %v7538_v21, %v6149_v22  ;;  %v6205_v22 = vld [vmem:[#allocation12 + $0x78] sm:$0xf0] }
 0x2c1   :  { %v2331_v43 = vpop.f32.mrf.mxu0  ;;  %v7551_v21 = vld [vmem:[#allocation12 + $0x6c] sm:$0xf] }
 0x2c2   :  { %v2332_v53 = vadd.f32 %v2331_v43, %v2318_v50  ;;  %v6100_v43 = vor.u32 %v7527_v41, %v6099_v38  ;;  %v6096_v50 = vor.u32 %v7524_v47, %v6093_v49  ;;  %v6216_v38 = vor.u32 %v7554_v32, %v6213_v29  ;;  %v6195_v41 = vld [vmem:[#allocation12 + $0x60] sm:$0xf]  ;;  %v6197_v47 = vld [vmem:[#allocation12 + $0x70] sm:$0xf0]  ;;  %v7582_v49 = vld [vmem:[#allocation12 + $0x164] sm:$0xf] }
 0x2c3   :  { %v6280_v29 = vor.u32 %v7570_v26, %v6277_v27  ;;  %v7583_v26 = vld [vmem:[#allocation12 + $0x16c] sm:$0xf]  ;;  %v6333_v27 = vld [vmem:[#allocation12 + $0x178] sm:$0xf0] }
 0x2c4   :  { %2680 = vmatpush.bf16.msrb.mxu0 %v6100_v43  ;;  %v6323_v43 = vld [vmem:[#allocation12 + $0x160] sm:$0xf] }
 0x2c7   :  { %v2373_v1 = vpop.f32.mrf.mxu3 }
 0x2c8   :  { %v2374_v40 = vadd.f32 %v2373_v1, %v2360_v2  ;;  %2681 = vmatpush.bf16.msrb.mxu0 %v6092_v48  ;;  %v7598_v1 = vld [vmem:[#allocation12 + $0x1e4] sm:$0xf]  ;;  %v6389_v2 = vld [vmem:[#allocation12 + $0x1f0] sm:$0xf0]  ;;  %v7826_v48 = vld [vmem:[%s8430_s10] ss:$0 sm:$0xff] }
 0x2c9   :  { %v2385_v23 = vpop.f32.mrf.mxu0 }
 0x2ca   :  { %v2386_v5 = vadd.f32 %v2385_v23, %v2372_v3  ;;  %v7568_v23 = vld [vmem:[#allocation12 + $0xec] sm:$0xf0]  ;;  %v6243_v3 = vld [vmem:[#allocation12 + $0xc0] sm:$0xf] }
 0x2d1   :  { %v2387_v4 = vpop.f32.mrf.mxu0 }
 0x2d2   :  { %v2388_v6 = vadd.f32 %v2387_v4, %v2374_v40  ;;  %v6392_v4 = vor.u32 %v7598_v1, %v6389_v2  ;;  %v7564_v40 = vld [vmem:[#allocation12 + $0xcc] sm:$0xf0] }
 0x2d9   :  { %v2343_v44 = vpop.f32.mrf.mxu1 }
 0x2da   :  { %v2344_v54 = vadd.f32 %v2343_v44, %v2330_v51  ;;  %v6101_v44 = vld [vmem:[#allocation10 + $0x28] sm:$0xf0]  ;;  %v6083_v51 = vld [vmem:[#allocation10] sm:$0xf] }
 0x2db   :  { %v6104_v45 = vor.u32 %v7526_v42, %v6101_v44  ;;  %v7552_v42 = vld [vmem:[#allocation12 + $0x6c] sm:$0xf0] }
 0x2dc   :  { %v2404_v59 = vmax.f32 %v2344_v54, 0.0  ;;  %v6084_v54 = vor.u32 %v7523_v52, %v6083_v51  ;;  %v6196_v51 = vor.u32 %v7552_v42, %v6195_v41  ;;  %v6324_v52 = vor.u32 %v7584_v39, %v6323_v43  ;;  %v7567_v41 = vld [vmem:[#allocation12 + $0xec] sm:$0xf]  ;;  %v6269_v42 = vld [vmem:[#allocation12 + $0xf8] sm:$0xf0] }
 0x2dd   :  { %2694 = vmatpush.bf16.msrb.mxu1 %v6104_v45  ;;  %v6344_v45 = vor.u32 %v7586_v33, %v6341_v35  ;;  %v6267_v33 = vld [vmem:[#allocation12 + $0xe8] sm:$0xf]  ;;  %v7569_v35 = vld [vmem:[#allocation12 + $0xf4] sm:$0xf0]  ;;  %v6397_v39 = vld [vmem:[#allocation12 + $0x1f8] sm:$0xf0] }
 0x2de   :  { %2682 = vmatpush.bf16.msrb.mxu0 %v6084_v54  ;;  %v6179_v54 = vld [vmem:[#allocation12 + $0x40] sm:$0xf] }
 0x2e1   :  { %v2345_v56 = vpop.f32.mrf.mxu1  ;;  %2695 = vmatpush.bf16.msrb.mxu1 %v6096_v50  ;;  %v6325_v50 = vld [vmem:[#allocation12 + $0x170] sm:$0xf0] }
 0x2e2   :  { %v2346_v58 = vadd.f32 %v2345_v56, %v2332_v53  ;;  %v7522_v53 = vld [vmem:[#allocation10 + $0x4] sm:$0xf] }
 0x2e3   :  { %v6088_v56 = vor.u32 %v7522_v53, %v6085_v55  ;;  %v6200_v53 = vor.u32 %v7550_v46, %v6197_v47  ;;  %v7548_v55 = vld [vmem:[#allocation12 + $0x4c] sm:$0xf0]  ;;  %v6251_v47 = vld [vmem:[#allocation12 + $0xc8] sm:$0xf] }
 0x2e4   :  { %v2406_v60 = vmax.f32 %v2346_v58, 0.0  ;;  %v6259_v58 = vld [vmem:[#allocation12 + $0xe0] sm:$0xf] }
 0x2e5   :  { %2696 = vmatpush.bf16.msrb.mxu1 %v6088_v56  ;;  %v6307_v56 = vld [vmem:[#allocation12 + $0x140] sm:$0xf] }
 0x2e6   :  { %v2408_v62 = vpack.c.bf16 %v2406_v60, %v2404_v59  ;;  %v6387_v59 = vld [vmem:[#allocation12 + $0x1e0] sm:$0xf]  ;;  %v6260_v60 = vor.u32 %v7568_v23, %v6259_v58  ;;  %v6328_v58 = vor.u32 %v7582_v49, %v6325_v50  ;;  %v7580_v23 = vld [vmem:[#allocation12 + $0x14c] sm:$0xf0]  ;;  %v6379_v49 = vld [vmem:[#allocation12 + $0x1c8] sm:$0xf] }
 0x2e7   :  { %v6308_v2 = vor.u32 %v7580_v23, %v6307_v56  ;;  %v7595_v56 = vld [vmem:[#allocation12 + $0x1cc] sm:$0xf] }
 0x2e8   :  { %2550 = vmatmul.bf16.vlgmr.msra.gmra.mxu2 %v2408_v62  ;;  %v7566_v62 = vld [vmem:[#allocation12 + $0xe4] sm:$0xf] }
 0x2e9   :  { %v2399_v63 = vpop.f32.mrf.mxu1  ;;  %v6264_v0 = vor.u32 %v7566_v62, %v6261_v57  ;;  %3103 = vmatpush.bf16.msrb.mxu2 %v6260_v60  ;;  %3145 = vmatpush.bf16.msra.mxu1 %v6392_v4  ;;  %v6181_v60 = vld [vmem:[#allocation12 + $0x50] sm:$0xf0]  ;;  %v7578_v62 = vld [vmem:[#allocation12 + $0x144] sm:$0xf]  ;;  %v6163_v4 = vld [vmem:[#allocation12 + $0x20] sm:$0xf] }
 0x2ea   :  { %v2400_v7 = vadd.f32 %v2399_v63, %v2386_v5  ;;  %v6388_v63 = vor.u32 %v7600_v61, %v6387_v59  ;;  %v6371_v5 = vld [vmem:[#allocation12 + $0x1c0] sm:$0xf]  ;;  %v7546_v59 = vld [vmem:[#allocation12 + $0x44] sm:$0xf]  ;;  %v6309_v57 = vld [vmem:[#allocation12 + $0x150] sm:$0xf0] }
 0x2eb   :  { %3131 = vmatpush.bf16.msra.mxu0 %v6264_v0  ;;  %v6180_v0 = vor.u32 %v7548_v55, %v6179_v54 }
 0x2ec   :  { %v2405_v12 = vmax.f32 %v2400_v7, 0.0  ;;  %3117 = vmatpush.bf16.msrb.mxu3 %v6388_v63  ;;  %v6244_v7 = vor.u32 %v7564_v40, %v6243_v3  ;;  %v6184_v3 = vor.u32 %v7546_v59, %v6181_v60  ;;  %v7544_v40 = vld [vmem:[#allocation12 + $0x2c] sm:$0xf0]  ;;  %v6235_v59 = vld [vmem:[#allocation12 + $0xa8] sm:$0xf] }
 0x2ed   :  { %v7561_v60 = vld [vmem:[#allocation12 + $0xb4] sm:$0xf0] }
 0x2ee   :  { %3104 = vmatpush.bf16.msrb.mxu2 %v6244_v7  ;;  %v7576_v7 = vld [vmem:[#allocation12 + $0x12c] sm:$0xf0] }
 0x2f1   :  { %v2401_v9 = vpop.f32.mrf.mxu1 }
 0x2f2   :  { %v2402_v10 = vadd.f32 %v2401_v9, %v2388_v6  ;;  %v7596_v6 = vld [vmem:[#allocation12 + $0x1cc] sm:$0xf0]  ;;  %3105 = vmatpush.bf16.msrb.mxu2 %v6228_v34 }
 0x2f3   :  { %v6372_v9 = vor.u32 %v7596_v6, %v6371_v5  ;;  %v6291_v5 = vld [vmem:[#allocation12 + $0x120] sm:$0xf]  ;;  %v6312_v6 = vor.u32 %v7578_v62, %v6309_v57  ;;  %v6236_v62 = vor.u32 %v7561_v60, %v6235_v59  ;;  %v7593_v57 = vld [vmem:[#allocation12 + $0x1b4] sm:$0xf0]  ;;  %v7539_v59 = vld [vmem:[#allocation12 + $0xc] sm:$0xf] }
 0x2f4   :  { %v2407_v19 = vmax.f32 %v2402_v10, 0.0  ;;  %v7562_v10 = vld [vmem:[#allocation12 + $0xc4] sm:$0xf]  ;;  %v6292_v15 = vor.u32 %v7576_v7, %v6291_v5  ;;  %v6219_v5 = vld [vmem:[#allocation12 + $0x88] sm:$0xf] }
 0x2f5   :  { %3118 = vmatpush.bf16.msrb.mxu3 %v6372_v9  ;;  %v7542_v9 = vld [vmem:[#allocation12 + $0x24] sm:$0xf]  ;;  %v6347_v7 = vld [vmem:[#allocation12 + $0x188] sm:$0xf]  ;;  %v6157_v60 = vld [vmem:[#allocation12 + $0x18] sm:$0xf0] }
 0x2f6   :  { %v2409_v14 = vpack.c.bf16 %v2407_v19, %v2405_v12  ;;  %v6245_v12 = vld [vmem:[#allocation12 + $0xd0] sm:$0xf0]  ;;  %v7594_v19 = vld [vmem:[#allocation12 + $0x1c4] sm:$0xf]  ;;  %3106 = vmatpush.bf16.msrb.mxu2 %v6212_v36  ;;  %v6395_v36 = vld [vmem:[#allocation12 + $0x1e8] sm:$0xf] }
 0x2f7   :  { %v6376_v17 = vor.u32 %v7594_v19, %v6373_v8  ;;  %v6293_v19 = vld [vmem:[#allocation12 + $0x130] sm:$0xf0]  ;;  %v6164_v8 = vor.u32 %v7544_v40, %v6163_v4  ;;  %v6365_v4 = vld [vmem:[#allocation12 + $0x1b8] sm:$0xf0] }
 0x2f8   :  { %2564 = vmatmul.bf16.vlgmr.msra.gmra.mxu3 %v2409_v14  ;;  %v6248_v14 = vor.u32 %v7562_v10, %v6245_v12  ;;  %v6165_v10 = vld [vmem:[#allocation12 + $0x30] sm:$0xf0]  ;;  %v7574_v12 = vld [vmem:[#allocation12 + $0x124] sm:$0xf] }
 0x2f9   :  { %3146 = vmatpush.bf16.msra.mxu1 %v6376_v17  ;;  %3119 = vmatpush.bf16.msrb.mxu3 %v6356_v24  ;;  %v6168_v16 = vor.u32 %v7542_v9, %v6165_v10  ;;  %v6147_v17 = vld [vmem:[#allocation12] sm:$0xf]  ;;  %v6296_v11 = vor.u32 %v7574_v12, %v6293_v19  ;;  %v7589_v10 = vld [vmem:[#allocation12 + $0x194] sm:$0xf0]  ;;  %v7555_v12 = vld [vmem:[#allocation12 + $0x8c] sm:$0xf] }
 0x2fa   :  { %3132 = vmatpush.bf16.msra.mxu0 %v6248_v14  ;;  %3107 = vmatpush.bf16.msrb.mxu2 %v6196_v51  ;;  %v7597_v51 = vld [vmem:[#allocation12 + $0x1d4] sm:$0xf0]  ;;  %v6221_v19 = vld [vmem:[#allocation12 + $0x98] sm:$0xf0] }
 0x2fb   :  { %v6380_v54 = vor.u32 %v7597_v51, %v6379_v49  ;;  %v6173_v49 = vld [vmem:[#allocation12 + $0x38] sm:$0xf0] }
 0x2fc   :  { %v6301_v51 = vld [vmem:[#allocation12 + $0x138] sm:$0xf0] }
 0x2fd   :  { %3147 = vmatpush.bf16.msra.mxu1 %v6360_v30  ;;  %3120 = vmatpush.bf16.msrb.mxu3 %v6340_v37  ;;  %v6276_v30 = vor.u32 %v7572_v20, %v6275_v18  ;;  %v6268_v37 = vor.u32 %v7569_v35, %v6267_v33  ;;  %v6331_v18 = vld [vmem:[#allocation12 + $0x168] sm:$0xf]  ;;  %v7585_v20 = vld [vmem:[#allocation12 + $0x174] sm:$0xf0] }
 0x2fe   :  { %3133 = vmatpush.bf16.msra.mxu0 %v6232_v25  ;;  %3108 = vmatpush.bf16.msrb.mxu2 %v6180_v0  ;;  %v6148_v25 = vor.u32 %v7540_v13, %v6147_v17  ;;  %v6237_v0 = vld [vmem:[#allocation12 + $0xb8] sm:$0xf0]  ;;  %v6203_v13 = vld [vmem:[#allocation12 + $0x68] sm:$0xf] }
 0x301   :  { %3148 = vmatpush.bf16.msra.mxu1 %v6344_v45  ;;  %3121 = vmatpush.bf16.msrb.mxu3 %v6324_v52  ;;  %v7599_v45 = vld [vmem:[#allocation12 + $0x1ec] sm:$0xf] }
 0x302   :  { %3134 = vmatpush.bf16.msra.mxu0 %v6216_v38  ;;  %3109 = vmatpush.bf16.msrb.mxu2 %v6164_v8  ;;  %v7601_v38 = vld [vmem:[#allocation12 + $0x1f4] sm:$0xf0]  ;;  %v6400_v46 = vor.u32 %v7599_v45, %v6397_v39  ;;  %v7563_v52 = vld [vmem:[#allocation12 + $0xcc] sm:$0xf]  ;;  %v6224_v8 = vor.u32 %v7555_v12, %v6221_v19  ;;  %v6299_v39 = vld [vmem:[#allocation12 + $0x128] sm:$0xf] }
 0x303   :  { %v6396_v43 = vor.u32 %v7601_v38, %v6395_v36  ;;  %v7547_v36 = vld [vmem:[#allocation12 + $0x4c] sm:$0xf]  ;;  %v6643_v12 = vld [vmem:[#allocation13 + $0x1e0] sm:$0xf] }
 0x304   :  { %v7579_v38 = vld [vmem:[#allocation12 + $0x14c] sm:$0xf] }
 0x305   :  { %3149 = vmatpush.bf16.msra.mxu1 %v6328_v58  ;;  %3122 = vmatpush.bf16.msrb.mxu3 %v6308_v2  ;;  %v6381_v58 = vld [vmem:[#allocation12 + $0x1d8] sm:$0xf0] }
 0x306   :  { %3135 = vmatpush.bf16.msra.mxu0 %v6200_v53  ;;  %3110 = vmatpush.bf16.msrb.mxu2 %v6148_v25  ;;  %v6253_v53 = vld [vmem:[#allocation12 + $0xd8] sm:$0xf0]  ;;  %v6384_v23 = vor.u32 %v7595_v56, %v6381_v58  ;;  %v6208_v25 = vor.u32 %v7551_v21, %v6205_v22  ;;  %v6283_v56 = vld [vmem:[#allocation12 + $0x108] sm:$0xf]  ;;  %v6771_v21 = vld [vmem:[#allocation13 + $0x2e0] sm:$0xf] }
 0x307   :  { %v6256_v55 = vor.u32 %v7563_v52, %v6253_v53  ;;  %v7696_v22 = vld [vmem:[#allocation13 + $0x2ec] sm:$0xf0] }
 0x309   :  { %3150 = vmatpush.bf16.msra.mxu1 %v6312_v6  ;;  %3123 = vmatpush.bf16.msrb.mxu3 %v6292_v15  ;;  %v7557_v6 = vld [vmem:[#allocation12 + $0x94] sm:$0xf0]  ;;  %v7587_v15 = vld [vmem:[#allocation12 + $0x18c] sm:$0xf] }
 0x30a   :  { %3136 = vmatpush.bf16.msra.mxu0 %v6184_v3  ;;  %3159 = vmatpush.bf16.msra.mxu2 %v6268_v37  ;;  %v7591_v3 = vld [vmem:[#allocation12 + $0x1ac] sm:$0xf]  ;;  %v6220_v9 = vor.u32 %v7557_v6, %v6219_v5  ;;  %v6189_v37 = vld [vmem:[#allocation12 + $0x58] sm:$0xf0] }
 0x30b   :  { %v6368_v40 = vor.u32 %v7591_v3, %v6365_v4 }
 0x30d   :  { %3151 = vmatpush.bf16.msra.mxu1 %v6296_v11  ;;  %3124 = vmatpush.bf16.msrb.mxu3 %v6276_v30  ;;  %v7553_v11 = vld [vmem:[#allocation12 + $0x74] sm:$0xf0]  ;;  %v6336_v30 = vor.u32 %v7583_v26, %v6333_v27  ;;  %v6627_v27 = vld [vmem:[#allocation13 + $0x1c0] sm:$0xf] }
 0x30e   :  { %3137 = vmatpush.bf16.msra.mxu0 %v6168_v16  ;;  %v6349_v16 = vld [vmem:[#allocation12 + $0x198] sm:$0xf0] }
 0x30f   :  { %v6352_v17 = vor.u32 %v7587_v15, %v6349_v16  ;;  %v6515_v15 = vld [vmem:[#allocation13 + $0xe0] sm:$0xf]  ;;  %v7632_v16 = vld [vmem:[#allocation13 + $0xec] sm:$0xf0] }
 0x311   :  { %3152 = vmatpush.bf16.msra.mxu1 %v6280_v29  ;;  %3173 = vmatpush.bf16.msra.mxu3 %v6396_v43  ;;  %v7581_v29 = vld [vmem:[#allocation12 + $0x154] sm:$0xf0]  ;;  %v6171_v43 = vld [vmem:[#allocation12 + $0x28] sm:$0xf] }
 0x312   :  { %3138 = vmatpush.bf16.msra.mxu0 %v6152_v31  ;;  %v7549_v31 = vld [vmem:[#allocation12 + $0x54] sm:$0xf0] }
 0x315   :  { %3174 = vmatpush.bf16.msra.mxu3 %v6380_v54  ;;  %v6155_v54 = vld [vmem:[#allocation12 + $0x8] sm:$0xf] }
 0x36b   :  { %v2551_v44 = vpop.f32.mrf.mxu2 }
 0x36c   :  { %v2552_v61 = vadd.f32 %v7826_v48, %v2551_v44  ;;  %v6272_v44 = vor.u32 %v7567_v41, %v6269_v42  ;;  %v6192_v41 = vor.u32 %v7547_v36, %v6189_v37  ;;  %v6317_v42 = vld [vmem:[#allocation12 + $0x158] sm:$0xf0]  ;;  %v7724_v36 = vld [vmem:[#allocation13 + $0x3cc] sm:$0xf0]  ;;  %v6755_v37 = vld [vmem:[#allocation13 + $0x2c0] sm:$0xf] }
 0x36d   :  { %v6320_v45 = vor.u32 %v7579_v38, %v6317_v42  ;;  %v7692_v38 = vld [vmem:[#allocation13 + $0x2cc] sm:$0xf0]  ;;  %v6611_v42 = vld [vmem:[#allocation13 + $0x1a0] sm:$0xf] }
 0x373   :  { %v2553_v14 = vpop.f32.mrf.mxu2 }
 0x374   :  { %v2554_v34 = vadd.f32 %v7826_v48, %v2553_v14  ;;  %v7565_v48 = vld [vmem:[#allocation12 + $0xd4] sm:$0xf0]  ;;  %v6348_v14 = vor.u32 %v7589_v10, %v6347_v7 }
 0x375   :  { %v6252_v50 = vor.u32 %v7565_v48, %v6251_v47  ;;  %v7543_v47 = vld [vmem:[#allocation12 + $0x2c] sm:$0xf] }
 0x376   :  { %v6176_v53 = vor.u32 %v7543_v47, %v6173_v49  ;;  %v6867_v47 = vld [vmem:[#allocation13 + $0x3a0] sm:$0xf]  ;;  %v7720_v49 = vld [vmem:[#allocation13 + $0x3ac] sm:$0xf0] }
 0x377   :  { %3160 = vmatpush.bf16.msra.mxu2 %v6252_v50  ;;  %v7575_v50 = vld [vmem:[#allocation12 + $0x12c] sm:$0xf] }
 0x378   :  { %v6304_v58 = vor.u32 %v7575_v50, %v6301_v51  ;;  %v6739_v50 = vld [vmem:[#allocation13 + $0x2a0] sm:$0xf]  ;;  %v7688_v51 = vld [vmem:[#allocation13 + $0x2ac] sm:$0xf0] }
 0x37b   :  { %v2565_v63 = vpop.f32.mrf.mxu3  ;;  %3161 = vmatpush.bf16.msra.mxu2 %v6236_v62  ;;  %v6285_v62 = vld [vmem:[#allocation12 + $0x118] sm:$0xf0] }
 0x37c   :  { %v2566_v1 = vadd.f32 %v2565_v63, %v2552_v61  ;;  %v6363_v61 = vld [vmem:[#allocation12 + $0x1a8] sm:$0xf]  ;;  %v7559_v63 = vld [vmem:[#allocation12 + $0xac] sm:$0xf] }
 0x37d   :  { %v6240_v2 = vor.u32 %v7559_v63, %v6237_v0  ;;  %v6160_v0 = vor.u32 %v7539_v59, %v6157_v60  ;;  %v6851_v59 = vld [vmem:[#allocation13 + $0x380] sm:$0xf]  ;;  %v6740_v60 = vor.u32 %v7688_v51, %v6739_v50 }
 0x37e   :  { %2570 = vst [vmem:[%s8441_s21] sm:$0xff] %v2566_v1 }
 0x37f   :  { %3162 = vmatpush.bf16.msra.mxu2 %v6220_v9 }
 0x383   :  { %v2567_v24 = vpop.f32.mrf.mxu3 }
 0x384   :  { %v2568_v28 = vadd.f32 %v2567_v24, %v2554_v34  ;;  %v6204_v34 = vor.u32 %v7553_v11, %v6203_v13  ;;  %v6332_v24 = vor.u32 %v7585_v20, %v6331_v18  ;;  %v6899_v11 = vld [vmem:[#allocation13 + $0x3e0] sm:$0xf]  ;;  %v7728_v18 = vld [vmem:[#allocation13 + $0x3ec] sm:$0xf0] }
 0x386   :  { %2571 = vst [vmem:[%s8441_s21 + $0x8] sm:$0xff] %v2568_v28  ;;  %v2572_v32 = vpack.c.bf16 %v2568_v28, %v2566_v1  ;;  %v6364_v1 = vor.u32 %v7593_v57, %v6363_v61  ;;  %v6187_v28 = vld [vmem:[#allocation12 + $0x48] sm:$0xf]  ;;  %3163 = vmatpush.bf16.msra.mxu2 %v6204_v34  ;;  %v7571_v61 = vld [vmem:[#allocation12 + $0x10c] sm:$0xf] }
 0x387   :  { %v6188_v33 = vor.u32 %v7549_v31, %v6187_v28  ;;  %v7660_v28 = vld [vmem:[#allocation13 + $0x1cc] sm:$0xf0]  ;;  %v6499_v31 = vld [vmem:[#allocation13 + $0xc0] sm:$0xf] }
 0x388   :  { %2683 = vmatmul.bf16.vlgmr.msrb.gmra.mxu0 %v2572_v32  ;;  %2697 = vmatmul.bf16.vlgmr.msrb.gmra.mxu1 %v2572_v32  ;;  %v6315_v32 = vld [vmem:[#allocation12 + $0x148] sm:$0xf] }
 0x389   :  { %3187 = vmatpush.bf16.msrb.mxu0 %v6272_v44  ;;  %3201 = vmatpush.bf16.msrb.mxu1 %v6400_v46  ;;  %v6316_v35 = vor.u32 %v7581_v29, %v6315_v32  ;;  %v7545_v44 = vld [vmem:[#allocation12 + $0x34] sm:$0xf0]  ;;  %v7628_v32 = vld [vmem:[#allocation13 + $0xcc] sm:$0xf0]  ;;  %v6900_v29 = vor.u32 %v7728_v18, %v6899_v11  ;;  %v6819_v11 = vld [vmem:[#allocation13 + $0x340] sm:$0xf] }
 0x38a   :  { %3175 = vmatpush.bf16.msra.mxu3 %v6364_v1  ;;  %v7577_v46 = vld [vmem:[#allocation12 + $0x134] sm:$0xf0]  ;;  %3164 = vmatpush.bf16.msra.mxu2 %v6188_v33  ;;  %v6172_v48 = vor.u32 %v7545_v44, %v6171_v43  ;;  %v6288_v1 = vor.u32 %v7571_v61, %v6285_v62  ;;  %v6883_v33 = vld [vmem:[#allocation13 + $0x3c0] sm:$0xf]  ;;  %v7656_v43 = vld [vmem:[#allocation13 + $0x1ac] sm:$0xf0]  ;;  %v6500_v44 = vor.u32 %v7628_v32, %v6499_v31 }
 0x38b   :  { %v6300_v52 = vor.u32 %v7577_v46, %v6299_v39  ;;  %v7624_v39 = vld [vmem:[#allocation13 + $0xac] sm:$0xf0]  ;;  %v6884_v46 = vor.u32 %v7724_v36, %v6883_v33  ;;  %v6723_v62 = vld [vmem:[#allocation13 + $0x280] sm:$0xf] }
 0x38c   :  { %v7716_v61 = vld [vmem:[#allocation13 + $0x38c] sm:$0xf0] }
 0x38d   :  { %3188 = vmatpush.bf16.msrb.mxu0 %v6256_v55  ;;  %3202 = vmatpush.bf16.msrb.mxu1 %v6384_v23  ;;  %v7541_v55 = vld [vmem:[#allocation12 + $0x14] sm:$0xf0]  ;;  %v7708_v18 = vld [vmem:[#allocation13 + $0x34c] sm:$0xf0] }
 0x38e   :  { %3176 = vmatpush.bf16.msra.mxu3 %v6348_v14  ;;  %v7573_v23 = vld [vmem:[#allocation12 + $0x114] sm:$0xf0]  ;;  %3165 = vmatpush.bf16.msra.mxu2 %v6172_v48  ;;  %v6156_v57 = vor.u32 %v7541_v55, %v6155_v54  ;;  %v6756_v48 = vor.u32 %v7692_v38, %v6755_v37  ;;  %v7652_v54 = vld [vmem:[#allocation13 + $0x18c] sm:$0xf0]  ;;  %v6645_v38 = vld [vmem:[#allocation13 + $0x1f0] sm:$0xf0] }
 0x38f   :  { %v6284_v63 = vor.u32 %v7573_v23, %v6283_v56  ;;  %v6467_v56 = vld [vmem:[#allocation13 + $0x80] sm:$0xf]  ;;  %v6868_v23 = vor.u32 %v7720_v49, %v6867_v47  ;;  %v7704_v31 = vld [vmem:[#allocation13 + $0x32c] sm:$0xf0]  ;;  %v6629_v47 = vld [vmem:[#allocation13 + $0x1d0] sm:$0xf0] }
 0x390   :  { %v7604_v36 = vld [vmem:[#allocation13 + $0xc] sm:$0xf0]  ;;  %v6501_v49 = vld [vmem:[#allocation13 + $0xd0] sm:$0xf0] }
 0x391   :  { %3189 = vmatpush.bf16.msrb.mxu0 %v6240_v2  ;;  %3203 = vmatpush.bf16.msrb.mxu1 %v6368_v40  ;;  %v2589_v2 = vld [vmem:[%s8432_s12] sm:$0x3] }
 0x392   :  { %3177 = vmatpush.bf16.msra.mxu3 %v6332_v24  ;;  %3166 = vmatpush.bf16.msra.mxu2 %v6156_v57  ;;  %v2591_v40 = vperm.slane %v2589_v2, 0  ;;  %v2592_v5 = vperm.slane %v2589_v2, 1  ;;  %v7684_v57 = vld [vmem:[#allocation13 + $0x28c] sm:$0xf0] }
 0x395   :  { %3190 = vmatpush.bf16.msrb.mxu0 %v6224_v8  ;;  %3204 = vmatpush.bf16.msrb.mxu1 %v6352_v17  ;;  %v7664_v8 = vld [vmem:[#allocation13 + $0x1ec] sm:$0xf0] }
 0x396   :  { %3178 = vmatpush.bf16.msra.mxu3 %v6316_v35  ;;  %v6644_v26 = vor.u32 %v7664_v8, %v6643_v12  ;;  %v6772_v35 = vor.u32 %v7696_v22, %v6771_v21  ;;  %v7644_v8 = vld [vmem:[#allocation13 + $0x14c] sm:$0xf0] }
 0x397   :  { %v7640_v22 = vld [vmem:[#allocation13 + $0x12c] sm:$0xf0] }
 0x399   :  { %3191 = vmatpush.bf16.msrb.mxu0 %v6208_v25  ;;  %3205 = vmatpush.bf16.msrb.mxu1 %v6336_v30  ;;  %v6516_v30 = vor.u32 %v7632_v16, %v6515_v15  ;;  %v6435_v15 = vld [vmem:[#allocation13 + $0x40] sm:$0xf]  ;;  %v7612_v16 = vld [vmem:[#allocation13 + $0x4c] sm:$0xf0] }
 0x39a   :  { %3179 = vmatpush.bf16.msra.mxu3 %v6300_v52  ;;  %v6612_v52 = vor.u32 %v7656_v43, %v6611_v42  ;;  %v6436_v21 = vor.u32 %v7612_v16, %v6435_v15  ;;  %v6517_v42 = vld [vmem:[#allocation13 + $0xf0] sm:$0xf0] }
 0x39b   :  { %v6565_v15 = vld [vmem:[#allocation13 + $0x150] sm:$0xf0] }
 0x39d   :  { %3192 = vmatpush.bf16.msrb.mxu0 %v6192_v41  ;;  %3206 = vmatpush.bf16.msrb.mxu1 %v6320_v45  ;;  %v6628_v41 = vor.u32 %v7660_v28, %v6627_v27  ;;  %v6483_v45 = vld [vmem:[#allocation13 + $0xa0] sm:$0xf]  ;;  %v7608_v27 = vld [vmem:[#allocation13 + $0x2c] sm:$0xf0]  ;;  %v6820_v28 = vor.u32 %v7708_v18, %v6819_v11 }
 0x39e   :  { %3180 = vmatpush.bf16.msra.mxu3 %v6284_v63  ;;  %v6484_v55 = vor.u32 %v7624_v39, %v6483_v45  ;;  %v7658_v39 = vld [vmem:[#allocation13 + $0x1c4] sm:$0xf]  ;;  %v6659_v11 = vld [vmem:[#allocation13 + $0x200] sm:$0xf] }
 0x39f   :  { %v6632_v50 = vor.u32 %v7658_v39, %v6629_v47 }
 0x3a1   :  { %3193 = vmatpush.bf16.msrb.mxu0 %v6176_v53  ;;  %3207 = vmatpush.bf16.msrb.mxu1 %v6304_v58  ;;  %v6595_v53 = vld [vmem:[#allocation13 + $0x180] sm:$0xf]  ;;  %v7620_v58 = vld [vmem:[#allocation13 + $0x8c] sm:$0xf0] }
 0x3a2   :  { %v6596_v63 = vor.u32 %v7652_v54, %v6595_v53  ;;  %v6468_v2 = vor.u32 %v7620_v58, %v6467_v56  ;;  %v6613_v53 = vld [vmem:[#allocation13 + $0x1b0] sm:$0xf0] }
 0x3a3   :  { %v6597_v56 = vld [vmem:[#allocation13 + $0x190] sm:$0xf0] }
 0x3a5   :  { %3194 = vmatpush.bf16.msrb.mxu0 %v6160_v0  ;;  %3208 = vmatpush.bf16.msrb.mxu1 %v6288_v1  ;;  %v6579_v0 = vld [vmem:[#allocation13 + $0x160] sm:$0xf]  ;;  %v7648_v1 = vld [vmem:[#allocation13 + $0x16c] sm:$0xf0] }
 0x3a6   :  { %v6580_v12 = vor.u32 %v7648_v1, %v6579_v0  ;;  %v7700_v0 = vld [vmem:[#allocation13 + $0x30c] sm:$0xf0] }
 0x405   :  { %v2684_v3 = vpop.f32.mrf.mxu0  ;;  %v2698_v4 = vpop.f32.mrf.mxu1 }
 0x406   :  { %v2685_v6 = vadd.f32 %v2684_v3, %v2591_v40  ;;  %v2699_v7 = vadd.f32 %v2698_v4, %v2592_v5  ;;  %v6451_v3 = vld [vmem:[#allocation13 + $0x60] sm:$0xf]  ;;  %v7616_v4 = vld [vmem:[#allocation13 + $0x6c] sm:$0xf0] }
 0x408   :  { %v2703_v17 = vmax.f32 %v2685_v6, 0.0  ;;  %v2704_v13 = vmax.f32 %v2699_v7, 0.0  ;;  %v6724_v6 = vor.u32 %v7684_v57, %v6723_v62  ;;  %v7712_v7 = vld [vmem:[#allocation13 + $0x36c] sm:$0xf0]  ;;  %v6485_v62 = vld [vmem:[#allocation13 + $0xb0] sm:$0xf0] }
 0x40d   :  { %v2686_v9 = vpop.f32.mrf.mxu0  ;;  %v2700_v10 = vpop.f32.mrf.mxu1 }
 0x40e   :  { %v2687_v19 = vadd.f32 %v2686_v9, %v2591_v40  ;;  %v2701_v14 = vadd.f32 %v2700_v10, %v2592_v5  ;;  %v6852_v40 = vor.u32 %v7716_v61, %v6851_v59  ;;  %v6835_v5 = vld [vmem:[#allocation13 + $0x360] sm:$0xf]  ;;  %v7680_v10 = vld [vmem:[#allocation13 + $0x26c] sm:$0xf0]  ;;  %v7622_v61 = vld [vmem:[#allocation13 + $0xa4] sm:$0xf] }
 0x40f   :  { %v6707_v9 = vld [vmem:[#allocation13 + $0x260] sm:$0xf]  ;;  %v7676_v59 = vld [vmem:[#allocation13 + $0x24c] sm:$0xf0]  ;;  %v6488_v57 = vor.u32 %v7622_v61, %v6485_v62  ;;  %v6725_v61 = vld [vmem:[#allocation13 + $0x290] sm:$0xf0] }
 0x410   :  { %v2705_v34 = vmax.f32 %v2687_v19, 0.0  ;;  %v2706_v20 = vmax.f32 %v2701_v14, 0.0  ;;  %v6563_v19 = vld [vmem:[#allocation13 + $0x140] sm:$0xf]  ;;  %v6452_v14 = vor.u32 %v7616_v4, %v6451_v3  ;;  %v6581_v3 = vld [vmem:[#allocation13 + $0x170] sm:$0xf0] }
 0x411   :  { %v7726_v4 = vld [vmem:[#allocation13 + $0x3e4] sm:$0xf] }
 0x412   :  { %v8347_v24 = vpack.c.bf16 %v2705_v34, %v2703_v17  ;;  %v8349_v25 = vpack.c.bf16 %v2706_v20, %v2704_v13  ;;  %v6836_v17 = vor.u32 %v7712_v7, %v6835_v5  ;;  %v6708_v13 = vor.u32 %v7680_v10, %v6707_v9  ;;  %v6547_v20 = vld [vmem:[#allocation13 + $0x120] sm:$0xf]  ;;  %v6901_v5 = vld [vmem:[#allocation13 + $0x3f0] sm:$0xf0]  ;;  %v7672_v7 = vld [vmem:[#allocation13 + $0x22c] sm:$0xf0] }
 0x413   :  { %v6564_v34 = vor.u32 %v7644_v8, %v6563_v19  ;;  %v6548_v32 = vor.u32 %v7640_v22, %v6547_v20  ;;  %v6904_v9 = vor.u32 %v7726_v4, %v6901_v5  ;;  %v6469_v19 = vld [vmem:[#allocation13 + $0x90] sm:$0xf0]  ;;  %v7642_v8 = vld [vmem:[#allocation13 + $0x144] sm:$0xf] }
 0x414   :  { %3111 = vmatmul.bf16.vlgmr.msrb.gmra.mxu2 %v8347_v24  ;;  %3125 = vmatmul.bf16.vlgmr.msrb.gmra.mxu3 %v8349_v25  ;;  %v6568_v16 = vor.u32 %v7642_v8, %v6565_v15  ;;  %v7614_v20 = vld [vmem:[#allocation13 + $0x64] sm:$0xf] }
 0x415   :  { %3139 = vmatmul.bf16.vlgmr.msra.gmra.mxu0 %v8347_v24  ;;  %3153 = vmatmul.bf16.vlgmr.msra.gmra.mxu1 %v8349_v25  ;;  %v7702_v4 = vld [vmem:[#allocation13 + $0x324] sm:$0xf] }
 0x416   :  { %4019 = vmatpush.bf16.msrb.mxu3 %v6644_v26  ;;  %4005 = vmatpush.bf16.msrb.mxu2 %v6516_v30  ;;  %v6419_v26 = vld [vmem:[#allocation13 + $0x20] sm:$0xf] }
 0x417   :  { %4047 = vmatpush.bf16.msra.mxu1 %v6900_v29  ;;  %4033 = vmatpush.bf16.msra.mxu0 %v6772_v35  ;;  %v6803_v30 = vld [vmem:[#allocation13 + $0x320] sm:$0xf]  ;;  %v6420_v33 = vor.u32 %v7608_v27, %v6419_v26  ;;  %v7694_v27 = vld [vmem:[#allocation13 + $0x2e4] sm:$0xf] }
 0x418   :  { %v6531_v29 = vld [vmem:[#allocation13 + $0x100] sm:$0xf]  ;;  %v6804_v37 = vor.u32 %v7704_v31, %v6803_v30  ;;  %v7638_v31 = vld [vmem:[#allocation13 + $0x124] sm:$0xf] }
 0x419   :  { %v6403_v35 = vld [vmem:[#allocation13] sm:$0xf] }
 0x41a   :  { %4020 = vmatpush.bf16.msrb.mxu3 %v6628_v41  ;;  %4006 = vmatpush.bf16.msrb.mxu2 %v6500_v44  ;;  %v7630_v41 = vld [vmem:[#allocation13 + $0xe4] sm:$0xf]  ;;  %v6404_v44 = vor.u32 %v7604_v36, %v6403_v35  ;;  %v6437_v36 = vld [vmem:[#allocation13 + $0x50] sm:$0xf0] }
 0x41b   :  { %4048 = vmatpush.bf16.msra.mxu1 %v6884_v46  ;;  %4034 = vmatpush.bf16.msra.mxu0 %v6756_v48  ;;  %v6520_v46 = vor.u32 %v7630_v41, %v6517_v42  ;;  %v7626_v48 = vld [vmem:[#allocation13 + $0xc4] sm:$0xf]  ;;  %v6757_v41 = vld [vmem:[#allocation13 + $0x2d0] sm:$0xf0] }
 0x41c   :  { %v6504_v51 = vor.u32 %v7626_v48, %v6501_v49  ;;  %v7610_v35 = vld [vmem:[#allocation13 + $0x44] sm:$0xf]  ;;  %v6421_v49 = vld [vmem:[#allocation13 + $0x30] sm:$0xf0] }
 0x41d   :  { %v7606_v48 = vld [vmem:[#allocation13 + $0x24] sm:$0xf] }
 0x41e   :  { %4021 = vmatpush.bf16.msrb.mxu3 %v6612_v52  ;;  %4007 = vmatpush.bf16.msrb.mxu2 %v6484_v55  ;;  %v7654_v52 = vld [vmem:[#allocation13 + $0x1a4] sm:$0xf] }
 0x41f   :  { %4049 = vmatpush.bf16.msra.mxu1 %v6868_v23  ;;  %4035 = vmatpush.bf16.msra.mxu0 %v6740_v60  ;;  %v6616_v54 = vor.u32 %v7654_v52, %v6613_v53  ;;  %v7650_v55 = vld [vmem:[#allocation13 + $0x184] sm:$0xf]  ;;  %v6691_v23 = vld [vmem:[#allocation13 + $0x240] sm:$0xf]  ;;  %v6741_v52 = vld [vmem:[#allocation13 + $0x2b0] sm:$0xf0] }
 0x420   :  { %v6600_v58 = vor.u32 %v7650_v55, %v6597_v56  ;;  %v6692_v60 = vor.u32 %v7676_v59, %v6691_v23  ;;  %v6837_v55 = vld [vmem:[#allocation13 + $0x370] sm:$0xf0]  ;;  %v7682_v59 = vld [vmem:[#allocation13 + $0x284] sm:$0xf] }
 0x421   :  { %v6405_v23 = vld [vmem:[#allocation13 + $0x10] sm:$0xf0]  ;;  %v6728_v62 = vor.u32 %v7682_v59, %v6725_v61  ;;  %v6507_v59 = vld [vmem:[#allocation13 + $0xc8] sm:$0xf] }
 0x422   :  { %4022 = vmatpush.bf16.msrb.mxu3 %v6596_v63  ;;  %4008 = vmatpush.bf16.msrb.mxu2 %v6468_v2  ;;  %v6787_v63 = vld [vmem:[#allocation13 + $0x300] sm:$0xf]  ;;  %v7646_v2 = vld [vmem:[#allocation13 + $0x164] sm:$0xf] }
 0x423   :  { %4050 = vmatpush.bf16.msra.mxu1 %v6852_v40  ;;  %4036 = vmatpush.bf16.msra.mxu0 %v6724_v6  ;;  %v6788_v1 = vor.u32 %v7700_v0, %v6787_v63  ;;  %v6584_v40 = vor.u32 %v7646_v2, %v6581_v3  ;;  %v6675_v6 = vld [vmem:[#allocation13 + $0x220] sm:$0xf]  ;;  %v6821_v63 = vld [vmem:[#allocation13 + $0x350] sm:$0xf0] }
 0x424   :  { %3167 = vmatmul.bf16.vlgmr.msra.gmra.mxu2 %v8347_v24  ;;  %3181 = vmatmul.bf16.vlgmr.msra.gmra.mxu3 %v8349_v25  ;;  %v6676_v10 = vor.u32 %v7672_v7, %v6675_v6  ;;  %v6709_v2 = vld [vmem:[#allocation13 + $0x270] sm:$0xf0]  ;;  %v7674_v6 = vld [vmem:[#allocation13 + $0x244] sm:$0xf] }
 0x425   :  { %3195 = vmatmul.bf16.vlgmr.msrb.gmra.mxu0 %v8347_v24  ;;  %3209 = vmatmul.bf16.vlgmr.msrb.gmra.mxu1 %v8349_v25  ;;  %v7636_v24 = vld [vmem:[#allocation13 + $0x10c] sm:$0xf0]  ;;  %v7662_v25 = vld [vmem:[#allocation13 + $0x1e4] sm:$0xf]  ;;  %v6693_v7 = vld [vmem:[#allocation13 + $0x250] sm:$0xf0] }
 0x426   :  { %4023 = vmatpush.bf16.msrb.mxu3 %v6580_v12  ;;  %4009 = vmatpush.bf16.msrb.mxu2 %v6452_v14  ;;  %v6532_v43 = vor.u32 %v7636_v24, %v6531_v29  ;;  %v6648_v45 = vor.u32 %v7662_v25, %v6645_v38  ;;  %v7618_v12 = vld [vmem:[#allocation13 + $0x84] sm:$0xf]  ;;  %v6440_v38 = vor.u32 %v7610_v35, %v6437_v36 }
 0x427   :  { %4051 = vmatpush.bf16.msra.mxu1 %v6836_v17  ;;  %4037 = vmatpush.bf16.msra.mxu0 %v6708_v13  ;;  %v6472_v14 = vor.u32 %v7618_v12, %v6469_v19  ;;  %v7722_v17 = vld [vmem:[#allocation13 + $0x3c4] sm:$0xf]  ;;  %v6885_v13 = vld [vmem:[#allocation13 + $0x3d0] sm:$0xf0] }
 0x428   :  { %v6888_v18 = vor.u32 %v7722_v17, %v6885_v13  ;;  %v7718_v29 = vld [vmem:[#allocation13 + $0x3a4] sm:$0xf]  ;;  %v6789_v19 = vld [vmem:[#allocation13 + $0x310] sm:$0xf0] }
 0x429   :  { %v7698_v12 = vld [vmem:[#allocation13 + $0x304] sm:$0xf]  ;;  %v6677_v17 = vld [vmem:[#allocation13 + $0x230] sm:$0xf0] }
 0x42a   :  { %4024 = vmatpush.bf16.msrb.mxu3 %v6564_v34  ;;  %4010 = vmatpush.bf16.msrb.mxu2 %v6436_v21  ;;  %v7668_v34 = vld [vmem:[#allocation13 + $0x20c] sm:$0xf0]  ;;  %v6453_v21 = vld [vmem:[#allocation13 + $0x70] sm:$0xf0] }
 0x42b   :  { %4052 = vmatpush.bf16.msra.mxu1 %v6820_v28  ;;  %4038 = vmatpush.bf16.msra.mxu0 %v6692_v60  ;;  %v6660_v22 = vor.u32 %v7668_v34, %v6659_v11  ;;  %v6456_v26 = vor.u32 %v7614_v20, %v6453_v21  ;;  %v6773_v28 = vld [vmem:[#allocation13 + $0x2f0] sm:$0xf0] }
 0x42c   :  { %v6776_v30 = vor.u32 %v7694_v27, %v6773_v28  ;;  %v6661_v34 = vld [vmem:[#allocation13 + $0x210] sm:$0xf0] }
 0x42e   :  { %4025 = vmatpush.bf16.msrb.mxu3 %v6548_v32  ;;  %4011 = vmatpush.bf16.msrb.mxu2 %v6420_v33  ;;  %v6549_v32 = vld [vmem:[#allocation13 + $0x130] sm:$0xf0] }
 0x42f   :  { %4053 = vmatpush.bf16.msra.mxu1 %v6804_v37  ;;  %4039 = vmatpush.bf16.msra.mxu0 %v6676_v10  ;;  %v6552_v24 = vor.u32 %v7638_v31, %v6549_v32  ;;  %v6869_v33 = vld [vmem:[#allocation13 + $0x3b0] sm:$0xf0]  ;;  %v7690_v37 = vld [vmem:[#allocation13 + $0x2c4] sm:$0xf]  ;;  %v8362_v10 = vld [vmem:[%s8434_s14] sm:$0xf] }
 0x430   :  { %v6872_v25 = vor.u32 %v7718_v29, %v6869_v33  ;;  %v6760_v42 = vor.u32 %v7690_v37, %v6757_v41  ;;  %v2776_v13 = vperm.slane %v8362_v10, 1  ;;  %v2775_v27 = vperm.slane %v8362_v10, 0  ;;  %v6651_v33 = vld [vmem:[#allocation13 + $0x1e8] sm:$0xf] }
 0x432   :  { %4026 = vmatpush.bf16.msrb.mxu3 %v6532_v43  ;;  %4012 = vmatpush.bf16.msrb.mxu2 %v6404_v44  ;;  %v7634_v43 = vld [vmem:[#allocation13 + $0x104] sm:$0xf]  ;;  %v6533_v44 = vld [vmem:[#allocation13 + $0x110] sm:$0xf0] }
 0x433   :  { %4054 = vmatpush.bf16.msra.mxu1 %v6788_v1  ;;  %4040 = vmatpush.bf16.msra.mxu0 %v6660_v22  ;;  %v6536_v39 = vor.u32 %v7634_v43, %v6533_v44  ;;  %v7678_v1 = vld [vmem:[#allocation13 + $0x264] sm:$0xf] }
 0x434   :  { %v6712_v3 = vor.u32 %v7678_v1, %v6709_v2  ;;  %v6603_v2 = vld [vmem:[#allocation13 + $0x188] sm:$0xf] }
 0x436   :  { %4075 = vmatpush.bf16.msra.mxu3 %v6648_v45  ;;  %4061 = vmatpush.bf16.msra.mxu2 %v6520_v46  ;;  %v7714_v45 = vld [vmem:[#allocation13 + $0x384] sm:$0xf]  ;;  %v6853_v46 = vld [vmem:[#allocation13 + $0x390] sm:$0xf0] }
 0x437   :  { %4103 = vmatpush.bf16.msrb.mxu1 %v6904_v9  ;;  %4089 = vmatpush.bf16.msrb.mxu0 %v6776_v30  ;;  %v6856_v47 = vor.u32 %v7714_v45, %v6853_v46  ;;  %v6696_v9 = vor.u32 %v7674_v6, %v6693_v7  ;;  %v6635_v45 = vld [vmem:[#allocation13 + $0x1c8] sm:$0xf] }
 0x43a   :  { %4076 = vmatpush.bf16.msra.mxu3 %v6632_v50  ;;  %4062 = vmatpush.bf16.msra.mxu2 %v6504_v51  ;;  %v7686_v50 = vld [vmem:[#allocation13 + $0x2a4] sm:$0xf]  ;;  %v6424_v51 = vor.u32 %v7606_v48, %v6421_v49  ;;  %v6523_v49 = vld [vmem:[#allocation13 + $0xe8] sm:$0xf] }
 0x43b   :  { %4104 = vmatpush.bf16.msrb.mxu1 %v6888_v18  ;;  %4090 = vmatpush.bf16.msrb.mxu0 %v6760_v42  ;;  %v6744_v53 = vor.u32 %v7686_v50, %v6741_v52  ;;  %v7666_v18 = vld [vmem:[#allocation13 + $0x204] sm:$0xf]  ;;  %v7633_v50 = vld [vmem:[#allocation13 + $0xf4] sm:$0xf0] }
 0x43e   :  { %4077 = vmatpush.bf16.msra.mxu3 %v6616_v54  ;;  %4063 = vmatpush.bf16.msra.mxu2 %v6488_v57  ;;  %v7710_v54 = vld [vmem:[#allocation13 + $0x364] sm:$0xf] }
 0x43f   :  { %4105 = vmatpush.bf16.msrb.mxu1 %v6872_v25  ;;  %v6840_v56 = vor.u32 %v7710_v54, %v6837_v55  ;;  %4091 = vmatpush.bf16.msrb.mxu0 %v6744_v53  ;;  %v7706_v57 = vld [vmem:[#allocation13 + $0x344] sm:$0xf]  ;;  %v7665_v25 = vld [vmem:[#allocation13 + $0x1f4] sm:$0xf0]  ;;  %v6524_v55 = vor.u32 %v7633_v50, %v6523_v49 }
 0x440   :  { %v6824_v0 = vor.u32 %v7706_v57, %v6821_v63  ;;  %v6652_v43 = vor.u32 %v7665_v25, %v6651_v33  ;;  %v2777_v63 = vperm.slane %v8362_v10, 2  ;;  %v7725_v33 = vld [vmem:[#allocation13 + $0x3d4] sm:$0xf0] }
 0x442   :  { %4078 = vmatpush.bf16.msra.mxu3 %v6600_v58  ;;  %4064 = vmatpush.bf16.msra.mxu2 %v6472_v14  ;;  %v7602_v58 = vld [vmem:[#allocation13 + $0x4] sm:$0xf]  ;;  %v6792_v14 = vor.u32 %v7698_v12, %v6789_v19 }
 0x443   :  { %4106 = vmatpush.bf16.msrb.mxu1 %v6856_v47  ;;  %v6408_v60 = vor.u32 %v7602_v58, %v6405_v23  ;;  %4092 = vmatpush.bf16.msrb.mxu0 %v6728_v62  ;;  %v7657_v58 = vld [vmem:[#allocation13 + $0x1b4] sm:$0xf0] }
 0x446   :  { %4079 = vmatpush.bf16.msra.mxu3 %v6584_v40  ;;  %4065 = vmatpush.bf16.msra.mxu2 %v6456_v26  ;;  %v6805_v40 = vld [vmem:[#allocation13 + $0x330] sm:$0xf0]  ;;  %v6664_v26 = vor.u32 %v7666_v18, %v6661_v34 }
 0x447   :  { %4107 = vmatpush.bf16.msrb.mxu1 %v6840_v56  ;;  %v6808_v5 = vor.u32 %v7702_v4, %v6805_v40  ;;  %4093 = vmatpush.bf16.msrb.mxu0 %v6712_v3  ;;  %v6619_v56 = vld [vmem:[#allocation13 + $0x1a8] sm:$0xf]  ;;  %v7653_v3 = vld [vmem:[#allocation13 + $0x194] sm:$0xf0] }
 0x448   :  { %v6491_v40 = vld [vmem:[#allocation13 + $0xa8] sm:$0xf]  ;;  %v6604_v19 = vor.u32 %v7653_v3, %v6603_v2  ;;  %v7609_v3 = vld [vmem:[#allocation13 + $0x34] sm:$0xf0] }
 0x449   :  { %v6427_v2 = vld [vmem:[#allocation13 + $0x28] sm:$0xf] }
 0x44a   :  { %4080 = vmatpush.bf16.msra.mxu3 %v6568_v16  ;;  %4066 = vmatpush.bf16.msra.mxu2 %v6440_v38  ;;  %v7670_v16 = vld [vmem:[#allocation13 + $0x224] sm:$0xf] }
 0x44b   :  { %4108 = vmatpush.bf16.msrb.mxu1 %v6824_v0  ;;  %4094 = vmatpush.bf16.msrb.mxu0 %v6696_v9  ;;  %v6680_v11 = vor.u32 %v7670_v16, %v6677_v17  ;;  %v6620_v0 = vor.u32 %v7657_v58, %v6619_v56  ;;  %v6907_v16 = vld [vmem:[#allocation13 + $0x3e8] sm:$0xf]  ;;  %v7729_v17 = vld [vmem:[#allocation13 + $0x3f4] sm:$0xf0] }
 0x44e   :  { %4081 = vmatpush.bf16.msra.mxu3 %v6552_v24  ;;  %4067 = vmatpush.bf16.msra.mxu2 %v6424_v51  ;;  %v2778_v51 = vperm.slane %v8362_v10, 3 }
 0x44f   :  { %4109 = vmatpush.bf16.msrb.mxu1 %v6808_v5  ;;  %4095 = vmatpush.bf16.msrb.mxu0 %v6680_v11  ;;  %v7625_v5 = vld [vmem:[#allocation13 + $0xb4] sm:$0xf0] }
 0x450   :  { %v6492_v10 = vor.u32 %v7625_v5, %v6491_v40  ;;  %v7621_v11 = vld [vmem:[#allocation13 + $0x94] sm:$0xf0] }
 0x451   :  { %v7689_v40 = vld [vmem:[#allocation13 + $0x2b4] sm:$0xf0] }
 0x452   :  { %4082 = vmatpush.bf16.msra.mxu3 %v6536_v39  ;;  %4068 = vmatpush.bf16.msra.mxu2 %v6408_v60  ;;  %v7661_v39 = vld [vmem:[#allocation13 + $0x1d4] sm:$0xf0] }
 0x453   :  { %4110 = vmatpush.bf16.msrb.mxu1 %v6792_v14  ;;  %4096 = vmatpush.bf16.msrb.mxu0 %v6664_v26  ;;  %v6636_v54 = vor.u32 %v7661_v39, %v6635_v45  ;;  %v7629_v60 = vld [vmem:[#allocation13 + $0xd4] sm:$0xf0]  ;;  %v6587_v14 = vld [vmem:[#allocation13 + $0x168] sm:$0xf] }
 0x454   :  { %v6508_v1 = vor.u32 %v7629_v60, %v6507_v59  ;;  %v6555_v39 = vld [vmem:[#allocation13 + $0x128] sm:$0xf]  ;;  %v7637_v60 = vld [vmem:[#allocation13 + $0x114] sm:$0xf0] }
 0x455   :  { %v6539_v59 = vld [vmem:[#allocation13 + $0x108] sm:$0xf] }
 0x456   :  { %v6540_v5 = vor.u32 %v7637_v60, %v6539_v59  ;;  %v6909_v59 = vld [vmem:[#allocation13 + $0x3f8] sm:$0xf0] }
 0x492   :  { %v3140_v8 = vpop.f32.mrf.mxu0  ;;  %v3154_v15 = vpop.f32.mrf.mxu1 }
 0x493   :  { %v3141_v20 = vadd.f32 %v3140_v8, %v2776_v13 }
 0x495   :  { %v3155_v31 = vadd.f32 %v3154_v15, %v3141_v20  ;;  %v7649_v15 = vld [vmem:[#allocation13 + $0x174] sm:$0xf0] }
 0x496   :  { %v6588_v26 = vor.u32 %v7649_v15, %v6587_v14  ;;  %v6411_v15 = vld [vmem:[#allocation13 + $0x8] sm:$0xf] }
 0x497   :  { %v3112_v21 = vpop.f32.mrf.mxu2  ;;  %v3126_v22 = vpop.f32.mrf.mxu3  ;;  %v3216_v35 = vmax.f32 %v3155_v31, 0.0 }
 0x498   :  { %v3113_v29 = vadd.f32 %v3112_v21, %v2775_v27 }
 0x49a   :  { %v3142_v28 = vpop.f32.mrf.mxu0  ;;  %v3156_v30 = vpop.f32.mrf.mxu1  ;;  %v3127_v41 = vadd.f32 %v3126_v22, %v3113_v29  ;;  %v7645_v29 = vld [vmem:[#allocation13 + $0x154] sm:$0xf0] }
 0x49b   :  { %v3143_v32 = vadd.f32 %v3142_v28, %v2776_v13  ;;  %v6475_v13 = vld [vmem:[#allocation13 + $0x88] sm:$0xf] }
 0x49c   :  { %v3215_v52 = vmax.f32 %v3127_v41, 0.0  ;;  %v6571_v28 = vld [vmem:[#allocation13 + $0x148] sm:$0xf] }
 0x49d   :  { %v3157_v24 = vadd.f32 %v3156_v30, %v3143_v32  ;;  %v6476_v32 = vor.u32 %v7621_v11, %v6475_v13  ;;  %v7685_v13 = vld [vmem:[#allocation13 + $0x294] sm:$0xf0] }
 0x49f   :  { %v3220_v36 = vmax.f32 %v3157_v24, 0.0  ;;  %v3114_v37 = vpop.f32.mrf.mxu2  ;;  %v3128_v38 = vpop.f32.mrf.mxu3  ;;  %v6891_v24 = vld [vmem:[#allocation13 + $0x3c8] sm:$0xf] }
 0x4a0   :  { %v3115_v42 = vadd.f32 %v3114_v37, %v2775_v27  ;;  %v6908_v27 = vor.u32 %v7729_v17, %v6907_v16  ;;  %v6779_v37 = vld [vmem:[#allocation13 + $0x2e8] sm:$0xf]  ;;  %v6892_v45 = vor.u32 %v7725_v33, %v6891_v24  ;;  %v7605_v16 = vld [vmem:[#allocation13 + $0x14] sm:$0xf0] }
 0x4a1   :  { %v8366_v44 = vpack.c.bf16 %v3220_v36, %v3216_v35  ;;  %v6459_v35 = vld [vmem:[#allocation13 + $0x68] sm:$0xf]  ;;  %v7617_v36 = vld [vmem:[#allocation13 + $0x74] sm:$0xf0] }
 0x4a2   :  { %v3129_v46 = vadd.f32 %v3128_v38, %v3115_v42  ;;  %v3196_v47 = vpop.f32.mrf.mxu0  ;;  %v3210_v48 = vpop.f32.mrf.mxu1  ;;  %v7697_v38 = vld [vmem:[#allocation13 + $0x2f4] sm:$0xf0]  ;;  %v6460_v50 = vor.u32 %v7617_v36, %v6459_v35  ;;  %v6731_v17 = vld [vmem:[#allocation13 + $0x288] sm:$0xf]  ;;  %v6509_v35 = vld [vmem:[#allocation13 + $0xd8] sm:$0xf0] }
 0x4a3   :  { %4027 = vmatmul.bf16.vlgmr.msrb.gmra.mxu3 %v8366_v44  ;;  %v3197_v61 = vadd.f32 %v3196_v47, %v2778_v51  ;;  %v6875_v47 = vld [vmem:[#allocation13 + $0x3a8] sm:$0xf]  ;;  %v7681_v24 = vld [vmem:[#allocation13 + $0x274] sm:$0xf0] }
 0x4a4   :  { %v3219_v53 = vmax.f32 %v3129_v46, 0.0  ;;  %4131 = vmatpush.bf16.msrb.mxu3 %v6652_v43  ;;  %v6572_v43 = vor.u32 %v7645_v29, %v6571_v28  ;;  %v7641_v46 = vld [vmem:[#allocation13 + $0x134] sm:$0xf0]  ;;  %v7655_v28 = vld [vmem:[#allocation13 + $0x1ac] sm:$0xf] }
 0x4a5   :  { %v3211_v6 = vadd.f32 %v3210_v48, %v3197_v61  ;;  %v7721_v48 = vld [vmem:[#allocation13 + $0x3b4] sm:$0xf0]  ;;  %v6556_v56 = vor.u32 %v7641_v46, %v6555_v39  ;;  %v6859_v61 = vld [vmem:[#allocation13 + $0x388] sm:$0xf] }
 0x4a6   :  { %v8370_v23 = vpack.c.bf16 %v3219_v53, %v3215_v52  ;;  %v6443_v52 = vld [vmem:[#allocation13 + $0x48] sm:$0xf]  ;;  %v7613_v53 = vld [vmem:[#allocation13 + $0x54] sm:$0xf0]  ;;  %v6876_v58 = vor.u32 %v7721_v48, %v6875_v47  ;;  %v7623_v48 = vld [vmem:[#allocation13 + $0xac] sm:$0xf] }
 0x4a7   :  { %v3168_v62 = vpop.f32.mrf.mxu2  ;;  %v3182_v57 = vpop.f32.mrf.mxu3  ;;  %v3218_v18 = vmax.f32 %v3211_v6, 0.0  ;;  %v6715_v29 = vld [vmem:[#allocation13 + $0x268] sm:$0xf]  ;;  %v7677_v46 = vld [vmem:[#allocation13 + $0x254] sm:$0xf0] }
 0x4a8   :  { %4132 = vmatpush.bf16.msrb.mxu3 %v6636_v54  ;;  %4013 = vmatmul.bf16.vlgmr.msrb.gmra.mxu2 %v8370_v23  ;;  %v3169_v9 = vadd.f32 %v3168_v62, %v2777_v63  ;;  %v6763_v54 = vld [vmem:[#allocation13 + $0x2c8] sm:$0xf]  ;;  %v7717_v62 = vld [vmem:[#allocation13 + $0x394] sm:$0xf0] }
 0x4a9   :  { %4117 = vmatpush.bf16.msrb.mxu2 %v6524_v55  ;;  %v7693_v55 = vld [vmem:[#allocation13 + $0x2d4] sm:$0xf0]  ;;  %v6860_v6 = vor.u32 %v7717_v62, %v6859_v61  ;;  %v6699_v39 = vld [vmem:[#allocation13 + $0x248] sm:$0xf] }
 0x4aa   :  { %v3198_v4 = vpop.f32.mrf.mxu0  ;;  %v3212_v12 = vpop.f32.mrf.mxu1  ;;  %v3183_v21 = vadd.f32 %v3182_v57, %v3169_v9  ;;  %v6444_v57 = vor.u32 %v7613_v53, %v6443_v52  ;;  %v6843_v9 = vld [vmem:[#allocation13 + $0x368] sm:$0xf]  ;;  %v7701_v53 = vld [vmem:[#allocation13 + $0x314] sm:$0xf0] }
 0x4ab   :  { %v3199_v7 = vadd.f32 %v3198_v4, %v2778_v51  ;;  %v6780_v51 = vor.u32 %v7697_v38, %v6779_v37  ;;  %v6747_v4 = vld [vmem:[#allocation13 + $0x2a8] sm:$0xf]  ;;  %v7705_v38 = vld [vmem:[#allocation13 + $0x334] sm:$0xf0] }
 0x4ac   :  { %4133 = vmatpush.bf16.msrb.mxu3 %v6620_v0  ;;  %v3217_v41 = vmax.f32 %v3183_v21, 0.0  ;;  %v7663_v0 = vld [vmem:[#allocation13 + $0x1ec] sm:$0xf]  ;;  %v6748_v14 = vor.u32 %v7689_v40, %v6747_v4  ;;  %v6827_v21 = vld [vmem:[#allocation13 + $0x348] sm:$0xf] }
 0x4ad   :  { %v3213_v8 = vadd.f32 %v3212_v12, %v3199_v7  ;;  %4118 = vmatpush.bf16.msrb.mxu2 %v6508_v1  ;;  %v6653_v1 = vld [vmem:[#allocation13 + $0x1f8] sm:$0xf0]  ;;  %v7713_v12 = vld [vmem:[#allocation13 + $0x374] sm:$0xf0]  ;;  %v6811_v37 = vld [vmem:[#allocation13 + $0x328] sm:$0xf] }
 0x4ae   :  { %v6656_v7 = vor.u32 %v7663_v0, %v6653_v1  ;;  %v6844_v11 = vor.u32 %v7713_v12, %v6843_v9  ;;  %v6812_v47 = vor.u32 %v7705_v38, %v6811_v37  ;;  %v6795_v52 = vld [vmem:[#allocation13 + $0x308] sm:$0xf]  ;;  %v7673_v62 = vld [vmem:[#allocation13 + $0x234] sm:$0xf0]  ;;  %v6477_v0 = vld [vmem:[#allocation13 + $0x98] sm:$0xf0] }
 0x4af   :  { %v3222_v34 = vmax.f32 %v3213_v8, 0.0  ;;  %v3170_v20 = vpop.f32.mrf.mxu2  ;;  %v3184_v31 = vpop.f32.mrf.mxu3  ;;  %v7659_v8 = vld [vmem:[#allocation13 + $0x1cc] sm:$0xf]  ;;  %v6683_v61 = vld [vmem:[#allocation13 + $0x228] sm:$0xf] }
 0x4b0   :  { %4134 = vmatpush.bf16.msrb.mxu3 %v6604_v19  ;;  %v3171_v22 = vadd.f32 %v3170_v20, %v2777_v63  ;;  %v6764_v63 = vor.u32 %v7693_v55, %v6763_v54  ;;  %v6428_v19 = vor.u32 %v7609_v3, %v6427_v2  ;;  %v7647_v54 = vld [vmem:[#allocation13 + $0x16c] sm:$0xf]  ;;  %v6700_v55 = vor.u32 %v7677_v46, %v6699_v39  ;;  %v6573_v40 = vld [vmem:[#allocation13 + $0x158] sm:$0xf0]  ;;  %v6667_v9 = vld [vmem:[#allocation13 + $0x208] sm:$0xf] }
 0x4b1   :  { %v8374_v30 = vpack.c.bf16 %v3222_v34, %v3218_v18  ;;  %4119 = vmatpush.bf16.msrb.mxu2 %v6492_v10  ;;  %v6637_v10 = vld [vmem:[#allocation13 + $0x1d8] sm:$0xf0]  ;;  %v7631_v18 = vld [vmem:[#allocation13 + $0xec] sm:$0xf]  ;;  %v6684_v4 = vor.u32 %v7673_v62, %v6683_v61  ;;  %v7669_v12 = vld [vmem:[#allocation13 + $0x214] sm:$0xf0] }
 0x4b2   :  { %v3185_v25 = vadd.f32 %v3184_v31, %v3171_v22  ;;  %v6525_v34 = vld [vmem:[#allocation13 + $0xf8] sm:$0xf0]  ;;  %v6640_v20 = vor.u32 %v7659_v8, %v6637_v10  ;;  %v7709_v22 = vld [vmem:[#allocation13 + $0x354] sm:$0xf0]  ;;  %v7643_v3 = vld [vmem:[#allocation13 + $0x14c] sm:$0xf] }
 0x4b3   :  { %4055 = vmatmul.bf16.vlgmr.msra.gmra.mxu1 %v8374_v30  ;;  %4083 = vmatmul.bf16.vlgmr.msra.gmra.mxu3 %v8366_v44  ;;  %v6621_v31 = vld [vmem:[#allocation13 + $0x1b8] sm:$0xf0]  ;;  %v6828_v33 = vor.u32 %v7709_v22, %v6827_v21  ;;  %v7695_v8 = vld [vmem:[#allocation13 + $0x2ec] sm:$0xf] }
 0x4b4   :  { %v3221_v42 = vmax.f32 %v3185_v25, 0.0  ;;  %4135 = vmatpush.bf16.msrb.mxu3 %v6588_v26  ;;  %4159 = vmatpush.bf16.msra.mxu1 %v6908_v27  ;;  %v6412_v26 = vor.u32 %v7605_v16, %v6411_v15  ;;  %v6732_v27 = vor.u32 %v7685_v13, %v6731_v17  ;;  %v7627_v25 = vld [vmem:[#allocation13 + $0xcc] sm:$0xf]  ;;  %v6624_v36 = vor.u32 %v7655_v28, %v6621_v31  ;;  %v6781_v10 = vld [vmem:[#allocation13 + $0x2f8] sm:$0xf0] }
 0x4b5   :  { %4120 = vmatpush.bf16.msrb.mxu2 %v6476_v32  ;;  %v6528_v32 = vor.u32 %v7631_v18, %v6525_v34  ;;  %v6576_v15 = vor.u32 %v7643_v3, %v6573_v40  ;;  %v7639_v17 = vld [vmem:[#allocation13 + $0x12c] sm:$0xf]  ;;  %v6668_v13 = vor.u32 %v7669_v12, %v6667_v9  ;;  %v6877_v34 = vld [vmem:[#allocation13 + $0x3b8] sm:$0xf0]  ;;  %v6784_v21 = vor.u32 %v7695_v8, %v6781_v10  ;;  %v6955_v12 = vld [vmem:[#allocation15 + $0x50] sm:$0xf] }
 0x4b6   :  { %v8378_v49 = vpack.c.bf16 %v3221_v42, %v3217_v41  ;;  %v6716_v41 = vor.u32 %v7681_v24, %v6715_v29  ;;  %v7651_v42 = vld [vmem:[#allocation13 + $0x18c] sm:$0xf]  ;;  %v6765_v28 = vld [vmem:[#allocation13 + $0x2d8] sm:$0xf0] }
 0x4b7   :  { %v7719_v18 = vld [vmem:[#allocation13 + $0x3ac] sm:$0xf]  ;;  %v6541_v24 = vld [vmem:[#allocation13 + $0x118] sm:$0xf0] }
 0x4b8   :  { %4136 = vmatpush.bf16.msrb.mxu3 %v6572_v43  ;;  %4160 = vmatpush.bf16.msra.mxu1 %v6892_v45  ;;  %v6605_v43 = vld [vmem:[#allocation13 + $0x198] sm:$0xf0]  ;;  %v6512_v45 = vor.u32 %v7627_v25, %v6509_v35  ;;  %v7611_v22 = vld [vmem:[#allocation13 + $0x4c] sm:$0xf] }
 0x4b9   :  { %4041 = vmatmul.bf16.vlgmr.msra.gmra.mxu0 %v8378_v49  ;;  %4069 = vmatmul.bf16.vlgmr.msra.gmra.mxu2 %v8370_v23  ;;  %v7635_v29 = vld [vmem:[#allocation13 + $0x10c] sm:$0xf]  ;;  %v6861_v25 = vld [vmem:[#allocation13 + $0x398] sm:$0xf0] }
 0x4ba   :  { %4121 = vmatpush.bf16.msrb.mxu2 %v6460_v50  ;;  %4145 = vmatpush.bf16.msra.mxu0 %v6780_v51  ;;  %v6493_v50 = vld [vmem:[#allocation13 + $0xb8] sm:$0xf0]  ;;  %v6608_v51 = vor.u32 %v7651_v42, %v6605_v43  ;;  %v7607_v37 = vld [vmem:[#allocation13 + $0x2c] sm:$0xf]  ;;  %v6544_v43 = vor.u32 %v7635_v29, %v6541_v24  ;;  %v6931_v29 = vld [vmem:[#allocation15 + $0x20] sm:$0xf] }
 0x4bb   :  { %v6496_v60 = vor.u32 %v7623_v48, %v6493_v50  ;;  %v6429_v38 = vld [vmem:[#allocation13 + $0x38] sm:$0xf0]  ;;  %v7711_v39 = vld [vmem:[#allocation13 + $0x36c] sm:$0xf]  ;;  %v7735_v24 = vld [vmem:[#allocation15 + $0x24] sm:$0xf0] }
 0x4bc   :  { %4137 = vmatpush.bf16.msrb.mxu3 %v6556_v56  ;;  %4161 = vmatpush.bf16.msra.mxu1 %v6876_v58  ;;  %v6589_v56 = vld [vmem:[#allocation13 + $0x178] sm:$0xf0]  ;;  %v7727_v58 = vld [vmem:[#allocation13 + $0x3ec] sm:$0xf] }
 0x4bd   :  { %v6592_v1 = vor.u32 %v7647_v54, %v6589_v56  ;;  %v6912_v2 = vor.u32 %v7727_v58, %v6909_v59  ;;  %v6749_v42 = vld [vmem:[#allocation13 + $0x2b8] sm:$0xf0]  ;;  %v7603_v50 = vld [vmem:[#allocation13 + $0xc] sm:$0xf]  ;;  %v7745_v56 = vld [vmem:[#allocation15 + $0x74] sm:$0xf0] }
 0x4be   :  { %4122 = vmatpush.bf16.msrb.mxu2 %v6444_v57  ;;  %4146 = vmatpush.bf16.msra.mxu0 %v6764_v63  ;;  %v6796_v57 = vor.u32 %v7701_v53, %v6795_v52  ;;  %v7619_v63 = vld [vmem:[#allocation13 + $0x8c] sm:$0xf]  ;;  %v6845_v46 = vld [vmem:[#allocation13 + $0x378] sm:$0xf0] }
 0x4bf   :  { %v7683_v52 = vld [vmem:[#allocation13 + $0x28c] sm:$0xf]  ;;  %v6733_v53 = vld [vmem:[#allocation13 + $0x298] sm:$0xf0]  ;;  %v6848_v54 = vor.u32 %v7711_v39, %v6845_v46  ;;  %v7011_v39 = vld [vmem:[#allocation15 + $0xc0] sm:$0xf] }
 0x4c0   :  { %4138 = vmatpush.bf16.msrb.mxu3 %v6540_v5  ;;  %4162 = vmatpush.bf16.msra.mxu1 %v6860_v6  ;;  %v7723_v5 = vld [vmem:[#allocation13 + $0x3cc] sm:$0xf]  ;;  %v6893_v6 = vld [vmem:[#allocation13 + $0x3d8] sm:$0xf0]  ;;  %v6736_v61 = vor.u32 %v7683_v52, %v6733_v53  ;;  %v7003_v53 = vld [vmem:[#allocation15 + $0xb0] sm:$0xf] }
 0x4c1   :  { %v6896_v16 = vor.u32 %v7723_v5, %v6893_v6  ;;  %v7707_v58 = vld [vmem:[#allocation13 + $0x34c] sm:$0xf]  ;;  %v6829_v59 = vld [vmem:[#allocation13 + $0x358] sm:$0xf0] }
 0x4c2   :  { %4123 = vmatpush.bf16.msrb.mxu2 %v6428_v19  ;;  %4147 = vmatpush.bf16.msra.mxu0 %v6748_v14  ;;  %v7615_v19 = vld [vmem:[#allocation13 + $0x6c] sm:$0xf]  ;;  %v6461_v14 = vld [vmem:[#allocation13 + $0x78] sm:$0xf0] }
 0x4c3   :  { %4111 = vmatmul.bf16.vlgmr.msrb.gmra.mxu1 %v8374_v30  ;;  %4139 = vmatmul.bf16.vlgmr.msrb.gmra.mxu3 %v8366_v44  ;;  %v7679_v62 = vld [vmem:[#allocation13 + $0x26c] sm:$0xf]  ;;  %v6701_v6 = vld [vmem:[#allocation13 + $0x258] sm:$0xf0] }
 0x4c4   :  { %4187 = vmatpush.bf16.msra.mxu3 %v6656_v7  ;;  %4163 = vmatpush.bf16.msra.mxu1 %v6844_v11  ;;  %v6480_v7 = vor.u32 %v7619_v63, %v6477_v0  ;;  %v6557_v11 = vld [vmem:[#allocation13 + $0x138] sm:$0xf0]  ;;  %v6832_v0 = vor.u32 %v7707_v58, %v6829_v59  ;;  %v7703_v3 = vld [vmem:[#allocation13 + $0x32c] sm:$0xf]  ;;  %v7777_v58 = vld [vmem:[#allocation15 + $0x174] sm:$0xf0] }
 0x4c5   :  { %v6560_v31 = vor.u32 %v7639_v17, %v6557_v11  ;;  %v7675_v5 = vld [vmem:[#allocation13 + $0x24c] sm:$0xf]  ;;  %v7742_v59 = vld [vmem:[#allocation15 + $0x64] sm:$0xf] }
 0x4c6   :  { %4124 = vmatpush.bf16.msrb.mxu2 %v6412_v26  ;;  %4148 = vmatpush.bf16.msra.mxu0 %v6732_v27  ;;  %v6445_v26 = vld [vmem:[#allocation13 + $0x58] sm:$0xf0]  ;;  %v7691_v27 = vld [vmem:[#allocation13 + $0x2cc] sm:$0xf]  ;;  %v6704_v8 = vor.u32 %v7675_v5, %v6701_v6  ;;  %v6987_v6 = vld [vmem:[#allocation15 + $0x90] sm:$0xf] }
 0x4c7   :  { %v6448_v35 = vor.u32 %v7611_v22, %v6445_v26  ;;  %v7671_v10 = vld [vmem:[#allocation13 + $0x22c] sm:$0xf]  ;;  %v6939_v22 = vld [vmem:[#allocation15 + $0x30] sm:$0xf]  ;;  %v7737_v26 = vld [vmem:[#allocation15 + $0x34] sm:$0xf0] }
 0x4c8   :  { %4188 = vmatpush.bf16.msra.mxu3 %v6640_v20  ;;  %4164 = vmatpush.bf16.msra.mxu1 %v6828_v33  ;;  %v6464_v20 = vor.u32 %v7615_v19, %v6461_v14  ;;  %v7715_v33 = vld [vmem:[#allocation13 + $0x38c] sm:$0xf]  ;;  %v6797_v14 = vld [vmem:[#allocation13 + $0x318] sm:$0xf0] }
 0x4c9   :  { %4097 = vmatmul.bf16.vlgmr.msrb.gmra.mxu0 %v8378_v49  ;;  %4125 = vmatmul.bf16.vlgmr.msrb.gmra.mxu2 %v8370_v23  ;;  %v7699_v19 = vld [vmem:[#allocation13 + $0x30c] sm:$0xf] }
 0x4ca   :  { %4173 = vmatpush.bf16.msra.mxu2 %v6528_v32  ;;  %4149 = vmatpush.bf16.msra.mxu0 %v6716_v41  ;;  %v6880_v32 = vor.u32 %v7719_v18, %v6877_v34  ;;  %v7687_v41 = vld [vmem:[#allocation13 + $0x2ac] sm:$0xf]  ;;  %v6800_v17 = vor.u32 %v7699_v19, %v6797_v14  ;;  %v6669_v18 = vld [vmem:[#allocation13 + $0x218] sm:$0xf0]  ;;  %v7738_v19 = vld [vmem:[#allocation15 + $0x44] sm:$0xf] }
 0x4cb   :  { %v6752_v48 = vor.u32 %v7687_v41, %v6749_v42  ;;  %v7667_v11 = vld [vmem:[#allocation13 + $0x20c] sm:$0xf]  ;;  %v7757_v41 = vld [vmem:[#allocation15 + $0xd4] sm:$0xf0] }
 0x4cc   :  { %4189 = vmatpush.bf16.msra.mxu3 %v6624_v36  ;;  %4165 = vmatpush.bf16.msra.mxu1 %v6812_v47  ;;  %v6768_v36 = vor.u32 %v7691_v27, %v6765_v28  ;;  %v6432_v47 = vor.u32 %v7607_v37, %v6429_v38  ;;  %v6672_v34 = vor.u32 %v7667_v11, %v6669_v18  ;;  %v7035_v27 = vld [vmem:[#allocation15 + $0xf0] sm:$0xf]  ;;  %v7761_v28 = vld [vmem:[#allocation15 + $0xf4] sm:$0xf0]  ;;  %v6949_v14 = vld [vmem:[#allocation15 + $0x48] sm:$0xf0] }
 0x4cd   :  { %v7019_v37 = vld [vmem:[#allocation15 + $0xd0] sm:$0xf]  ;;  %v7771_v11 = vld [vmem:[#allocation15 + $0x144] sm:$0xf0]  ;;  %v7736_v18 = vld [vmem:[#allocation15 + $0x34] sm:$0xf] }
 0x4ce   :  { %4174 = vmatpush.bf16.msra.mxu2 %v6512_v45  ;;  %4150 = vmatpush.bf16.msra.mxu0 %v6700_v55  ;;  %v6864_v45 = vor.u32 %v7715_v33, %v6861_v25  ;;  %v6971_v55 = vld [vmem:[#allocation15 + $0x70] sm:$0xf]  ;;  %v7027_v33 = vld [vmem:[#allocation15 + $0xe0] sm:$0xf]  ;;  %v6932_v25 = vor.u32 %v7735_v24, %v6931_v29  ;;  %v7020_v42 = vor.u32 %v7757_v41, %v7019_v37  ;;  %v6933_v29 = vld [vmem:[#allocation15 + $0x28] sm:$0xf0] }
 0x4cf   :  { %v6972_v63 = vor.u32 %v7745_v56, %v6971_v55  ;;  %v7099_v55 = vld [vmem:[#allocation15 + $0x170] sm:$0xf]  ;;  %v7758_v24 = vld [vmem:[#allocation15 + $0xe4] sm:$0xf]  ;;  %v7059_v37 = vld [vmem:[#allocation15 + $0x120] sm:$0xf] }
 0x4d0   :  { %4190 = vmatpush.bf16.msra.mxu3 %v6608_v51  ;;  %4166 = vmatpush.bf16.msra.mxu1 %v6796_v57  ;;  %v6413_v51 = vld [vmem:[#allocation13 + $0x18] sm:$0xf0] }
 0x4d1   :  { %v6717_v57 = vld [vmem:[#allocation13 + $0x278] sm:$0xf0] }
 0x4d2   :  { %4175 = vmatpush.bf16.msra.mxu2 %v6496_v60  ;;  %4151 = vmatpush.bf16.msra.mxu0 %v6684_v4  ;;  %v6416_v60 = vor.u32 %v7603_v50, %v6413_v51  ;;  %v6813_v4 = vld [vmem:[#allocation13 + $0x338] sm:$0xf0]  ;;  %v6720_v40 = vor.u32 %v7679_v62, %v6717_v57  ;;  %v6995_v57 = vld [vmem:[#allocation15 + $0xa0] sm:$0xf] }
 0x4d3   :  { %4167 = vmatmul.bf16.vlgmr.msra.gmra.mxu1 %v8374_v30  ;;  %v6816_v9 = vor.u32 %v7703_v3, %v6813_v4  ;;  %v6973_v50 = vld [vmem:[#allocation15 + $0x78] sm:$0xf0]  ;;  %v7740_v3 = vld [vmem:[#allocation15 + $0x54] sm:$0xf] }
 0x4d4   :  { %4191 = vmatpush.bf16.msra.mxu3 %v6592_v1  ;;  %4215 = vmatpush.bf16.msrb.mxu1 %v6912_v2  ;;  %v6963_v1 = vld [vmem:[#allocation15 + $0x60] sm:$0xf]  ;;  %v7743_v2 = vld [vmem:[#allocation15 + $0x64] sm:$0xf0]  ;;  %v6957_v4 = vld [vmem:[#allocation15 + $0x58] sm:$0xf0] }
 0x4d5   :  { %v6960_v5 = vor.u32 %v7740_v3, %v6957_v4  ;;  %v7793_v4 = vld [vmem:[#allocation15 + $0x1f4] sm:$0xf0] }
 0x4d6   :  { %4176 = vmatpush.bf16.msra.mxu2 %v6480_v7  ;;  %4152 = vmatpush.bf16.msra.mxu0 %v6668_v13  ;;  %v6964_v7 = vor.u32 %v7743_v2, %v6963_v1  ;;  %v7775_v2 = vld [vmem:[#allocation15 + $0x164] sm:$0xf0] }
 0x4d8   :  { %4192 = vmatpush.bf16.msra.mxu3 %v6576_v15  ;;  %4216 = vmatpush.bf16.msrb.mxu1 %v6896_v16  ;;  %v6685_v15 = vld [vmem:[#allocation13 + $0x238] sm:$0xf0] }
 0x4d9   :  { %4153 = vmatmul.bf16.vlgmr.msra.gmra.mxu0 %v8378_v49  ;;  %v6688_v13 = vor.u32 %v7671_v10, %v6685_v15  ;;  %v6952_v10 = vor.u32 %v7738_v19, %v6949_v14  ;;  %v6979_v15 = vld [vmem:[#allocation15 + $0x80] sm:$0xf] }
 0x4da   :  { %4177 = vmatpush.bf16.msra.mxu2 %v6464_v20  ;;  %4201 = vmatpush.bf16.msrb.mxu0 %v6784_v21  ;;  %v7739_v20 = vld [vmem:[#allocation15 + $0x44] sm:$0xf0] }
 0x4dc   :  { %4193 = vmatpush.bf16.msra.mxu3 %v6560_v31  ;;  %4217 = vmatpush.bf16.msrb.mxu1 %v6880_v32  ;;  %v6940_v31 = vor.u32 %v7737_v26, %v6939_v22  ;;  %v7036_v32 = vor.u32 %v7761_v28, %v7035_v27  ;;  %v7037_v22 = vld [vmem:[#allocation15 + $0xf8] sm:$0xf0]  ;;  %v7067_v27 = vld [vmem:[#allocation15 + $0x130] sm:$0xf]  ;;  %v7769_v28 = vld [vmem:[#allocation15 + $0x134] sm:$0xf0] }
 0x4de   :  { %4178 = vmatpush.bf16.msra.mxu2 %v6448_v35  ;;  %4202 = vmatpush.bf16.msrb.mxu0 %v6768_v36  ;;  %v7733_v36 = vld [vmem:[#allocation15 + $0x14] sm:$0xf0] }
 0x4e0   :  { %4194 = vmatpush.bf16.msra.mxu3 %v6544_v43  ;;  %4218 = vmatpush.bf16.msrb.mxu1 %v6864_v45  ;;  %v6915_v43 = vld [vmem:[#allocation15] sm:$0xf]  ;;  %v7731_v45 = vld [vmem:[#allocation15 + $0x4] sm:$0xf0] }
 0x4e1   :  { %v6916_v46 = vor.u32 %v7731_v45, %v6915_v43  ;;  %v6925_v43 = vld [vmem:[#allocation15 + $0x18] sm:$0xf0]  ;;  %v7756_v45 = vld [vmem:[#allocation15 + $0xd4] sm:$0xf] }
 0x4e2   :  { %4179 = vmatpush.bf16.msra.mxu2 %v6432_v47  ;;  %4203 = vmatpush.bf16.msrb.mxu0 %v6752_v48  ;;  %v7755_v47 = vld [vmem:[#allocation15 + $0xc4] sm:$0xf0]  ;;  %v7744_v48 = vld [vmem:[#allocation15 + $0x74] sm:$0xf] }
 0x4e3   :  { %4195 = vmatmul.bf16.vlgmr.msra.gmra.mxu3 %v8366_v44  ;;  %v7741_v44 = vld [vmem:[#allocation15 + $0x54] sm:$0xf0]  ;;  %v7012_v51 = vor.u32 %v7755_v47, %v7011_v39  ;;  %v6976_v52 = vor.u32 %v7744_v48, %v6973_v50 }
 0x4e4   :  { %4219 = vmatpush.bf16.msrb.mxu1 %v6848_v54  ;;  %v6956_v16 = vor.u32 %v7741_v44, %v6955_v12  ;;  %4645 = vmatpush.bf16.msrb.mxu3 %v7036_v32  ;;  %v7753_v54 = vld [vmem:[#allocation15 + $0xb4] sm:$0xf0]  ;;  %v7734_v32 = vld [vmem:[#allocation15 + $0x24] sm:$0xf] }
 0x4e5   :  { %v7004_v56 = vor.u32 %v7753_v54, %v7003_v53  ;;  %v7773_v44 = vld [vmem:[#allocation15 + $0x154] sm:$0xf0]  ;;  %v7730_v54 = vld [vmem:[#allocation15 + $0x4] sm:$0xf] }
 0x4e6   :  { %4180 = vmatpush.bf16.msra.mxu2 %v6416_v60  ;;  %4204 = vmatpush.bf16.msrb.mxu0 %v6736_v61  ;;  %v6965_v60 = vld [vmem:[#allocation15 + $0x68] sm:$0xf0]  ;;  %v7100_v61 = vor.u32 %v7777_v58, %v7099_v55 }
 0x4e7   :  { %v6968_v62 = vor.u32 %v7742_v59, %v6965_v60  ;;  %v6917_v55 = vld [vmem:[#allocation15 + $0x8] sm:$0xf0] }
 0x4e8   :  { %4220 = vmatpush.bf16.msrb.mxu1 %v6832_v0  ;;  %v7091_v0 = vld [vmem:[#allocation15 + $0x160] sm:$0xf]  ;;  %v6920_v59 = vor.u32 %v7730_v54, %v6917_v55  ;;  %v7013_v60 = vld [vmem:[#allocation15 + $0xc8] sm:$0xf0] }
 0x4e9   :  { %4181 = vmatmul.bf16.vlgmr.msra.gmra.mxu2 %v8370_v23  ;;  %v6947_v23 = vld [vmem:[#allocation15 + $0x40] sm:$0xf] }
 0x4ea   :  { %4631 = vmatpush.bf16.msrb.mxu2 %v6972_v63  ;;  %4205 = vmatpush.bf16.msrb.mxu0 %v6720_v40  ;;  %v6948_v21 = vor.u32 %v7739_v20, %v6947_v23  ;;  %v7751_v63 = vld [vmem:[#allocation15 + $0xa4] sm:$0xf0]  ;;  %v7092_v40 = vor.u32 %v7775_v2, %v7091_v0 }
 0x4eb   :  { %v6996_v1 = vor.u32 %v7751_v63, %v6995_v57  ;;  %v7043_v63 = vld [vmem:[#allocation15 + $0x100] sm:$0xf]  ;;  %v7763_v0 = vld [vmem:[#allocation15 + $0x104] sm:$0xf0] }
 0x4ec   :  { %4221 = vmatpush.bf16.msrb.mxu1 %v6816_v9  ;;  %v7083_v9 = vld [vmem:[#allocation15 + $0x150] sm:$0xf]  ;;  %v7044_v3 = vor.u32 %v7763_v0, %v7043_v63  ;;  %v7069_v63 = vld [vmem:[#allocation15 + $0x138] sm:$0xf0] }
 0x4ee   :  { %4632 = vmatpush.bf16.msrb.mxu2 %v6964_v7  ;;  %4206 = vmatpush.bf16.msrb.mxu0 %v6704_v8  ;;  %v7749_v7 = vld [vmem:[#allocation15 + $0x94] sm:$0xf0]  ;;  %v7084_v8 = vor.u32 %v7773_v44, %v7083_v9  ;;  %v7776_v9 = vld [vmem:[#allocation15 + $0x174] sm:$0xf] }
 0x4ef   :  { %v6988_v12 = vor.u32 %v7749_v7, %v6987_v6 }
 0x4f0   :  { %4222 = vmatpush.bf16.msrb.mxu1 %v6800_v17  ;;  %v7075_v17 = vld [vmem:[#allocation15 + $0x140] sm:$0xf] }
 0x4f1   :  { %v7076_v23 = vor.u32 %v7771_v11, %v7075_v17  ;;  %v7750_v17 = vld [vmem:[#allocation15 + $0xa4] sm:$0xf] }
 0x4f2   :  { %4633 = vmatpush.bf16.msrb.mxu2 %v6956_v16  ;;  %4207 = vmatpush.bf16.msrb.mxu0 %v6688_v13  ;;  %v7747_v16 = vld [vmem:[#allocation15 + $0x84] sm:$0xf0]  ;;  %v7774_v11 = vld [vmem:[#allocation15 + $0x164] sm:$0xf] }
 0x4f3   :  { %4223 = vmatmul.bf16.vlgmr.msrb.gmra.mxu1 %v8374_v30  ;;  %v7759_v30 = vld [vmem:[#allocation15 + $0xe4] sm:$0xf0]  ;;  %v6980_v13 = vor.u32 %v7747_v16, %v6979_v15 }
 0x4f4   :  { %v7028_v35 = vor.u32 %v7759_v30, %v7027_v33  ;;  %v6936_v30 = vor.u32 %v7734_v32, %v6933_v29  ;;  %v7791_v15 = vld [vmem:[#allocation15 + $0x1e4] sm:$0xf0]  ;;  %v7748_v32 = vld [vmem:[#allocation15 + $0x94] sm:$0xf]  ;;  %v6989_v29 = vld [vmem:[#allocation15 + $0x98] sm:$0xf0] }
 0x4f6   :  { %4208 = vmatpush.bf16.msrb.mxu0 %v6672_v34  ;;  %4634 = vmatpush.bf16.msrb.mxu2 %v6948_v21  ;;  %v6941_v34 = vld [vmem:[#allocation15 + $0x38] sm:$0xf0]  ;;  %v7760_v21 = vld [vmem:[#allocation15 + $0xf4] sm:$0xf] }
 0x4f7   :  { %4646 = vmatpush.bf16.msrb.mxu3 %v7028_v35  ;;  %v6944_v20 = vor.u32 %v7736_v18, %v6941_v34  ;;  %v7040_v26 = vor.u32 %v7760_v21, %v7037_v22  ;;  %v7029_v35 = vld [vmem:[#allocation15 + $0xe8] sm:$0xf0] }
 0x4f9   :  { %4209 = vmatmul.bf16.vlgmr.msrb.gmra.mxu0 %v8378_v49  ;;  %v6923_v49 = vld [vmem:[#allocation15 + $0x10] sm:$0xf] }
 0x4fa   :  { %4635 = vmatpush.bf16.msrb.mxu2 %v6940_v31  ;;  %v6924_v38 = vor.u32 %v7733_v36, %v6923_v49  ;;  %4659 = vmatpush.bf16.msra.mxu0 %v7100_v61  ;;  %v7068_v31 = vor.u32 %v7769_v28, %v7067_v27  ;;  %v7032_v49 = vor.u32 %v7758_v24, %v7029_v35  ;;  %v8395_v36 = vld [vmem:[%s8436_s16] sm:$0xf]  ;;  %v7789_v27 = vld [vmem:[#allocation15 + $0x1d4] sm:$0xf0]  ;;  %v7772_v24 = vld [vmem:[#allocation15 + $0x154] sm:$0xf] }
 0x4fb   :  { %4647 = vmatpush.bf16.msrb.mxu3 %v7020_v42  ;;  %v7732_v42 = vld [vmem:[#allocation15 + $0x14] sm:$0xf]  ;;  %v3357_v50 = vperm.slane %v8395_v36, 0  ;;  %v6992_v35 = vor.u32 %v7748_v32, %v6989_v29 }
 0x4fc   :  { %v6928_v39 = vor.u32 %v7732_v42, %v6925_v43  ;;  %v7139_v42 = vld [vmem:[#allocation15 + $0x1c0] sm:$0xf]  ;;  %v7787_v43 = vld [vmem:[#allocation15 + $0x1c4] sm:$0xf0] }
 0x4fe   :  { %4636 = vmatpush.bf16.msrb.mxu2 %v6932_v25  ;;  %4660 = vmatpush.bf16.msra.mxu0 %v7092_v40  ;;  %v7752_v40 = vld [vmem:[#allocation15 + $0xb4] sm:$0xf] }
 0x4ff   :  { %4648 = vmatpush.bf16.msrb.mxu3 %v7012_v51  ;;  %v7051_v51 = vld [vmem:[#allocation15 + $0x110] sm:$0xf] }
 0x502   :  { %4637 = vmatpush.bf16.msrb.mxu2 %v6924_v38  ;;  %4661 = vmatpush.bf16.msra.mxu0 %v7084_v8  ;;  %v7767_v38 = vld [vmem:[#allocation15 + $0x124] sm:$0xf0] }
 0x503   :  { %4649 = vmatpush.bf16.msrb.mxu3 %v7004_v56  ;;  %v7060_v41 = vor.u32 %v7767_v38, %v7059_v37  ;;  %v7754_v56 = vld [vmem:[#allocation15 + $0xc4] sm:$0xf]  ;;  %v3358_v38 = vperm.slane %v8395_v36, 1 }
 0x504   :  { %v7016_v61 = vor.u32 %v7754_v56, %v7013_v60  ;;  %v7785_v60 = vld [vmem:[#allocation15 + $0x1b4] sm:$0xf0] }
 0x506   :  { %4638 = vmatpush.bf16.msrb.mxu2 %v6916_v46  ;;  %4662 = vmatpush.bf16.msra.mxu0 %v7076_v23  ;;  %v7021_v46 = vld [vmem:[#allocation15 + $0xd8] sm:$0xf0]  ;;  %v7093_v23 = vld [vmem:[#allocation15 + $0x168] sm:$0xf0] }
 0x507   :  { %4650 = vmatpush.bf16.msrb.mxu3 %v6996_v1  ;;  %v7024_v48 = vor.u32 %v7756_v45, %v7021_v46  ;;  %v7163_v1 = vld [vmem:[#allocation15 + $0x1f0] sm:$0xf]  ;;  %v7096_v21 = vor.u32 %v7774_v11, %v7093_v23  ;;  %v7746_v46 = vld [vmem:[#allocation15 + $0x84] sm:$0xf]  ;;  %v3359_v23 = vperm.slane %v8395_v36, 2 }
 0x508   :  { %v7164_v6 = vor.u32 %v7793_v4, %v7163_v1  ;;  %v7123_v4 = vld [vmem:[#allocation15 + $0x1a0] sm:$0xf] }
 0x50a   :  { %4687 = vmatpush.bf16.msra.mxu2 %v6976_v52  ;;  %4663 = vmatpush.bf16.msra.mxu0 %v7068_v31  ;;  %v7765_v52 = vld [vmem:[#allocation15 + $0x114] sm:$0xf0] }
 0x50b   :  { %4651 = vmatpush.bf16.msrb.mxu3 %v6988_v12  ;;  %v7052_v53 = vor.u32 %v7765_v52, %v7051_v51  ;;  %v7101_v12 = vld [vmem:[#allocation15 + $0x178] sm:$0xf0]  ;;  %4673 = vmatpush.bf16.msra.mxu1 %v7164_v6  ;;  %v7766_v6 = vld [vmem:[#allocation15 + $0x124] sm:$0xf] }
 0x50c   :  { %v7104_v19 = vor.u32 %v7776_v9, %v7101_v12 }
 0x50e   :  { %4688 = vmatpush.bf16.msra.mxu2 %v6968_v62  ;;  %4664 = vmatpush.bf16.msra.mxu0 %v7060_v41 }
 0x50f   :  { %4652 = vmatpush.bf16.msrb.mxu3 %v6980_v13  ;;  %v6997_v13 = vld [vmem:[#allocation15 + $0xa8] sm:$0xf0] }
 0x510   :  { %v7000_v34 = vor.u32 %v7750_v17, %v6997_v13  ;;  %v7764_v17 = vld [vmem:[#allocation15 + $0x114] sm:$0xf]  ;;  %v7053_v13 = vld [vmem:[#allocation15 + $0x118] sm:$0xf0] }
 0x512   :  { %4689 = vmatpush.bf16.msra.mxu2 %v6960_v5  ;;  %4665 = vmatpush.bf16.msra.mxu0 %v7052_v53  ;;  %v7005_v5 = vld [vmem:[#allocation15 + $0xb8] sm:$0xf0]  ;;  %v7077_v53 = vld [vmem:[#allocation15 + $0x148] sm:$0xf0] }
 0x513   :  { %4701 = vmatpush.bf16.msra.mxu3 %v7040_v26  ;;  %v7008_v7 = vor.u32 %v7752_v40, %v7005_v5  ;;  %v7147_v26 = vld [vmem:[#allocation15 + $0x1d0] sm:$0xf]  ;;  %v7783_v40 = vld [vmem:[#allocation15 + $0x1a4] sm:$0xf0] }
 0x514   :  { %v7148_v31 = vor.u32 %v7789_v27, %v7147_v26  ;;  %v7124_v5 = vor.u32 %v7783_v40, %v7123_v4  ;;  %v7762_v27 = vld [vmem:[#allocation15 + $0x104] sm:$0xf]  ;;  %v7125_v4 = vld [vmem:[#allocation15 + $0x1a8] sm:$0xf0] }
 0x516   :  { %4690 = vmatpush.bf16.msra.mxu2 %v6952_v10  ;;  %4666 = vmatpush.bf16.msra.mxu0 %v7044_v3  ;;  %v7155_v10 = vld [vmem:[#allocation15 + $0x1e0] sm:$0xf] }
 0x517   :  { %4702 = vmatpush.bf16.msra.mxu3 %v7032_v49  ;;  %v7156_v16 = vor.u32 %v7791_v15, %v7155_v10  ;;  %v7085_v49 = vld [vmem:[#allocation15 + $0x158] sm:$0xf0]  ;;  %v7781_v10 = vld [vmem:[#allocation15 + $0x194] sm:$0xf0] }
 0x518   :  { %v7088_v37 = vor.u32 %v7772_v24, %v7085_v49 }
 0x519   :  { %4674 = vmatpush.bf16.msra.mxu1 %v7156_v16 }
 0x51a   :  { %4691 = vmatpush.bf16.msra.mxu2 %v6944_v20  ;;  %4715 = vmatpush.bf16.msrb.mxu0 %v7104_v19 }
 0x51b   :  { %4703 = vmatpush.bf16.msra.mxu3 %v7024_v48  ;;  %v6981_v48 = vld [vmem:[#allocation15 + $0x88] sm:$0xf0] }
 0x51c   :  { %v6984_v52 = vor.u32 %v7746_v46, %v6981_v48  ;;  %v7788_v48 = vld [vmem:[#allocation15 + $0x1d4] sm:$0xf] }
 0x51d   :  { %4675 = vmatpush.bf16.msra.mxu1 %v7148_v31  ;;  %v7792_v31 = vld [vmem:[#allocation15 + $0x1f4] sm:$0xf] }
 0x51e   :  { %4692 = vmatpush.bf16.msra.mxu2 %v6936_v30  ;;  %4716 = vmatpush.bf16.msrb.mxu0 %v7096_v21  ;;  %v7107_v21 = vld [vmem:[#allocation15 + $0x180] sm:$0xf] }
 0x51f   :  { %4704 = vmatpush.bf16.msra.mxu3 %v7016_v61 }
 0x522   :  { %4693 = vmatpush.bf16.msra.mxu2 %v6928_v39  ;;  %4717 = vmatpush.bf16.msrb.mxu0 %v7088_v37  ;;  %v7140_v39 = vor.u32 %v7787_v43, %v7139_v42 }
 0x523   :  { %4705 = vmatpush.bf16.msra.mxu3 %v7008_v7  ;;  %v7061_v7 = vld [vmem:[#allocation15 + $0x128] sm:$0xf0] }
 0x524   :  { %4676 = vmatpush.bf16.msra.mxu1 %v7140_v39  ;;  %v7064_v12 = vor.u32 %v7766_v6, %v7061_v7  ;;  %v7780_v6 = vld [vmem:[#allocation15 + $0x194] sm:$0xf]  ;;  %v7117_v7 = vld [vmem:[#allocation15 + $0x198] sm:$0xf0] }
 0x526   :  { %v4028_v33 = vpop.f32.mrf.mxu3  ;;  %4694 = vmatpush.bf16.msra.mxu2 %v6920_v59  ;;  %v7131_v59 = vld [vmem:[#allocation15 + $0x1b0] sm:$0xf] }
 0x527   :  { %4706 = vmatpush.bf16.msra.mxu3 %v7000_v34  ;;  %v7056_v34 = vor.u32 %v7764_v17, %v7053_v13 }
 0x52b   :  { %v4014_v25 = vpop.f32.mrf.mxu2  ;;  %4707 = vmatpush.bf16.msra.mxu3 %v6992_v35 }
 0x52c   :  { %v4015_v62 = vadd.f32 %v4014_v25, %v3357_v50 }
 0x52e   :  { %v4030_v57 = vpop.f32.mrf.mxu3  ;;  %v4029_v8 = vadd.f32 %v4028_v33, %v4015_v62  ;;  %v7132_v62 = vor.u32 %v7785_v60, %v7131_v59 }
 0x52f   :  { %4708 = vmatpush.bf16.msra.mxu3 %v6984_v52 }
 0x530   :  { %v8397_v47 = vpop.f32.mrf.mxu1  ;;  %4677 = vmatpush.bf16.msra.mxu1 %v7132_v62 }
 0x533   :  { %v4016_v58 = vpop.f32.mrf.mxu2 }
 0x534   :  { %v4017_v14 = vadd.f32 %v4016_v58, %v3357_v50  ;;  %v7770_v50 = vld [vmem:[#allocation15 + $0x144] sm:$0xf]  ;;  %4678 = vmatpush.bf16.msra.mxu1 %v7124_v5 }
 0x535   :  { %v7080_v55 = vor.u32 %v7770_v50, %v7077_v53  ;;  %v7149_v50 = vld [vmem:[#allocation15 + $0x1d8] sm:$0xf0] }
 0x536   :  { %v4042_v2 = vpop.f32.mrf.mxu0  ;;  %v4031_v22 = vadd.f32 %v4030_v57, %v4017_v14  ;;  %v4084_v25 = vpop.f32.mrf.mxu3  ;;  %v7768_v57 = vld [vmem:[#allocation15 + $0x134] sm:$0xf] }
 0x537   :  { %v4043_v18 = vadd.f32 %v4042_v2, %v4029_v8  ;;  %4718 = vmatpush.bf16.msrb.mxu0 %v7080_v55  ;;  %v7072_v0 = vor.u32 %v7768_v57, %v7069_v63  ;;  %v7115_v8 = vld [vmem:[#allocation15 + $0x190] sm:$0xf]  ;;  %v7141_v55 = vld [vmem:[#allocation15 + $0x1c8] sm:$0xf0]  ;;  %v7133_v63 = vld [vmem:[#allocation15 + $0x1b8] sm:$0xf0] }
 0x538   :  { %v4058_v44 = vpop.f32.mrf.mxu1  ;;  %v7116_v16 = vor.u32 %v7781_v10, %v7115_v8 }
 0x539   :  { %v4057_v33 = vadd.f32 %v8397_v47, %v4043_v18 }
 0x53a   :  { %4679 = vmatpush.bf16.msra.mxu1 %v7116_v16 }
 0x53b   :  { %v4229_v51 = vmax.f32 %v4057_v33, 0.0  ;;  %4719 = vmatpush.bf16.msrb.mxu0 %v7072_v0 }
 0x53c   :  { %v4070_v20 = vpop.f32.mrf.mxu2 }
 0x53d   :  { %v4071_v56 = vadd.f32 %v4070_v20, %v3358_v38 }
 0x53e   :  { %v4044_v28 = vpop.f32.mrf.mxu0  ;;  %v4086_v1 = vpop.f32.mrf.mxu3 }
 0x53f   :  { %v4045_v30 = vadd.f32 %v4044_v28, %v4031_v22  ;;  %v4085_v3 = vadd.f32 %v4084_v25, %v4071_v56  ;;  %4720 = vmatpush.bf16.msrb.mxu0 %v7064_v12  ;;  %v7779_v22 = vld [vmem:[#allocation15 + $0x184] sm:$0xf0]  ;;  %v7045_v28 = vld [vmem:[#allocation15 + $0x108] sm:$0xf0]  ;;  %v7165_v25 = vld [vmem:[#allocation15 + $0x1f8] sm:$0xf0]  ;;  %v7120_v12 = vor.u32 %v7780_v6, %v7117_v7 }
 0x540   :  { %v4112_v45 = vpop.f32.mrf.mxu1  ;;  %v7108_v26 = vor.u32 %v7779_v22, %v7107_v21  ;;  %v7048_v33 = vor.u32 %v7762_v27, %v7045_v28 }
 0x541   :  { %v4059_v41 = vadd.f32 %v4058_v44, %v4045_v30  ;;  %v7168_v30 = vor.u32 %v7792_v31, %v7165_v25  ;;  %v7798_v25 = vld [vmem:[#allocation16 + $0x20] sm:$0xff] }
 0x542   :  { %4680 = vmatpush.bf16.msra.mxu1 %v7108_v26 }
 0x543   :  { %v4233_v47 = vmax.f32 %v4059_v41, 0.0  ;;  %4721 = vmatpush.bf16.msrb.mxu0 %v7056_v34  ;;  %v7157_v41 = vld [vmem:[#allocation15 + $0x1e8] sm:$0xf0] }
 0x544   :  { %v4072_v54 = vpop.f32.mrf.mxu2 }
 0x545   :  { %v8402_v58 = vpack.c.bf16 %v4233_v47, %v4229_v51  ;;  %v4073_v2 = vadd.f32 %v4072_v54, %v3358_v38  ;;  %v7790_v38 = vld [vmem:[#allocation15 + $0x1e4] sm:$0xf]  ;;  %v7152_v51 = vor.u32 %v7788_v48, %v7149_v50 }
 0x546   :  { %v4098_v61 = vpop.f32.mrf.mxu0  ;;  %v4140_v29 = vpop.f32.mrf.mxu3  ;;  %4729 = vmatpush.bf16.msrb.mxu1 %v7168_v30  ;;  %v7786_v54 = vld [vmem:[#allocation15 + $0x1c4] sm:$0xf]  ;;  %v7797_v30 = vld [vmem:[#allocation16 + $0x18] sm:$0xff] }
 0x547   :  { %4639 = vmatmul.bf16.vlgmr.msrb.gmra.mxu2 %v8402_v58  ;;  %v4099_v9 = vadd.f32 %v4098_v61, %v4085_v3  ;;  %v4087_v14 = vadd.f32 %v4086_v1, %v4073_v2  ;;  %4722 = vmatpush.bf16.msrb.mxu0 %v7048_v33  ;;  %v7144_v59 = vor.u32 %v7786_v54, %v7141_v55  ;;  %v7782_v3 = vld [vmem:[#allocation15 + $0x1a4] sm:$0xf]  ;;  %v7799_v33 = vld [vmem:[#allocation16 + $0x28] sm:$0xff] }
 0x548   :  { %v4114_v44 = vpop.f32.mrf.mxu1  ;;  %v7128_v5 = vor.u32 %v7782_v3, %v7125_v4 }
 0x549   :  { %v4113_v11 = vadd.f32 %v4112_v45, %v4099_v9  ;;  %v7160_v45 = vor.u32 %v7790_v38, %v7157_v41  ;;  %v7795_v38 = vld [vmem:[#allocation16 + $0x8] sm:$0xff] }
 0x54a   :  { %v7807_v41 = vld [vmem:[#allocation16 + $0x68] sm:$0xff] }
 0x54b   :  { %v4230_v32 = vmax.f32 %v4113_v11, 0.0  ;;  %4730 = vmatpush.bf16.msrb.mxu1 %v7160_v45  ;;  %v7805_v45 = vld [vmem:[#allocation16 + $0x58] sm:$0xff] }
 0x54c   :  { %v4126_v19 = vpop.f32.mrf.mxu2 }
 0x54d   :  { %v4127_v49 = vadd.f32 %v4126_v19, %v3359_v23  ;;  %v7109_v19 = vld [vmem:[#allocation15 + $0x188] sm:$0xf0] }
 0x54e   :  { %v4100_v15 = vpop.f32.mrf.mxu0  ;;  %v4142_v52 = vpop.f32.mrf.mxu3 }
 0x54f   :  { %v4101_v18 = vadd.f32 %v4100_v15, %v4087_v14  ;;  %v4141_v46 = vadd.f32 %v4140_v29, %v4127_v49  ;;  %4731 = vmatpush.bf16.msrb.mxu1 %v7152_v51  ;;  %v3360_v14 = vperm.slane %v8395_v36, 3  ;;  %v7801_v29 = vld [vmem:[#allocation16 + $0x38] sm:$0xff]  ;;  %v7796_v49 = vld [vmem:[#allocation16 + $0x10] sm:$0xff]  ;;  %v7803_v51 = vld [vmem:[#allocation16 + $0x48] sm:$0xff] }
 0x550   :  { %v4168_v37 = vpop.f32.mrf.mxu1  ;;  %4881 = vmatpush.bf16.msrb.mxu2 %v7801_v29 }
 0x551   :  { %v4115_v20 = vadd.f32 %v4114_v44, %v4101_v18  ;;  %v7778_v44 = vld [vmem:[#allocation15 + $0x184] sm:$0xf] }
 0x552   :  { %v7112_v8 = vor.u32 %v7778_v44, %v7109_v19 }
 0x553   :  { %v4234_v24 = vmax.f32 %v4115_v20, 0.0  ;;  %4732 = vmatpush.bf16.msrb.mxu1 %v7144_v59 }
 0x554   :  { %v4128_v42 = vpop.f32.mrf.mxu2 }
 0x555   :  { %v4238_v35 = vpack.c.bf16 %v4234_v24, %v4230_v32  ;;  %v4129_v39 = vadd.f32 %v4128_v42, %v3359_v23  ;;  %v7800_v24 = vld [vmem:[#allocation16 + $0x30] sm:$0xff]  ;;  %v7794_v42 = vld [vmem:[#allocation16] sm:$0xff] }
 0x556   :  { %v4154_v43 = vpop.f32.mrf.mxu0  ;;  %4882 = vmatpush.bf16.msrb.mxu2 %v7800_v24 }
 0x557   :  { %4653 = vmatmul.bf16.vlgmr.msrb.gmra.mxu3 %v4238_v35  ;;  %4695 = vmatmul.bf16.vlgmr.msra.gmra.mxu2 %v8402_v58  ;;  %v4155_v47 = vadd.f32 %v4154_v43, %v4141_v46  ;;  %v4143_v53 = vadd.f32 %v4142_v52, %v4129_v39  ;;  %v7784_v58 = vld [vmem:[#allocation15 + $0x1b4] sm:$0xf]  ;;  %v7806_v43 = vld [vmem:[#allocation16 + $0x60] sm:$0xff] }
 0x558   :  { %v4170_v62 = vpop.f32.mrf.mxu1  ;;  %v7136_v0 = vor.u32 %v7784_v58, %v7133_v63  ;;  %v7804_v46 = vld [vmem:[#allocation16 + $0x50] sm:$0xff]  ;;  %v7802_v52 = vld [vmem:[#allocation16 + $0x40] sm:$0xff] }
 0x559   :  { %v4169_v60 = vadd.f32 %v4168_v37, %v4155_v47  ;;  %v7808_v37 = vld [vmem:[#allocation16 + $0x70] sm:$0xff]  ;;  %v4305_v47 = vld [vmem:[%s8438_s18] sm:$0x3] }
 0x55a   :  { %4733 = vmatpush.bf16.msrb.mxu1 %v7136_v0  ;;  %4883 = vmatpush.bf16.msrb.mxu2 %v7799_v33  ;;  %v4307_v54 = vperm.slane %v4305_v47, 0  ;;  %v4308_v7 = vperm.slane %v4305_v47, 1 }
 0x55b   :  { %v4231_v1 = vmax.f32 %v4169_v60, 0.0 }
 0x55e   :  { %v4156_v56 = vpop.f32.mrf.mxu0  ;;  %4734 = vmatpush.bf16.msrb.mxu1 %v7128_v5  ;;  %4884 = vmatpush.bf16.msrb.mxu2 %v7798_v25 }
 0x55f   :  { %v4157_v61 = vadd.f32 %v4156_v56, %v4143_v53 }
 0x561   :  { %v4171_v57 = vadd.f32 %v4170_v62, %v4157_v61 }
 0x562   :  { %4735 = vmatpush.bf16.msrb.mxu1 %v7120_v12  ;;  %4885 = vmatpush.bf16.msrb.mxu2 %v7797_v30 }
 0x563   :  { %v4235_v2 = vmax.f32 %v4171_v57, 0.0 }
 0x565   :  { %v4239_v40 = vpack.c.bf16 %v4235_v2, %v4231_v1 }
 0x566   :  { %v4196_v10 = vpop.f32.mrf.mxu3  ;;  %4736 = vmatpush.bf16.msrb.mxu1 %v7112_v8  ;;  %4886 = vmatpush.bf16.msrb.mxu2 %v7796_v49 }
 0x567   :  { %4709 = vmatmul.bf16.vlgmr.msra.gmra.mxu3 %v4238_v35  ;;  %4667 = vmatmul.bf16.vlgmr.msra.gmra.mxu0 %v4239_v40  ;;  %v7809_v35 = vld [vmem:[#allocation16 + $0x78] sm:$0xff] }
 0x568   :  { %4895 = vmatpush.bf16.msrb.mxu3 %v7809_v35 }
 0x56a   :  { %4887 = vmatpush.bf16.msrb.mxu2 %v7795_v38 }
 0x56c   :  { %v4182_v9 = vpop.f32.mrf.mxu2  ;;  %4896 = vmatpush.bf16.msrb.mxu3 %v7808_v37 }
 0x56d   :  { %v4183_v15 = vadd.f32 %v4182_v9, %v3360_v14 }
 0x56e   :  { %v4198_v23 = vpop.f32.mrf.mxu3  ;;  %4888 = vmatpush.bf16.msrb.mxu2 %v7794_v42 }
 0x56f   :  { %v4197_v18 = vadd.f32 %v4196_v10, %v4183_v15 }
 0x570   :  { %v4224_v16 = vpop.f32.mrf.mxu1  ;;  %4897 = vmatpush.bf16.msrb.mxu3 %v7807_v41 }
 0x574   :  { %v4184_v17 = vpop.f32.mrf.mxu2  ;;  %4898 = vmatpush.bf16.msrb.mxu3 %v7806_v43 }
 0x575   :  { %v4185_v11 = vadd.f32 %v4184_v17, %v3360_v14 }
 0x576   :  { %v4210_v13 = vpop.f32.mrf.mxu0 }
 0x577   :  { %v4211_v34 = vadd.f32 %v4210_v13, %v4197_v18  ;;  %4723 = vmatmul.bf16.vlgmr.msrb.gmra.mxu0 %v4239_v40  ;;  %v4199_v20 = vadd.f32 %v4198_v23, %v4185_v11 }
 0x578   :  { %v4226_v27 = vpop.f32.mrf.mxu1  ;;  %4899 = vmatpush.bf16.msrb.mxu3 %v7805_v45 }
 0x579   :  { %v4225_v22 = vadd.f32 %v4224_v16, %v4211_v34 }
 0x57b   :  { %v4232_v36 = vmax.f32 %v4225_v22, 0.0 }
 0x57c   :  { %4900 = vmatpush.bf16.msrb.mxu3 %v7804_v46 }
 0x57e   :  { %v4212_v21 = vpop.f32.mrf.mxu0 }
 0x57f   :  { %v4213_v26 = vadd.f32 %v4212_v21, %v4199_v20 }
 0x580   :  { %4901 = vmatpush.bf16.msrb.mxu3 %v7803_v51 }
 0x581   :  { %v4227_v28 = vadd.f32 %v4226_v27, %v4213_v26  ;;  %v7827_v26 = vld [vmem:[%s8440_s20] ss:$0 sm:$0xff] }
 0x583   :  { %v4236_v31 = vmax.f32 %v4227_v28, 0.0 }
 0x584   :  { %4902 = vmatpush.bf16.msrb.mxu3 %v7802_v52 }
 0x585   :  { %v4240_v32 = vpack.c.bf16 %v4236_v31, %v4232_v36 }
 0x587   :  { %4681 = vmatmul.bf16.vlgmr.msra.gmra.mxu1 %v4240_v32 }
 0x597   :  { %4737 = vmatmul.bf16.vlgmr.msrb.gmra.mxu1 %v4240_v32 }
 0x5ca   :  { %v4640_v39 = vpop.f32.mrf.mxu2 }
 0x5cb   :  { %v4641_v60 = vadd.f32 %v4640_v39, %v4307_v54 }
 0x5d2   :  { %v4642_v53 = vpop.f32.mrf.mxu2 }
 0x5d3   :  { %v4643_v61 = vadd.f32 %v4642_v53, %v4307_v54 }
 0x5da   :  { %v4654_v48 = vpop.f32.mrf.mxu3  ;;  %v4696_v63 = vpop.f32.mrf.mxu2 }
 0x5db   :  { %v4655_v62 = vadd.f32 %v4654_v48, %v4641_v60  ;;  %v4697_v19 = vadd.f32 %v4696_v63, %v4308_v7 }
 0x5e2   :  { %v4656_v55 = vpop.f32.mrf.mxu3  ;;  %v4698_v12 = vpop.f32.mrf.mxu2 }
 0x5e3   :  { %v4657_v57 = vadd.f32 %v4656_v55, %v4643_v61  ;;  %v4699_v8 = vadd.f32 %v4698_v12, %v4308_v7 }
 0x5e4   :  { %v4668_v50 = vpop.f32.mrf.mxu0 }
 0x5e5   :  { %v4669_v58 = vadd.f32 %v4668_v50, %v4655_v62 }
 0x5ea   :  { %v4710_v2 = vpop.f32.mrf.mxu3 }
 0x5eb   :  { %v4711_v10 = vadd.f32 %v4710_v2, %v4697_v19 }
 0x5ec   :  { %v4670_v56 = vpop.f32.mrf.mxu0 }
 0x5ed   :  { %v4671_v0 = vadd.f32 %v4670_v56, %v4657_v57 }
 0x5f2   :  { %v4712_v14 = vpop.f32.mrf.mxu3 }
 0x5f3   :  { %v4713_v16 = vadd.f32 %v4712_v14, %v4699_v8 }
 0x5f4   :  { %v4724_v40 = vpop.f32.mrf.mxu0 }
 0x5f5   :  { %v4725_v17 = vadd.f32 %v4724_v40, %v4711_v10 }
 0x5fc   :  { %v4726_v15 = vpop.f32.mrf.mxu0 }
 0x5fd   :  { %v4727_v13 = vadd.f32 %v4726_v15, %v4713_v16 }
 0x604   :  { %v4682_v59 = vpop.f32.mrf.mxu1 }
 0x605   :  { %v4683_v1 = vadd.f32 %v4682_v59, %v4669_v58 }
 0x607   :  { %v4743_v5 = vmax.f32 %v4683_v1, 0.0 }
 0x60c   :  { %v4684_v3 = vpop.f32.mrf.mxu1 }
 0x60d   :  { %v4685_v4 = vadd.f32 %v4684_v3, %v4671_v0 }
 0x60f   :  { %v4745_v6 = vmax.f32 %v4685_v4, 0.0 }
 0x611   :  { %v4747_v9 = vpack.c.bf16 %v4745_v6, %v4743_v5 }
 0x613   :  { %4889 = vmatmul.bf16.vlgmr.msrb.gmra.mxu2 %v4747_v9 }
 0x614   :  { %v4738_v44 = vpop.f32.mrf.mxu1 }
 0x615   :  { %v4739_v11 = vadd.f32 %v4738_v44, %v4725_v17 }
 0x617   :  { %v4744_v23 = vmax.f32 %v4739_v11, 0.0 }
 0x61c   :  { %v4740_v18 = vpop.f32.mrf.mxu1 }
 0x61d   :  { %v4741_v34 = vadd.f32 %v4740_v18, %v4727_v13 }
 0x61f   :  { %v4746_v20 = vmax.f32 %v4741_v34, 0.0 }
 0x621   :  { %v4748_v21 = vpack.c.bf16 %v4746_v20, %v4744_v23 }
 0x623   :  { %4903 = vmatmul.bf16.vlgmr.msrb.gmra.mxu3 %v4748_v21 }
 0x696   :  { %v4890_v22 = vpop.f32.mrf.mxu2 }
 0x697   :  { %v4891_v27 = vadd.f32 %v7827_v26, %v4890_v22 }
 0x69e   :  { %v4892_v31 = vpop.f32.mrf.mxu2 }
 0x69f   :  { %v4893_v32 = vadd.f32 %v7827_v26, %v4892_v31 }
 0x6a6   :  { %v4904_v28 = vpop.f32.mrf.mxu3 }
 0x6a7   :  { %v4905_v36 = vadd.f32 %v4904_v28, %v4891_v27 }
 0x6a9   :  { %4909 = vst [vmem:[%s8462_s28] sm:$0xff] %v4905_v36 }
 0x6ae   :  { %v4906_v29 = vpop.f32.mrf.mxu3 }
 0x6af   :  { %v4907_v24 = vadd.f32 %v4906_v29, %v4893_v32 }
 0x6b1   :  { %4910 = vst [vmem:[%s8462_s28 + $0x8] sm:$0xff] %v4907_v24 }
 0x6b2   :  { %4919 = vsyncpa [#allocation3], 1 }
 0x6b3   :  { %4920 = vsyncpa [#allocation5], 1 }
 0x6b4   :  { %4921 = vsyncpa [#allocation8], 1 }
 0x6b5   :  { %4922 = vsyncpa [#allocation11], 1 }
 0x6b6   :  { %4923 = vsyncpa [#allocation14], 1 }
 0x6b7   :  { %4924 = vsyncpa [#allocation17], 1 }

</bundles_post_ra>
